<compile_context>
chip_gen: v5e
topology: v5e:2x2
jax: 0.10.0
libtpu: 0.0.40
codegen_flags: <defaults>
</compile_context>

<pallas_src>
import jax
import jax.numpy as jnp
from jax.experimental import pallas as pl
from jax.experimental.pallas import tpu as pltpu

VMEM = pltpu.MemorySpace.VMEM
SMEM = pltpu.MemorySpace.SMEM


# ----------------------------- fused Pallas kernel --------------------------

def _l2norm(x):
    # F.normalize(p=2, dim=1, eps=1e-12): x / max(||x||, 1e-12)
    sq = jnp.sum(x * x, axis=1, keepdims=True)
    return x * jax.lax.rsqrt(jnp.maximum(sq, 1e-24))


def _ihbr_fused_kernel(
    users_f_ref, items_f_ref, bundles_f_ref,          # node features
    wqk_ref, wvo_ref,                                  # folded MHA weights (H, D, D)
    dnn_ub_w_ref, dnn_ub_b_ref,                        # dnns_ub[0]
    att_b_w_ref,                                       # Att(emb) weight row, (1, D)
    pred_w1_ref, pred_b1_ref, pred_w2t_ref,            # PredictLayer (w1 as (9, D, 8))
    ab_i_ref, bi_avg_ref, ui_avg_ref, ub_avg_ref, ub_graph_ref,   # graphs
    sel_ub_ref,                                        # merged one-hot selector
    att_b_bias_ref, pred_b2_ref,                       # (1,1) scalars in SMEM
    out_ref,
):
    f32 = jnp.float32
    relu = lambda t: jnp.maximum(t, 0.0)

    items_feat = items_f_ref[...]                      # (I, D)
    ni = items_feat.shape[0]
    n_heads = wqk_ref.shape[0]
    bp = sel_ub_ref.shape[0] // 2

    # -------------------- Intention --------------------
    # stacked (A_i; B_i) propagation: one MXU op, free sublane split (I % 8 == 0)
    ab = relu(jnp.dot(ab_i_ref[...], items_feat, preferred_element_type=f32))  # (2I, D)
    items = ab[:ni] + ab[ni:] + items_feat

    # TODO(synk): att_layer.MHAtt source is unavailable; implemented as standard
    # scaled-dot-product multi-head self-attention with the per-head Q/K and V/O
    # projections folded host-side into (D, D) matrices (exact rewrite).
    attn = None
    for h in range(n_heads):                           # unrolled, 8 heads
        tmp = jnp.dot(items, wqk_ref[h], preferred_element_type=f32)           # (I, D)
        s = jax.lax.dot_general(tmp, items, (((1,), (1,)), ((), ())),
                                preferred_element_type=f32)                    # (I, I)
        s = s - jnp.max(s, axis=-1, keepdims=True)
        p = jnp.exp(s)
        p = p * pl.reciprocal(jnp.sum(p, axis=-1, keepdims=True), approx=True)
        vo = jnp.dot(items, wvo_ref[h], preferred_element_type=f32)            # (I, D)
        term = jnp.dot(p, vo, preferred_element_type=f32)
        attn = term if attn is None else attn + term
    items = attn                                                               # (I, D)

    # bi_avg @ items computed once, reused below for b1
    bi_items = relu(jnp.dot(bi_avg_ref[...], items, preferred_element_type=f32))
    bundles = bi_items + bundles_f_ref[...]
    users = (relu(jnp.dot(ui_avg_ref[...], items, preferred_element_type=f32))
             + relu(jnp.dot(ub_avg_ref[...], bundles, preferred_element_type=f32))
             + users_f_ref[...])

    # -------------------- NPPT (layers = 1; Dropout = identity / eval) ------
    # (features_ui / att_i branch is dead code for the model output and removed)
    f_ub0 = jnp.concatenate([users, bundles], axis=0)          # sublane concat (U % 8 == 0)
    prop = jnp.dot(ub_graph_ref[...], f_ub0, preferred_element_type=f32)
    f_ub = relu(jnp.dot(prop, dnn_ub_w_ref[...], preferred_element_type=f32)
                + dnn_ub_b_ref[...])                            # (U+B, D)

    b1 = _l2norm(bi_items)
    x = jnp.concatenate([users, b1], axis=0)                    # (U+B, D)

    # TODO(synk): att_layer.Att source is unavailable; implemented as per-view
    # score = view @ w + bias, softmax over the 2 stacked views, weighted sum.
    w_row = att_b_w_ref[...]                                    # (1, D)
    bias = att_b_bias_ref[0, 0]
    sa = jnp.sum(f_ub0 * w_row, axis=1, keepdims=True) + bias   # VPU lane reduce
    sb = jnp.sum(x * w_row, axis=1, keepdims=True) + bias
    m = jnp.maximum(sa, sb)
    ea = jnp.exp(sa - m)
    eb = jnp.exp(sb - m)
    inv = pl.reciprocal(ea + eb, approx=True)
    ub_att = (ea * f_ub0 + eb * x) * inv                        # (U+B, D)

    # joint L2-norm of the virtual [f_ub | ub_att] row: shared rsqrt, slabs separate
    sq = (jnp.sum(f_ub * f_ub, axis=1, keepdims=True)
          + jnp.sum(ub_att * ub_att, axis=1, keepdims=True))
    nrm = jax.lax.rsqrt(jnp.maximum(sq, 1e-24))
    slabs = (f_ub0, f_ub * nrm, ub_att * nrm)                   # all_ub = [s0 | s1 | s2]

    # -------------------- gather + predict --------------------
    # merged selector: one gather matmul per slab, free sublane split at bp
    sel = sel_ub_ref[...]                                       # (2*Bp, U+B)
    hdn = pred_b1_ref[...]                                      # (1, 8), broadcasts
    for k in range(3):
        gk = jnp.dot(sel, slabs[k], preferred_element_type=f32)  # (2*Bp, D)
        u_k = gk[:bp]
        b_k = gk[bp:]
        hdn = (hdn
               + jnp.dot(b_k * u_k, pred_w1_ref[k],     preferred_element_type=f32)
               + jnp.dot(b_k,       pred_w1_ref[3 + k], preferred_element_type=f32)
               + jnp.dot(u_k,       pred_w1_ref[6 + k], preferred_element_type=f32))
    hdn = relu(hdn)                                             # (Bp, 8)

    # lane-dense (1, Bp) output row: pred^T = w2^T · hdn^T + b2
    out_ref[...] = (jax.lax.dot_general(pred_w2t_ref[...], hdn,
                                        (((1,), (1,)), ((), ())),
                                        preferred_element_type=f32)
                    + pred_b2_ref[0, 0])


def ihbr_forward(p, g, users_idx, bundles_idx, *, n_heads=8):
    num_users = p["users_feature"].shape[0]
    num_bundles = p["bundles_feature"].shape[0]
    emb = p["users_feature"].shape[1]
    rows = num_users + num_bundles
    batch = users_idx.shape[0]
    pad = (-batch) % 8                          # sublane-align the predict batch
    pbatch = batch + pad

    # ----- host-side algebraic folds (tiny; traced once under jit) -----
    dh = emb // n_heads
    scale = 1.0 / (dh ** 0.5)
    wq, wk, wv, wo = p["wq"], p["wk"], p["wv"], p["wo"]
    wqk = jnp.stack([(wq[:, h * dh:(h + 1) * dh] @ wk[:, h * dh:(h + 1) * dh].T) * scale
                     for h in range(n_heads)])                  # (H, D, D)
    wvo = jnp.stack([wv[:, h * dh:(h + 1) * dh] @ wo[h * dh:(h + 1) * dh, :]
                     for h in range(n_heads)])                  # (H, D, D)

    ab_i = jnp.concatenate([g["A_i"], g["B_i"]], axis=0)        # (2I, I)
    pred_w1_blocks = p["pred_w1"].reshape(9, emb, 8)            # row-wise (D, 8) blocks

    sel_u = jax.nn.one_hot(users_idx, rows, dtype=jnp.float32)
    sel_b = jax.nn.one_hot(bundles_idx + num_users, rows, dtype=jnp.float32)
    if pad:
        zpad = jnp.zeros((pad, rows), jnp.float32)
        sel_u = jnp.concatenate([sel_u, zpad], axis=0)
        sel_b = jnp.concatenate([sel_b, zpad], axis=0)
    sel_ub = jnp.concatenate([sel_u, sel_b], axis=0)            # (2*Bp, rows)

    vspec = pl.BlockSpec(memory_space=VMEM)
    sspec = pl.BlockSpec(memory_space=SMEM)

    out = pl.pallas_call(
        _ihbr_fused_kernel,
        out_shape=jax.ShapeDtypeStruct((1, pbatch), jnp.float32),
        in_specs=[vspec] * 17 + [sspec] * 2,
        out_specs=vspec,
    )(
        p["users_feature"], p["items_feature"], p["bundles_feature"],
        wqk, wvo,
        p["dnn_ub_w"], p["dnn_ub_b"],
        p["att_b_w"].T,                                         # (1, D)
        pred_w1_blocks, p["pred_b1"], p["pred_w2"].T,           # (1, 8)
        ab_i, g["bi_avg"], g["ui_avg"], g["ub_avg"], g["ub_graph"],
        sel_ub,
        p["att_b_bias"], p["pred_b2"],
    )
    return out[0, :batch][:, None]                              # (batch, 1)


# ----------------------------- model wiring (host / __init__) ---------------

def row_norm(gm, eps=1e-8):
    return gm / (gm.sum(axis=1, keepdims=True) + eps)


def laplace(gm, eps=1e-8):
    r = 1.0 / (jnp.sqrt(gm.sum(axis=1, keepdims=True)) + eps)
    c = 1.0 / (jnp.sqrt(gm.sum(axis=0, keepdims=True)) + eps)
    return r * gm * c


def xavier_normal(key, shape):
    std = (2.0 / (shape[0] + shape[1])) ** 0.5
    return std * jax.random.normal(key, shape, jnp.float32)


def linear_init(key, fan_in, fan_out):
    k1, k2 = jax.random.split(key)
    bound = 1.0 / (fan_in ** 0.5)
    w = jax.random.uniform(k1, (fan_in, fan_out), jnp.float32, -bound, bound)
    b = jax.random.uniform(k2, (1, fan_out), jnp.float32, -bound, bound)
    return w, b


def build_model(key, num_users, num_items, num_bundles, emb):
    keys = jax.random.split(key, 20)
    p = {}
    p["users_feature"] = xavier_normal(keys[0], (num_users, emb))
    p["items_feature"] = xavier_normal(keys[1], (num_items, emb))
    p["bundles_feature"] = xavier_normal(keys[2], (num_bundles, emb))
    # MHAtt(8, emb, emb, emb) projections (folded host-side in ihbr_forward)
    p["wq"], _ = linear_init(keys[3], emb, emb)
    p["wk"], _ = linear_init(keys[4], emb, emb)
    p["wv"], _ = linear_init(keys[5], emb, emb)
    p["wo"], _ = linear_init(keys[6], emb, emb)
    # dnns (layers = 1): Linear(emb -> emb)
    p["dnn_ub_w"], p["dnn_ub_b"] = linear_init(keys[7], emb, emb)
    p["dnn_ui_w"], p["dnn_ui_b"] = linear_init(keys[8], emb, emb)   # dead branch
    # Att(emb) pooling weights
    p["att_b_w"], p["att_b_bias"] = linear_init(keys[9], emb, 1)
    p["att_i_w"], p["att_i_bias"] = linear_init(keys[10], emb, 1)   # dead branch
    # PredictLayer(3*3*emb): Linear(9*emb, 8) -> ReLU -> Linear(8, 1)
    p["pred_w1"], p["pred_b1"] = linear_init(keys[11], 9 * emb, 8)
    p["pred_w2"], p["pred_b2"] = linear_init(keys[12], 8, 1)

    # synthetic interaction graphs (dense, deterministic)
    ub = jax.random.bernoulli(keys[13], 0.4, (num_users, num_bundles)).astype(jnp.float32)
    ui = jax.random.bernoulli(keys[14], 0.4, (num_users, num_items)).astype(jnp.float32)
    bi = jax.random.bernoulli(keys[15], 0.4, (num_bundles, num_items)).astype(jnp.float32)

    g = {}
    g["A_i"] = row_norm(ui.T @ ui)
    g["B_i"] = row_norm(bi.T @ bi)
    ub_norm = row_norm(ub)
    bu_norm = row_norm(ub.T)
    ui_norm = row_norm(ui)
    iu_norm = row_norm(ui.T)
    bi_norm = row_norm(bi)
    ib_norm = row_norm(bi.T)
    g["bi_avg"] = bi_norm
    g["ui_avg"] = ui_norm
    g["ub_avg"] = ub_norm
    g["ib_avg"] = ib_norm                                           # dead branch
    eye_u = jnp.eye(num_users, dtype=jnp.float32)
    eye_b = jnp.eye(num_bundles, dtype=jnp.float32)
    eye_i = jnp.eye(num_items, dtype=jnp.float32)
    g["ub_graph"] = laplace(jnp.block([[eye_u, ub_norm], [bu_norm, eye_b]]))
    g["ui_graph"] = laplace(jnp.block([[eye_u, ui_norm], [iu_norm, eye_i]]))  # dead branch
    return p, g


if __name__ == "__main__":
    NUM_USERS, NUM_ITEMS, NUM_BUNDLES = 24, 40, 16
    EMB = 32          # divisible by 8 heads
    BATCH = 6

    key = jax.random.PRNGKey(0)
    k_model, k_u, k_b = jax.random.split(key, 3)
    params, graphs = build_model(k_model, NUM_USERS, NUM_ITEMS, NUM_BUNDLES, EMB)

    users_idx = jax.random.randint(k_u, (BATCH,), 0, NUM_USERS)
    bundles_idx = jax.random.randint(k_b, (BATCH,), 0, NUM_BUNDLES)

    forward = jax.jit(ihbr_forward)
    pred = forward(params, graphs, users_idx, bundles_idx)
    pred = jax.block_until_ready(pred)
    assert pred.shape == (BATCH, 1)
    assert bool(jnp.all(jnp.isfinite(pred)))
    print("KERNEL_OK")
</pallas_src>

<mosaic_0001>
module attributes {stable_mosaic.version = 11 : i64} {
  func.func @_ihbr_fused_kernel(%arg0: memref<24x32xf32, #tpu.memory_space<vmem>>, %arg1: memref<40x32xf32, #tpu.memory_space<vmem>>, %arg2: memref<16x32xf32, #tpu.memory_space<vmem>>, %arg3: memref<8x32x32xf32, #tpu.memory_space<vmem>>, %arg4: memref<8x32x32xf32, #tpu.memory_space<vmem>>, %arg5: memref<32x32xf32, #tpu.memory_space<vmem>>, %arg6: memref<1x32xf32, #tpu.memory_space<vmem>>, %arg7: memref<1x32xf32, #tpu.memory_space<vmem>>, %arg8: memref<9x32x8xf32, #tpu.memory_space<vmem>>, %arg9: memref<1x8xf32, #tpu.memory_space<vmem>>, %arg10: memref<1x8xf32, #tpu.memory_space<vmem>>, %arg11: memref<80x40xf32, #tpu.memory_space<vmem>>, %arg12: memref<16x40xf32, #tpu.memory_space<vmem>>, %arg13: memref<24x40xf32, #tpu.memory_space<vmem>>, %arg14: memref<24x16xf32, #tpu.memory_space<vmem>>, %arg15: memref<40x40xf32, #tpu.memory_space<vmem>>, %arg16: memref<16x40xf32, #tpu.memory_space<vmem>>, %arg17: memref<1x1xf32, #tpu.memory_space<smem>>, %arg18: memref<1x1xf32, #tpu.memory_space<smem>>, %arg19: memref<1x8xf32, #tpu.memory_space<vmem>>) attributes {dimension_semantics = [], scalar_prefetch = 0 : i64, scratch_operands = 0 : i64, tpu.core_type = #tpu.core_type<tc>} {
    %c0 = arith.constant 0 : index
    %c0_0 = arith.constant 0 : index
    %0 = vector.load %arg1[%c0, %c0_0] : memref<40x32xf32, #tpu.memory_space<vmem>>, vector<40x32xf32>
    %c0_1 = arith.constant 0 : index
    %c0_2 = arith.constant 0 : index
    %1 = vector.load %arg11[%c0_1, %c0_2] : memref<80x40xf32, #tpu.memory_space<vmem>>, vector<80x40xf32>
    %cst = arith.constant dense<0.000000e+00> : vector<80x32xf32>
    %2 = tpu.matmul %1, %0, %cst {dimension_numbers = #tpu.dot_dimension_numbers<[1], [0], [0], [1], [0, 0, 1, 1], [], []>} : vector<80x40xf32>, vector<40x32xf32>, vector<80x32xf32> -> vector<80x32xf32>
    %cst_3 = arith.constant 0.000000e+00 : f32
    %3 = vector.broadcast %cst_3 : f32 to vector<80x32xf32>
    %4 = arith.maximumf %2, %3 : vector<80x32xf32>
    %5 = vector.extract_strided_slice %4 {offsets = [0, 0], sizes = [40, 32], strides = [1, 1]} : vector<80x32xf32> to vector<40x32xf32>
    %6 = vector.extract_strided_slice %4 {offsets = [40, 0], sizes = [40, 32], strides = [1, 1]} : vector<80x32xf32> to vector<40x32xf32>
    %7 = arith.addf %5, %6 : vector<40x32xf32>
    %8 = arith.addf %7, %0 : vector<40x32xf32>
    %c0_4 = arith.constant 0 : index
    %c0_5 = arith.constant 0 : index
    %c0_6 = arith.constant 0 : index
    %9 = vector.load %arg3[%c0_4, %c0_5, %c0_6] : memref<8x32x32xf32, #tpu.memory_space<vmem>>, vector<1x32x32xf32>
    %10 = vector.shape_cast %9 : vector<1x32x32xf32> to vector<32x32xf32>
    %cst_7 = arith.constant dense<0.000000e+00> : vector<40x32xf32>
    %11 = tpu.matmul %8, %10, %cst_7 {dimension_numbers = #tpu.dot_dimension_numbers<[1], [0], [0], [1], [0, 0, 1, 1], [], []>} : vector<40x32xf32>, vector<32x32xf32>, vector<40x32xf32> -> vector<40x32xf32>
    %cst_8 = arith.constant dense<0.000000e+00> : vector<40x40xf32>
    %12 = tpu.matmul %11, %8, %cst_8 {dimension_numbers = #tpu.dot_dimension_numbers<[1], [1], [0], [0], [0, 0, 1, 0], [], []>} : vector<40x32xf32>, vector<40x32xf32>, vector<40x40xf32> -> vector<40x40xf32>
    %cst_9 = arith.constant dense<0xFF800000> : vector<40xf32>
    %13 = vector.multi_reduction <maximumf>, %12, %cst_9 [1] : vector<40x40xf32> to vector<40xf32>
    %14 = vector.shape_cast %13 : vector<40xf32> to vector<40x1xf32>
    %15 = vector.broadcast %14 : vector<40x1xf32> to vector<40x40xf32>
    %16 = arith.subf %12, %15 : vector<40x40xf32>
    %17 = math.exp %16 : vector<40x40xf32>
    %cst_10 = arith.constant dense<0.000000e+00> : vector<40xf32>
    %18 = vector.multi_reduction <add>, %17, %cst_10 [1] : vector<40x40xf32> to vector<40xf32>
    %19 = vector.shape_cast %18 : vector<40xf32> to vector<40x1xf32>
    %20 = tpu.reciprocal %19 {approx = true} : vector<40x1xf32> -> vector<40x1xf32>
    %21 = vector.broadcast %20 : vector<40x1xf32> to vector<40x40xf32>
    %22 = arith.mulf %17, %21 : vector<40x40xf32>
    %c0_11 = arith.constant 0 : index
    %c0_12 = arith.constant 0 : index
    %c0_13 = arith.constant 0 : index
    %23 = vector.load %arg4[%c0_11, %c0_12, %c0_13] : memref<8x32x32xf32, #tpu.memory_space<vmem>>, vector<1x32x32xf32>
    %24 = vector.shape_cast %23 : vector<1x32x32xf32> to vector<32x32xf32>
    %cst_14 = arith.constant dense<0.000000e+00> : vector<40x32xf32>
    %25 = tpu.matmul %8, %24, %cst_14 {dimension_numbers = #tpu.dot_dimension_numbers<[1], [0], [0], [1], [0, 0, 1, 1], [], []>} : vector<40x32xf32>, vector<32x32xf32>, vector<40x32xf32> -> vector<40x32xf32>
    %cst_15 = arith.constant dense<0.000000e+00> : vector<40x32xf32>
    %26 = tpu.matmul %22, %25, %cst_15 {dimension_numbers = #tpu.dot_dimension_numbers<[1], [0], [0], [1], [0, 0, 1, 1], [], []>} : vector<40x40xf32>, vector<40x32xf32>, vector<40x32xf32> -> vector<40x32xf32>
    %c1 = arith.constant 1 : index
    %c0_16 = arith.constant 0 : index
    %c0_17 = arith.constant 0 : index
    %27 = vector.load %arg3[%c1, %c0_16, %c0_17] : memref<8x32x32xf32, #tpu.memory_space<vmem>>, vector<1x32x32xf32>
    %28 = vector.shape_cast %27 : vector<1x32x32xf32> to vector<32x32xf32>
    %cst_18 = arith.constant dense<0.000000e+00> : vector<40x32xf32>
    %29 = tpu.matmul %8, %28, %cst_18 {dimension_numbers = #tpu.dot_dimension_numbers<[1], [0], [0], [1], [0, 0, 1, 1], [], []>} : vector<40x32xf32>, vector<32x32xf32>, vector<40x32xf32> -> vector<40x32xf32>
    %cst_19 = arith.constant dense<0.000000e+00> : vector<40x40xf32>
    %30 = tpu.matmul %29, %8, %cst_19 {dimension_numbers = #tpu.dot_dimension_numbers<[1], [1], [0], [0], [0, 0, 1, 0], [], []>} : vector<40x32xf32>, vector<40x32xf32>, vector<40x40xf32> -> vector<40x40xf32>
    %cst_20 = arith.constant dense<0xFF800000> : vector<40xf32>
    %31 = vector.multi_reduction <maximumf>, %30, %cst_20 [1] : vector<40x40xf32> to vector<40xf32>
    %32 = vector.shape_cast %31 : vector<40xf32> to vector<40x1xf32>
    %33 = vector.broadcast %32 : vector<40x1xf32> to vector<40x40xf32>
    %34 = arith.subf %30, %33 : vector<40x40xf32>
    %35 = math.exp %34 : vector<40x40xf32>
    %cst_21 = arith.constant dense<0.000000e+00> : vector<40xf32>
    %36 = vector.multi_reduction <add>, %35, %cst_21 [1] : vector<40x40xf32> to vector<40xf32>
    %37 = vector.shape_cast %36 : vector<40xf32> to vector<40x1xf32>
    %38 = tpu.reciprocal %37 {approx = true} : vector<40x1xf32> -> vector<40x1xf32>
    %39 = vector.broadcast %38 : vector<40x1xf32> to vector<40x40xf32>
    %40 = arith.mulf %35, %39 : vector<40x40xf32>
    %c1_22 = arith.constant 1 : index
    %c0_23 = arith.constant 0 : index
    %c0_24 = arith.constant 0 : index
    %41 = vector.load %arg4[%c1_22, %c0_23, %c0_24] : memref<8x32x32xf32, #tpu.memory_space<vmem>>, vector<1x32x32xf32>
    %42 = vector.shape_cast %41 : vector<1x32x32xf32> to vector<32x32xf32>
    %cst_25 = arith.constant dense<0.000000e+00> : vector<40x32xf32>
    %43 = tpu.matmul %8, %42, %cst_25 {dimension_numbers = #tpu.dot_dimension_numbers<[1], [0], [0], [1], [0, 0, 1, 1], [], []>} : vector<40x32xf32>, vector<32x32xf32>, vector<40x32xf32> -> vector<40x32xf32>
    %cst_26 = arith.constant dense<0.000000e+00> : vector<40x32xf32>
    %44 = tpu.matmul %40, %43, %cst_26 {dimension_numbers = #tpu.dot_dimension_numbers<[1], [0], [0], [1], [0, 0, 1, 1], [], []>} : vector<40x40xf32>, vector<40x32xf32>, vector<40x32xf32> -> vector<40x32xf32>
    %45 = arith.addf %26, %44 : vector<40x32xf32>
    %c2 = arith.constant 2 : index
    %c0_27 = arith.constant 0 : index
    %c0_28 = arith.constant 0 : index
    %46 = vector.load %arg3[%c2, %c0_27, %c0_28] : memref<8x32x32xf32, #tpu.memory_space<vmem>>, vector<1x32x32xf32>
    %47 = vector.shape_cast %46 : vector<1x32x32xf32> to vector<32x32xf32>
    %cst_29 = arith.constant dense<0.000000e+00> : vector<40x32xf32>
    %48 = tpu.matmul %8, %47, %cst_29 {dimension_numbers = #tpu.dot_dimension_numbers<[1], [0], [0], [1], [0, 0, 1, 1], [], []>} : vector<40x32xf32>, vector<32x32xf32>, vector<40x32xf32> -> vector<40x32xf32>
    %cst_30 = arith.constant dense<0.000000e+00> : vector<40x40xf32>
    %49 = tpu.matmul %48, %8, %cst_30 {dimension_numbers = #tpu.dot_dimension_numbers<[1], [1], [0], [0], [0, 0, 1, 0], [], []>} : vector<40x32xf32>, vector<40x32xf32>, vector<40x40xf32> -> vector<40x40xf32>
    %cst_31 = arith.constant dense<0xFF800000> : vector<40xf32>
    %50 = vector.multi_reduction <maximumf>, %49, %cst_31 [1] : vector<40x40xf32> to vector<40xf32>
    %51 = vector.shape_cast %50 : vector<40xf32> to vector<40x1xf32>
    %52 = vector.broadcast %51 : vector<40x1xf32> to vector<40x40xf32>
    %53 = arith.subf %49, %52 : vector<40x40xf32>
    %54 = math.exp %53 : vector<40x40xf32>
    %cst_32 = arith.constant dense<0.000000e+00> : vector<40xf32>
    %55 = vector.multi_reduction <add>, %54, %cst_32 [1] : vector<40x40xf32> to vector<40xf32>
    %56 = vector.shape_cast %55 : vector<40xf32> to vector<40x1xf32>
    %57 = tpu.reciprocal %56 {approx = true} : vector<40x1xf32> -> vector<40x1xf32>
    %58 = vector.broadcast %57 : vector<40x1xf32> to vector<40x40xf32>
    %59 = arith.mulf %54, %58 : vector<40x40xf32>
    %c2_33 = arith.constant 2 : index
    %c0_34 = arith.constant 0 : index
    %c0_35 = arith.constant 0 : index
    %60 = vector.load %arg4[%c2_33, %c0_34, %c0_35] : memref<8x32x32xf32, #tpu.memory_space<vmem>>, vector<1x32x32xf32>
    %61 = vector.shape_cast %60 : vector<1x32x32xf32> to vector<32x32xf32>
    %cst_36 = arith.constant dense<0.000000e+00> : vector<40x32xf32>
    %62 = tpu.matmul %8, %61, %cst_36 {dimension_numbers = #tpu.dot_dimension_numbers<[1], [0], [0], [1], [0, 0, 1, 1], [], []>} : vector<40x32xf32>, vector<32x32xf32>, vector<40x32xf32> -> vector<40x32xf32>
    %cst_37 = arith.constant dense<0.000000e+00> : vector<40x32xf32>
    %63 = tpu.matmul %59, %62, %cst_37 {dimension_numbers = #tpu.dot_dimension_numbers<[1], [0], [0], [1], [0, 0, 1, 1], [], []>} : vector<40x40xf32>, vector<40x32xf32>, vector<40x32xf32> -> vector<40x32xf32>
    %64 = arith.addf %45, %63 : vector<40x32xf32>
    %c3 = arith.constant 3 : index
    %c0_38 = arith.constant 0 : index
    %c0_39 = arith.constant 0 : index
    %65 = vector.load %arg3[%c3, %c0_38, %c0_39] : memref<8x32x32xf32, #tpu.memory_space<vmem>>, vector<1x32x32xf32>
    %66 = vector.shape_cast %65 : vector<1x32x32xf32> to vector<32x32xf32>
    %cst_40 = arith.constant dense<0.000000e+00> : vector<40x32xf32>
    %67 = tpu.matmul %8, %66, %cst_40 {dimension_numbers = #tpu.dot_dimension_numbers<[1], [0], [0], [1], [0, 0, 1, 1], [], []>} : vector<40x32xf32>, vector<32x32xf32>, vector<40x32xf32> -> vector<40x32xf32>
    %cst_41 = arith.constant dense<0.000000e+00> : vector<40x40xf32>
    %68 = tpu.matmul %67, %8, %cst_41 {dimension_numbers = #tpu.dot_dimension_numbers<[1], [1], [0], [0], [0, 0, 1, 0], [], []>} : vector<40x32xf32>, vector<40x32xf32>, vector<40x40xf32> -> vector<40x40xf32>
    %cst_42 = arith.constant dense<0xFF800000> : vector<40xf32>
    %69 = vector.multi_reduction <maximumf>, %68, %cst_42 [1] : vector<40x40xf32> to vector<40xf32>
    %70 = vector.shape_cast %69 : vector<40xf32> to vector<40x1xf32>
    %71 = vector.broadcast %70 : vector<40x1xf32> to vector<40x40xf32>
    %72 = arith.subf %68, %71 : vector<40x40xf32>
    %73 = math.exp %72 : vector<40x40xf32>
    %cst_43 = arith.constant dense<0.000000e+00> : vector<40xf32>
    %74 = vector.multi_reduction <add>, %73, %cst_43 [1] : vector<40x40xf32> to vector<40xf32>
    %75 = vector.shape_cast %74 : vector<40xf32> to vector<40x1xf32>
    %76 = tpu.reciprocal %75 {approx = true} : vector<40x1xf32> -> vector<40x1xf32>
    %77 = vector.broadcast %76 : vector<40x1xf32> to vector<40x40xf32>
    %78 = arith.mulf %73, %77 : vector<40x40xf32>
    %c3_44 = arith.constant 3 : index
    %c0_45 = arith.constant 0 : index
    %c0_46 = arith.constant 0 : index
    %79 = vector.load %arg4[%c3_44, %c0_45, %c0_46] : memref<8x32x32xf32, #tpu.memory_space<vmem>>, vector<1x32x32xf32>
    %80 = vector.shape_cast %79 : vector<1x32x32xf32> to vector<32x32xf32>
    %cst_47 = arith.constant dense<0.000000e+00> : vector<40x32xf32>
    %81 = tpu.matmul %8, %80, %cst_47 {dimension_numbers = #tpu.dot_dimension_numbers<[1], [0], [0], [1], [0, 0, 1, 1], [], []>} : vector<40x32xf32>, vector<32x32xf32>, vector<40x32xf32> -> vector<40x32xf32>
    %cst_48 = arith.constant dense<0.000000e+00> : vector<40x32xf32>
    %82 = tpu.matmul %78, %81, %cst_48 {dimension_numbers = #tpu.dot_dimension_numbers<[1], [0], [0], [1], [0, 0, 1, 1], [], []>} : vector<40x40xf32>, vector<40x32xf32>, vector<40x32xf32> -> vector<40x32xf32>
    %83 = arith.addf %64, %82 : vector<40x32xf32>
    %c4 = arith.constant 4 : index
    %c0_49 = arith.constant 0 : index
    %c0_50 = arith.constant 0 : index
    %84 = vector.load %arg3[%c4, %c0_49, %c0_50] : memref<8x32x32xf32, #tpu.memory_space<vmem>>, vector<1x32x32xf32>
    %85 = vector.shape_cast %84 : vector<1x32x32xf32> to vector<32x32xf32>
    %cst_51 = arith.constant dense<0.000000e+00> : vector<40x32xf32>
    %86 = tpu.matmul %8, %85, %cst_51 {dimension_numbers = #tpu.dot_dimension_numbers<[1], [0], [0], [1], [0, 0, 1, 1], [], []>} : vector<40x32xf32>, vector<32x32xf32>, vector<40x32xf32> -> vector<40x32xf32>
    %cst_52 = arith.constant dense<0.000000e+00> : vector<40x40xf32>
    %87 = tpu.matmul %86, %8, %cst_52 {dimension_numbers = #tpu.dot_dimension_numbers<[1], [1], [0], [0], [0, 0, 1, 0], [], []>} : vector<40x32xf32>, vector<40x32xf32>, vector<40x40xf32> -> vector<40x40xf32>
    %cst_53 = arith.constant dense<0xFF800000> : vector<40xf32>
    %88 = vector.multi_reduction <maximumf>, %87, %cst_53 [1] : vector<40x40xf32> to vector<40xf32>
    %89 = vector.shape_cast %88 : vector<40xf32> to vector<40x1xf32>
    %90 = vector.broadcast %89 : vector<40x1xf32> to vector<40x40xf32>
    %91 = arith.subf %87, %90 : vector<40x40xf32>
    %92 = math.exp %91 : vector<40x40xf32>
    %cst_54 = arith.constant dense<0.000000e+00> : vector<40xf32>
    %93 = vector.multi_reduction <add>, %92, %cst_54 [1] : vector<40x40xf32> to vector<40xf32>
    %94 = vector.shape_cast %93 : vector<40xf32> to vector<40x1xf32>
    %95 = tpu.reciprocal %94 {approx = true} : vector<40x1xf32> -> vector<40x1xf32>
    %96 = vector.broadcast %95 : vector<40x1xf32> to vector<40x40xf32>
    %97 = arith.mulf %92, %96 : vector<40x40xf32>
    %c4_55 = arith.constant 4 : index
    %c0_56 = arith.constant 0 : index
    %c0_57 = arith.constant 0 : index
    %98 = vector.load %arg4[%c4_55, %c0_56, %c0_57] : memref<8x32x32xf32, #tpu.memory_space<vmem>>, vector<1x32x32xf32>
    %99 = vector.shape_cast %98 : vector<1x32x32xf32> to vector<32x32xf32>
    %cst_58 = arith.constant dense<0.000000e+00> : vector<40x32xf32>
    %100 = tpu.matmul %8, %99, %cst_58 {dimension_numbers = #tpu.dot_dimension_numbers<[1], [0], [0], [1], [0, 0, 1, 1], [], []>} : vector<40x32xf32>, vector<32x32xf32>, vector<40x32xf32> -> vector<40x32xf32>
    %cst_59 = arith.constant dense<0.000000e+00> : vector<40x32xf32>
    %101 = tpu.matmul %97, %100, %cst_59 {dimension_numbers = #tpu.dot_dimension_numbers<[1], [0], [0], [1], [0, 0, 1, 1], [], []>} : vector<40x40xf32>, vector<40x32xf32>, vector<40x32xf32> -> vector<40x32xf32>
    %102 = arith.addf %83, %101 : vector<40x32xf32>
    %c5 = arith.constant 5 : index
    %c0_60 = arith.constant 0 : index
    %c0_61 = arith.constant 0 : index
    %103 = vector.load %arg3[%c5, %c0_60, %c0_61] : memref<8x32x32xf32, #tpu.memory_space<vmem>>, vector<1x32x32xf32>
    %104 = vector.shape_cast %103 : vector<1x32x32xf32> to vector<32x32xf32>
    %cst_62 = arith.constant dense<0.000000e+00> : vector<40x32xf32>
    %105 = tpu.matmul %8, %104, %cst_62 {dimension_numbers = #tpu.dot_dimension_numbers<[1], [0], [0], [1], [0, 0, 1, 1], [], []>} : vector<40x32xf32>, vector<32x32xf32>, vector<40x32xf32> -> vector<40x32xf32>
    %cst_63 = arith.constant dense<0.000000e+00> : vector<40x40xf32>
    %106 = tpu.matmul %105, %8, %cst_63 {dimension_numbers = #tpu.dot_dimension_numbers<[1], [1], [0], [0], [0, 0, 1, 0], [], []>} : vector<40x32xf32>, vector<40x32xf32>, vector<40x40xf32> -> vector<40x40xf32>
    %cst_64 = arith.constant dense<0xFF800000> : vector<40xf32>
    %107 = vector.multi_reduction <maximumf>, %106, %cst_64 [1] : vector<40x40xf32> to vector<40xf32>
    %108 = vector.shape_cast %107 : vector<40xf32> to vector<40x1xf32>
    %109 = vector.broadcast %108 : vector<40x1xf32> to vector<40x40xf32>
    %110 = arith.subf %106, %109 : vector<40x40xf32>
    %111 = math.exp %110 : vector<40x40xf32>
    %cst_65 = arith.constant dense<0.000000e+00> : vector<40xf32>
    %112 = vector.multi_reduction <add>, %111, %cst_65 [1] : vector<40x40xf32> to vector<40xf32>
    %113 = vector.shape_cast %112 : vector<40xf32> to vector<40x1xf32>
    %114 = tpu.reciprocal %113 {approx = true} : vector<40x1xf32> -> vector<40x1xf32>
    %115 = vector.broadcast %114 : vector<40x1xf32> to vector<40x40xf32>
    %116 = arith.mulf %111, %115 : vector<40x40xf32>
    %c5_66 = arith.constant 5 : index
    %c0_67 = arith.constant 0 : index
    %c0_68 = arith.constant 0 : index
    %117 = vector.load %arg4[%c5_66, %c0_67, %c0_68] : memref<8x32x32xf32, #tpu.memory_space<vmem>>, vector<1x32x32xf32>
    %118 = vector.shape_cast %117 : vector<1x32x32xf32> to vector<32x32xf32>
    %cst_69 = arith.constant dense<0.000000e+00> : vector<40x32xf32>
    %119 = tpu.matmul %8, %118, %cst_69 {dimension_numbers = #tpu.dot_dimension_numbers<[1], [0], [0], [1], [0, 0, 1, 1], [], []>} : vector<40x32xf32>, vector<32x32xf32>, vector<40x32xf32> -> vector<40x32xf32>
    %cst_70 = arith.constant dense<0.000000e+00> : vector<40x32xf32>
    %120 = tpu.matmul %116, %119, %cst_70 {dimension_numbers = #tpu.dot_dimension_numbers<[1], [0], [0], [1], [0, 0, 1, 1], [], []>} : vector<40x40xf32>, vector<40x32xf32>, vector<40x32xf32> -> vector<40x32xf32>
    %121 = arith.addf %102, %120 : vector<40x32xf32>
    %c6 = arith.constant 6 : index
    %c0_71 = arith.constant 0 : index
    %c0_72 = arith.constant 0 : index
    %122 = vector.load %arg3[%c6, %c0_71, %c0_72] : memref<8x32x32xf32, #tpu.memory_space<vmem>>, vector<1x32x32xf32>
    %123 = vector.shape_cast %122 : vector<1x32x32xf32> to vector<32x32xf32>
    %cst_73 = arith.constant dense<0.000000e+00> : vector<40x32xf32>
    %124 = tpu.matmul %8, %123, %cst_73 {dimension_numbers = #tpu.dot_dimension_numbers<[1], [0], [0], [1], [0, 0, 1, 1], [], []>} : vector<40x32xf32>, vector<32x32xf32>, vector<40x32xf32> -> vector<40x32xf32>
    %cst_74 = arith.constant dense<0.000000e+00> : vector<40x40xf32>
    %125 = tpu.matmul %124, %8, %cst_74 {dimension_numbers = #tpu.dot_dimension_numbers<[1], [1], [0], [0], [0, 0, 1, 0], [], []>} : vector<40x32xf32>, vector<40x32xf32>, vector<40x40xf32> -> vector<40x40xf32>
    %cst_75 = arith.constant dense<0xFF800000> : vector<40xf32>
    %126 = vector.multi_reduction <maximumf>, %125, %cst_75 [1] : vector<40x40xf32> to vector<40xf32>
    %127 = vector.shape_cast %126 : vector<40xf32> to vector<40x1xf32>
    %128 = vector.broadcast %127 : vector<40x1xf32> to vector<40x40xf32>
    %129 = arith.subf %125, %128 : vector<40x40xf32>
    %130 = math.exp %129 : vector<40x40xf32>
    %cst_76 = arith.constant dense<0.000000e+00> : vector<40xf32>
    %131 = vector.multi_reduction <add>, %130, %cst_76 [1] : vector<40x40xf32> to vector<40xf32>
    %132 = vector.shape_cast %131 : vector<40xf32> to vector<40x1xf32>
    %133 = tpu.reciprocal %132 {approx = true} : vector<40x1xf32> -> vector<40x1xf32>
    %134 = vector.broadcast %133 : vector<40x1xf32> to vector<40x40xf32>
    %135 = arith.mulf %130, %134 : vector<40x40xf32>
    %c6_77 = arith.constant 6 : index
    %c0_78 = arith.constant 0 : index
    %c0_79 = arith.constant 0 : index
    %136 = vector.load %arg4[%c6_77, %c0_78, %c0_79] : memref<8x32x32xf32, #tpu.memory_space<vmem>>, vector<1x32x32xf32>
    %137 = vector.shape_cast %136 : vector<1x32x32xf32> to vector<32x32xf32>
    %cst_80 = arith.constant dense<0.000000e+00> : vector<40x32xf32>
    %138 = tpu.matmul %8, %137, %cst_80 {dimension_numbers = #tpu.dot_dimension_numbers<[1], [0], [0], [1], [0, 0, 1, 1], [], []>} : vector<40x32xf32>, vector<32x32xf32>, vector<40x32xf32> -> vector<40x32xf32>
    %cst_81 = arith.constant dense<0.000000e+00> : vector<40x32xf32>
    %139 = tpu.matmul %135, %138, %cst_81 {dimension_numbers = #tpu.dot_dimension_numbers<[1], [0], [0], [1], [0, 0, 1, 1], [], []>} : vector<40x40xf32>, vector<40x32xf32>, vector<40x32xf32> -> vector<40x32xf32>
    %140 = arith.addf %121, %139 : vector<40x32xf32>
    %c7 = arith.constant 7 : index
    %c0_82 = arith.constant 0 : index
    %c0_83 = arith.constant 0 : index
    %141 = vector.load %arg3[%c7, %c0_82, %c0_83] : memref<8x32x32xf32, #tpu.memory_space<vmem>>, vector<1x32x32xf32>
    %142 = vector.shape_cast %141 : vector<1x32x32xf32> to vector<32x32xf32>
    %cst_84 = arith.constant dense<0.000000e+00> : vector<40x32xf32>
    %143 = tpu.matmul %8, %142, %cst_84 {dimension_numbers = #tpu.dot_dimension_numbers<[1], [0], [0], [1], [0, 0, 1, 1], [], []>} : vector<40x32xf32>, vector<32x32xf32>, vector<40x32xf32> -> vector<40x32xf32>
    %cst_85 = arith.constant dense<0.000000e+00> : vector<40x40xf32>
    %144 = tpu.matmul %143, %8, %cst_85 {dimension_numbers = #tpu.dot_dimension_numbers<[1], [1], [0], [0], [0, 0, 1, 0], [], []>} : vector<40x32xf32>, vector<40x32xf32>, vector<40x40xf32> -> vector<40x40xf32>
    %cst_86 = arith.constant dense<0xFF800000> : vector<40xf32>
    %145 = vector.multi_reduction <maximumf>, %144, %cst_86 [1] : vector<40x40xf32> to vector<40xf32>
    %146 = vector.shape_cast %145 : vector<40xf32> to vector<40x1xf32>
    %147 = vector.broadcast %146 : vector<40x1xf32> to vector<40x40xf32>
    %148 = arith.subf %144, %147 : vector<40x40xf32>
    %149 = math.exp %148 : vector<40x40xf32>
    %cst_87 = arith.constant dense<0.000000e+00> : vector<40xf32>
    %150 = vector.multi_reduction <add>, %149, %cst_87 [1] : vector<40x40xf32> to vector<40xf32>
    %151 = vector.shape_cast %150 : vector<40xf32> to vector<40x1xf32>
    %152 = tpu.reciprocal %151 {approx = true} : vector<40x1xf32> -> vector<40x1xf32>
    %153 = vector.broadcast %152 : vector<40x1xf32> to vector<40x40xf32>
    %154 = arith.mulf %149, %153 : vector<40x40xf32>
    %c7_88 = arith.constant 7 : index
    %c0_89 = arith.constant 0 : index
    %c0_90 = arith.constant 0 : index
    %155 = vector.load %arg4[%c7_88, %c0_89, %c0_90] : memref<8x32x32xf32, #tpu.memory_space<vmem>>, vector<1x32x32xf32>
    %156 = vector.shape_cast %155 : vector<1x32x32xf32> to vector<32x32xf32>
    %cst_91 = arith.constant dense<0.000000e+00> : vector<40x32xf32>
    %157 = tpu.matmul %8, %156, %cst_91 {dimension_numbers = #tpu.dot_dimension_numbers<[1], [0], [0], [1], [0, 0, 1, 1], [], []>} : vector<40x32xf32>, vector<32x32xf32>, vector<40x32xf32> -> vector<40x32xf32>
    %cst_92 = arith.constant dense<0.000000e+00> : vector<40x32xf32>
    %158 = tpu.matmul %154, %157, %cst_92 {dimension_numbers = #tpu.dot_dimension_numbers<[1], [0], [0], [1], [0, 0, 1, 1], [], []>} : vector<40x40xf32>, vector<40x32xf32>, vector<40x32xf32> -> vector<40x32xf32>
    %159 = arith.addf %140, %158 : vector<40x32xf32>
    %c0_93 = arith.constant 0 : index
    %c0_94 = arith.constant 0 : index
    %160 = vector.load %arg12[%c0_93, %c0_94] : memref<16x40xf32, #tpu.memory_space<vmem>>, vector<16x40xf32>
    %cst_95 = arith.constant dense<0.000000e+00> : vector<16x32xf32>
    %161 = tpu.matmul %160, %159, %cst_95 {dimension_numbers = #tpu.dot_dimension_numbers<[1], [0], [0], [1], [0, 0, 1, 1], [], []>} : vector<16x40xf32>, vector<40x32xf32>, vector<16x32xf32> -> vector<16x32xf32>
    %cst_96 = arith.constant 0.000000e+00 : f32
    %162 = vector.broadcast %cst_96 : f32 to vector<16x32xf32>
    %163 = arith.maximumf %161, %162 : vector<16x32xf32>
    %c0_97 = arith.constant 0 : index
    %c0_98 = arith.constant 0 : index
    %164 = vector.load %arg2[%c0_97, %c0_98] : memref<16x32xf32, #tpu.memory_space<vmem>>, vector<16x32xf32>
    %165 = arith.addf %163, %164 : vector<16x32xf32>
    %c0_99 = arith.constant 0 : index
    %c0_100 = arith.constant 0 : index
    %166 = vector.load %arg13[%c0_99, %c0_100] : memref<24x40xf32, #tpu.memory_space<vmem>>, vector<24x40xf32>
    %cst_101 = arith.constant dense<0.000000e+00> : vector<24x32xf32>
    %167 = tpu.matmul %166, %159, %cst_101 {dimension_numbers = #tpu.dot_dimension_numbers<[1], [0], [0], [1], [0, 0, 1, 1], [], []>} : vector<24x40xf32>, vector<40x32xf32>, vector<24x32xf32> -> vector<24x32xf32>
    %cst_102 = arith.constant 0.000000e+00 : f32
    %168 = vector.broadcast %cst_102 : f32 to vector<24x32xf32>
    %169 = arith.maximumf %167, %168 : vector<24x32xf32>
    %c0_103 = arith.constant 0 : index
    %c0_104 = arith.constant 0 : index
    %170 = vector.load %arg14[%c0_103, %c0_104] : memref<24x16xf32, #tpu.memory_space<vmem>>, vector<24x16xf32>
    %cst_105 = arith.constant dense<0.000000e+00> : vector<24x32xf32>
    %171 = tpu.matmul %170, %165, %cst_105 {dimension_numbers = #tpu.dot_dimension_numbers<[1], [0], [0], [1], [0, 0, 1, 1], [], []>} : vector<24x16xf32>, vector<16x32xf32>, vector<24x32xf32> -> vector<24x32xf32>
    %cst_106 = arith.constant 0.000000e+00 : f32
    %172 = vector.broadcast %cst_106 : f32 to vector<24x32xf32>
    %173 = arith.maximumf %171, %172 : vector<24x32xf32>
    %174 = arith.addf %169, %173 : vector<24x32xf32>
    %c0_107 = arith.constant 0 : index
    %c0_108 = arith.constant 0 : index
    %175 = vector.load %arg0[%c0_107, %c0_108] : memref<24x32xf32, #tpu.memory_space<vmem>>, vector<24x32xf32>
    %176 = arith.addf %174, %175 : vector<24x32xf32>
    %177 = tpu.concatenate %176, %165 in 0 : vector<24x32xf32>, vector<16x32xf32> -> vector<40x32xf32>
    %c0_109 = arith.constant 0 : index
    %c0_110 = arith.constant 0 : index
    %178 = vector.load %arg15[%c0_109, %c0_110] : memref<40x40xf32, #tpu.memory_space<vmem>>, vector<40x40xf32>
    %cst_111 = arith.constant dense<0.000000e+00> : vector<40x32xf32>
    %179 = tpu.matmul %178, %177, %cst_111 {dimension_numbers = #tpu.dot_dimension_numbers<[1], [0], [0], [1], [0, 0, 1, 1], [], []>} : vector<40x40xf32>, vector<40x32xf32>, vector<40x32xf32> -> vector<40x32xf32>
    %c0_112 = arith.constant 0 : index
    %c0_113 = arith.constant 0 : index
    %180 = vector.load %arg5[%c0_112, %c0_113] : memref<32x32xf32, #tpu.memory_space<vmem>>, vector<32x32xf32>
    %cst_114 = arith.constant dense<0.000000e+00> : vector<40x32xf32>
    %181 = tpu.matmul %179, %180, %cst_114 {dimension_numbers = #tpu.dot_dimension_numbers<[1], [0], [0], [1], [0, 0, 1, 1], [], []>} : vector<40x32xf32>, vector<32x32xf32>, vector<40x32xf32> -> vector<40x32xf32>
    %c0_115 = arith.constant 0 : index
    %c0_116 = arith.constant 0 : index
    %182 = vector.load %arg6[%c0_115, %c0_116] : memref<1x32xf32, #tpu.memory_space<vmem>>, vector<1x32xf32>
    %183 = vector.broadcast %182 : vector<1x32xf32> to vector<40x32xf32>
    %184 = arith.addf %181, %183 : vector<40x32xf32>
    %cst_117 = arith.constant 0.000000e+00 : f32
    %185 = vector.broadcast %cst_117 : f32 to vector<40x32xf32>
    %186 = arith.maximumf %184, %185 : vector<40x32xf32>
    %187 = arith.mulf %163, %163 : vector<16x32xf32>
    %cst_118 = arith.constant dense<0.000000e+00> : vector<16xf32>
    %188 = vector.multi_reduction <add>, %187, %cst_118 [1] : vector<16x32xf32> to vector<16xf32>
    %189 = vector.shape_cast %188 : vector<16xf32> to vector<16x1xf32>
    %cst_119 = arith.constant 1.000000e-24 : f32
    %190 = vector.broadcast %cst_119 : f32 to vector<16x1xf32>
    %191 = arith.maximumf %189, %190 : vector<16x1xf32>
    %192 = math.rsqrt %191 : vector<16x1xf32>
    %193 = vector.broadcast %192 : vector<16x1xf32> to vector<16x32xf32>
    %194 = arith.mulf %163, %193 : vector<16x32xf32>
    %195 = tpu.concatenate %176, %194 in 0 : vector<24x32xf32>, vector<16x32xf32> -> vector<40x32xf32>
    %c0_120 = arith.constant 0 : index
    %c0_121 = arith.constant 0 : index
    %196 = vector.load %arg7[%c0_120, %c0_121] : memref<1x32xf32, #tpu.memory_space<vmem>>, vector<1x32xf32>
    %c0_122 = arith.constant 0 : index
    %c0_123 = arith.constant 0 : index
    %197 = memref.load %arg17[%c0_122, %c0_123] : memref<1x1xf32, #tpu.memory_space<smem>>
    %198 = vector.broadcast %196 : vector<1x32xf32> to vector<40x32xf32>
    %199 = arith.mulf %177, %198 : vector<40x32xf32>
    %cst_124 = arith.constant dense<0.000000e+00> : vector<40xf32>
    %200 = vector.multi_reduction <add>, %199, %cst_124 [1] : vector<40x32xf32> to vector<40xf32>
    %201 = vector.shape_cast %200 : vector<40xf32> to vector<40x1xf32>
    %202 = vector.broadcast %197 : f32 to vector<40x1xf32>
    %203 = arith.addf %201, %202 : vector<40x1xf32>
    %204 = vector.broadcast %196 : vector<1x32xf32> to vector<40x32xf32>
    %205 = arith.mulf %195, %204 : vector<40x32xf32>
    %cst_125 = arith.constant dense<0.000000e+00> : vector<40xf32>
    %206 = vector.multi_reduction <add>, %205, %cst_125 [1] : vector<40x32xf32> to vector<40xf32>
    %207 = vector.shape_cast %206 : vector<40xf32> to vector<40x1xf32>
    %208 = vector.broadcast %197 : f32 to vector<40x1xf32>
    %209 = arith.addf %207, %208 : vector<40x1xf32>
    %210 = arith.maximumf %203, %209 : vector<40x1xf32>
    %211 = arith.subf %203, %210 : vector<40x1xf32>
    %212 = math.exp %211 : vector<40x1xf32>
    %213 = arith.subf %209, %210 : vector<40x1xf32>
    %214 = math.exp %213 : vector<40x1xf32>
    %215 = arith.addf %212, %214 : vector<40x1xf32>
    %216 = tpu.reciprocal %215 {approx = true} : vector<40x1xf32> -> vector<40x1xf32>
    %217 = vector.broadcast %212 : vector<40x1xf32> to vector<40x32xf32>
    %218 = arith.mulf %217, %177 : vector<40x32xf32>
    %219 = vector.broadcast %214 : vector<40x1xf32> to vector<40x32xf32>
    %220 = arith.mulf %219, %195 : vector<40x32xf32>
    %221 = arith.addf %218, %220 : vector<40x32xf32>
    %222 = vector.broadcast %216 : vector<40x1xf32> to vector<40x32xf32>
    %223 = arith.mulf %221, %222 : vector<40x32xf32>
    %224 = arith.mulf %186, %186 : vector<40x32xf32>
    %cst_126 = arith.constant dense<0.000000e+00> : vector<40xf32>
    %225 = vector.multi_reduction <add>, %224, %cst_126 [1] : vector<40x32xf32> to vector<40xf32>
    %226 = vector.shape_cast %225 : vector<40xf32> to vector<40x1xf32>
    %227 = arith.mulf %223, %223 : vector<40x32xf32>
    %cst_127 = arith.constant dense<0.000000e+00> : vector<40xf32>
    %228 = vector.multi_reduction <add>, %227, %cst_127 [1] : vector<40x32xf32> to vector<40xf32>
    %229 = vector.shape_cast %228 : vector<40xf32> to vector<40x1xf32>
    %230 = arith.addf %226, %229 : vector<40x1xf32>
    %cst_128 = arith.constant 1.000000e-24 : f32
    %231 = vector.broadcast %cst_128 : f32 to vector<40x1xf32>
    %232 = arith.maximumf %230, %231 : vector<40x1xf32>
    %233 = math.rsqrt %232 : vector<40x1xf32>
    %234 = vector.broadcast %233 : vector<40x1xf32> to vector<40x32xf32>
    %235 = arith.mulf %186, %234 : vector<40x32xf32>
    %236 = vector.broadcast %233 : vector<40x1xf32> to vector<40x32xf32>
    %237 = arith.mulf %223, %236 : vector<40x32xf32>
    %c0_129 = arith.constant 0 : index
    %c0_130 = arith.constant 0 : index
    %238 = vector.load %arg16[%c0_129, %c0_130] : memref<16x40xf32, #tpu.memory_space<vmem>>, vector<16x40xf32>
    %c0_131 = arith.constant 0 : index
    %c0_132 = arith.constant 0 : index
    %239 = vector.load %arg9[%c0_131, %c0_132] : memref<1x8xf32, #tpu.memory_space<vmem>>, vector<1x8xf32>
    %cst_133 = arith.constant dense<0.000000e+00> : vector<16x32xf32>
    %240 = tpu.matmul %238, %177, %cst_133 {dimension_numbers = #tpu.dot_dimension_numbers<[1], [0], [0], [1], [0, 0, 1, 1], [], []>} : vector<16x40xf32>, vector<40x32xf32>, vector<16x32xf32> -> vector<16x32xf32>
    %241 = vector.extract_strided_slice %240 {offsets = [0, 0], sizes = [8, 32], strides = [1, 1]} : vector<16x32xf32> to vector<8x32xf32>
    %242 = vector.extract_strided_slice %240 {offsets = [8, 0], sizes = [8, 32], strides = [1, 1]} : vector<16x32xf32> to vector<8x32xf32>
    %243 = arith.mulf %242, %241 : vector<8x32xf32>
    %c0_134 = arith.constant 0 : index
    %c0_135 = arith.constant 0 : index
    %c0_136 = arith.constant 0 : index
    %244 = vector.load %arg8[%c0_134, %c0_135, %c0_136] : memref<9x32x8xf32, #tpu.memory_space<vmem>>, vector<1x32x8xf32>
    %245 = vector.shape_cast %244 : vector<1x32x8xf32> to vector<32x8xf32>
    %cst_137 = arith.constant dense<0.000000e+00> : vector<8x8xf32>
    %246 = tpu.matmul %243, %245, %cst_137 {dimension_numbers = #tpu.dot_dimension_numbers<[1], [0], [0], [1], [0, 0, 1, 1], [], []>} : vector<8x32xf32>, vector<32x8xf32>, vector<8x8xf32> -> vector<8x8xf32>
    %247 = vector.broadcast %239 : vector<1x8xf32> to vector<8x8xf32>
    %248 = arith.addf %247, %246 : vector<8x8xf32>
    %c3_138 = arith.constant 3 : index
    %c0_139 = arith.constant 0 : index
    %c0_140 = arith.constant 0 : index
    %249 = vector.load %arg8[%c3_138, %c0_139, %c0_140] : memref<9x32x8xf32, #tpu.memory_space<vmem>>, vector<1x32x8xf32>
    %250 = vector.shape_cast %249 : vector<1x32x8xf32> to vector<32x8xf32>
    %cst_141 = arith.constant dense<0.000000e+00> : vector<8x8xf32>
    %251 = tpu.matmul %242, %250, %cst_141 {dimension_numbers = #tpu.dot_dimension_numbers<[1], [0], [0], [1], [0, 0, 1, 1], [], []>} : vector<8x32xf32>, vector<32x8xf32>, vector<8x8xf32> -> vector<8x8xf32>
    %252 = arith.addf %248, %251 : vector<8x8xf32>
    %c6_142 = arith.constant 6 : index
    %c0_143 = arith.constant 0 : index
    %c0_144 = arith.constant 0 : index
    %253 = vector.load %arg8[%c6_142, %c0_143, %c0_144] : memref<9x32x8xf32, #tpu.memory_space<vmem>>, vector<1x32x8xf32>
    %254 = vector.shape_cast %253 : vector<1x32x8xf32> to vector<32x8xf32>
    %cst_145 = arith.constant dense<0.000000e+00> : vector<8x8xf32>
    %255 = tpu.matmul %241, %254, %cst_145 {dimension_numbers = #tpu.dot_dimension_numbers<[1], [0], [0], [1], [0, 0, 1, 1], [], []>} : vector<8x32xf32>, vector<32x8xf32>, vector<8x8xf32> -> vector<8x8xf32>
    %256 = arith.addf %252, %255 : vector<8x8xf32>
    %cst_146 = arith.constant dense<0.000000e+00> : vector<16x32xf32>
    %257 = tpu.matmul %238, %235, %cst_146 {dimension_numbers = #tpu.dot_dimension_numbers<[1], [0], [0], [1], [0, 0, 1, 1], [], []>} : vector<16x40xf32>, vector<40x32xf32>, vector<16x32xf32> -> vector<16x32xf32>
    %258 = vector.extract_strided_slice %257 {offsets = [0, 0], sizes = [8, 32], strides = [1, 1]} : vector<16x32xf32> to vector<8x32xf32>
    %259 = vector.extract_strided_slice %257 {offsets = [8, 0], sizes = [8, 32], strides = [1, 1]} : vector<16x32xf32> to vector<8x32xf32>
    %260 = arith.mulf %259, %258 : vector<8x32xf32>
    %c1_147 = arith.constant 1 : index
    %c0_148 = arith.constant 0 : index
    %c0_149 = arith.constant 0 : index
    %261 = vector.load %arg8[%c1_147, %c0_148, %c0_149] : memref<9x32x8xf32, #tpu.memory_space<vmem>>, vector<1x32x8xf32>
    %262 = vector.shape_cast %261 : vector<1x32x8xf32> to vector<32x8xf32>
    %cst_150 = arith.constant dense<0.000000e+00> : vector<8x8xf32>
    %263 = tpu.matmul %260, %262, %cst_150 {dimension_numbers = #tpu.dot_dimension_numbers<[1], [0], [0], [1], [0, 0, 1, 1], [], []>} : vector<8x32xf32>, vector<32x8xf32>, vector<8x8xf32> -> vector<8x8xf32>
    %264 = arith.addf %256, %263 : vector<8x8xf32>
    %c4_151 = arith.constant 4 : index
    %c0_152 = arith.constant 0 : index
    %c0_153 = arith.constant 0 : index
    %265 = vector.load %arg8[%c4_151, %c0_152, %c0_153] : memref<9x32x8xf32, #tpu.memory_space<vmem>>, vector<1x32x8xf32>
    %266 = vector.shape_cast %265 : vector<1x32x8xf32> to vector<32x8xf32>
    %cst_154 = arith.constant dense<0.000000e+00> : vector<8x8xf32>
    %267 = tpu.matmul %259, %266, %cst_154 {dimension_numbers = #tpu.dot_dimension_numbers<[1], [0], [0], [1], [0, 0, 1, 1], [], []>} : vector<8x32xf32>, vector<32x8xf32>, vector<8x8xf32> -> vector<8x8xf32>
    %268 = arith.addf %264, %267 : vector<8x8xf32>
    %c7_155 = arith.constant 7 : index
    %c0_156 = arith.constant 0 : index
    %c0_157 = arith.constant 0 : index
    %269 = vector.load %arg8[%c7_155, %c0_156, %c0_157] : memref<9x32x8xf32, #tpu.memory_space<vmem>>, vector<1x32x8xf32>
    %270 = vector.shape_cast %269 : vector<1x32x8xf32> to vector<32x8xf32>
    %cst_158 = arith.constant dense<0.000000e+00> : vector<8x8xf32>
    %271 = tpu.matmul %258, %270, %cst_158 {dimension_numbers = #tpu.dot_dimension_numbers<[1], [0], [0], [1], [0, 0, 1, 1], [], []>} : vector<8x32xf32>, vector<32x8xf32>, vector<8x8xf32> -> vector<8x8xf32>
    %272 = arith.addf %268, %271 : vector<8x8xf32>
    %cst_159 = arith.constant dense<0.000000e+00> : vector<16x32xf32>
    %273 = tpu.matmul %238, %237, %cst_159 {dimension_numbers = #tpu.dot_dimension_numbers<[1], [0], [0], [1], [0, 0, 1, 1], [], []>} : vector<16x40xf32>, vector<40x32xf32>, vector<16x32xf32> -> vector<16x32xf32>
    %274 = vector.extract_strided_slice %273 {offsets = [0, 0], sizes = [8, 32], strides = [1, 1]} : vector<16x32xf32> to vector<8x32xf32>
    %275 = vector.extract_strided_slice %273 {offsets = [8, 0], sizes = [8, 32], strides = [1, 1]} : vector<16x32xf32> to vector<8x32xf32>
    %276 = arith.mulf %275, %274 : vector<8x32xf32>
    %c2_160 = arith.constant 2 : index
    %c0_161 = arith.constant 0 : index
    %c0_162 = arith.constant 0 : index
    %277 = vector.load %arg8[%c2_160, %c0_161, %c0_162] : memref<9x32x8xf32, #tpu.memory_space<vmem>>, vector<1x32x8xf32>
    %278 = vector.shape_cast %277 : vector<1x32x8xf32> to vector<32x8xf32>
    %cst_163 = arith.constant dense<0.000000e+00> : vector<8x8xf32>
    %279 = tpu.matmul %276, %278, %cst_163 {dimension_numbers = #tpu.dot_dimension_numbers<[1], [0], [0], [1], [0, 0, 1, 1], [], []>} : vector<8x32xf32>, vector<32x8xf32>, vector<8x8xf32> -> vector<8x8xf32>
    %280 = arith.addf %272, %279 : vector<8x8xf32>
    %c5_164 = arith.constant 5 : index
    %c0_165 = arith.constant 0 : index
    %c0_166 = arith.constant 0 : index
    %281 = vector.load %arg8[%c5_164, %c0_165, %c0_166] : memref<9x32x8xf32, #tpu.memory_space<vmem>>, vector<1x32x8xf32>
    %282 = vector.shape_cast %281 : vector<1x32x8xf32> to vector<32x8xf32>
    %cst_167 = arith.constant dense<0.000000e+00> : vector<8x8xf32>
    %283 = tpu.matmul %275, %282, %cst_167 {dimension_numbers = #tpu.dot_dimension_numbers<[1], [0], [0], [1], [0, 0, 1, 1], [], []>} : vector<8x32xf32>, vector<32x8xf32>, vector<8x8xf32> -> vector<8x8xf32>
    %284 = arith.addf %280, %283 : vector<8x8xf32>
    %c8 = arith.constant 8 : index
    %c0_168 = arith.constant 0 : index
    %c0_169 = arith.constant 0 : index
    %285 = vector.load %arg8[%c8, %c0_168, %c0_169] : memref<9x32x8xf32, #tpu.memory_space<vmem>>, vector<1x32x8xf32>
    %286 = vector.shape_cast %285 : vector<1x32x8xf32> to vector<32x8xf32>
    %cst_170 = arith.constant dense<0.000000e+00> : vector<8x8xf32>
    %287 = tpu.matmul %274, %286, %cst_170 {dimension_numbers = #tpu.dot_dimension_numbers<[1], [0], [0], [1], [0, 0, 1, 1], [], []>} : vector<8x32xf32>, vector<32x8xf32>, vector<8x8xf32> -> vector<8x8xf32>
    %288 = arith.addf %284, %287 : vector<8x8xf32>
    %cst_171 = arith.constant 0.000000e+00 : f32
    %289 = vector.broadcast %cst_171 : f32 to vector<8x8xf32>
    %290 = arith.maximumf %288, %289 : vector<8x8xf32>
    %c0_172 = arith.constant 0 : index
    %c0_173 = arith.constant 0 : index
    %291 = vector.load %arg10[%c0_172, %c0_173] : memref<1x8xf32, #tpu.memory_space<vmem>>, vector<1x8xf32>
    %cst_174 = arith.constant dense<0.000000e+00> : vector<1x8xf32>
    %292 = tpu.matmul %291, %290, %cst_174 {dimension_numbers = #tpu.dot_dimension_numbers<[1], [1], [0], [0], [0, 0, 1, 0], [], []>} : vector<1x8xf32>, vector<8x8xf32>, vector<1x8xf32> -> vector<1x8xf32>
    %c0_175 = arith.constant 0 : index
    %c0_176 = arith.constant 0 : index
    %293 = memref.load %arg18[%c0_175, %c0_176] : memref<1x1xf32, #tpu.memory_space<smem>>
    %294 = vector.broadcast %293 : f32 to vector<1x8xf32>
    %295 = arith.addf %292, %294 : vector<1x8xf32>
    %c0_177 = arith.constant 0 : index
    %c0_178 = arith.constant 0 : index
    %296 = vector.load %arg19[%c0_177, %c0_178] : memref<1x8xf32, #tpu.memory_space<vmem>>, vector<1x8xf32>
    tpu.vector_store %arg19[%c0_177, %c0_178], %295 {strides = array<i32>} : memref<1x8xf32, #tpu.memory_space<vmem>>, vector<1x8xf32>,
    return
  }
}

</mosaic_0001>

<bundles_post_ra>
// kernel: ihbr_forward.1
= control target key start
LH: loop header
LB: loop body
LE: loop exit
PB: predicated region body
PF: predicated region fallthrough
CT: control target
= control target key end

     0   :  { %vm79_vm0 = vcmask 326656   ;;  %vm181_vm1 = vcmask 261120   ;;  %vm2086_vm2 = vcmask 130048   ;;  %s4944_s1 = inlined_call_operand.vmem [shape: f32[40,32], index: 1, kind: input, shape index: {}]   ;;  %s4945_s11 = inlined_call_operand.vmem [shape: f32[80,40], index: 11, kind: input, shape index: {}]   ;;  %s4946_s3 = inlined_call_operand.vmem [shape: f32[8,32,32], index: 3, kind: input, shape index: {}]   ;;  %s4947_s4 = inlined_call_operand.vmem [shape: f32[8,32,32], index: 4, kind: input, shape index: {}]   ;;  %s4948_s12 = inlined_call_operand.vmem [shape: f32[16,40], index: 12, kind: input, shape index: {}]   ;;  %s4949_s7 = inlined_call_operand.vmem [shape: f32[1,32], index: 7, kind: input, shape index: {}]   ;;  %s4950_s13 = inlined_call_operand.vmem [shape: f32[24,40], index: 13, kind: input, shape index: {}]   ;;  %s4951_s2 = inlined_call_operand.vmem [shape: f32[16,32], index: 2, kind: input, shape index: {}]   ;;  %s4952_s14 = inlined_call_operand.vmem [shape: f32[24,16], index: 14, kind: input, shape index: {}]   ;;  %s4953_s0 = inlined_call_operand.vmem [shape: f32[24,32], index: 0, kind: input, shape index: {}]   ;;  %s4954_s15 = inlined_call_operand.vmem [shape: f32[40,40], index: 15, kind: input, shape index: {}]   ;;  %s4955_s17 = inlined_call_operand.<no memory space> [shape: f32[1,1], index: 17, kind: input, shape index: {}]   ;;  %s4956_s5 = inlined_call_operand.vmem [shape: f32[32,32], index: 5, kind: input, shape index: {}]   ;;  %s4957_s6 = inlined_call_operand.vmem [shape: f32[1,32], index: 6, kind: input, shape index: {}]   ;;  %s4958_s16 = inlined_call_operand.vmem [shape: f32[16,40], index: 16, kind: input, shape index: {}]   ;;  %s4959_s9 = inlined_call_operand.vmem [shape: f32[1,8], index: 9, kind: input, shape index: {}]   ;;  %s4960_s8 = inlined_call_operand.vmem [shape: f32[9,32,8], index: 8, kind: input, shape index: {}]   ;;  %s4961_s10 = inlined_call_operand.vmem [shape: f32[1,8], index: 10, kind: input, shape index: {}]   ;;  %s4962_s18 = inlined_call_operand.<no memory space> [shape: f32[1,1], index: 18, kind: input, shape index: {}]   ;;  %s4963_s19 = inlined_call_operand.vmem [shape: f32[1,8], index: 19, kind: output, shape index: {}]  }
   0x1   :  { %4968 = sst [smem:[#allocation4_spill]] %s4944_s1 }
   0x2   :  { %4969 = sst [smem:[#allocation5_spill]] %s4945_s11 }
   0x3   :  { %4970 = sst [smem:[#allocation6_spill]] %s4946_s3 }
   0x4   :  { %4971 = sst [smem:[#allocation7_spill]] %s4947_s4 }
   0x5   :  { %s4972_s20 = sld [smem:[#allocation4_spill]] }
   0x6   :  { %s4973_s28 = sld [smem:[#allocation5_spill]] }
   0x7   :  { %s4974_s22 = sld [smem:[#allocation6_spill]] }
   0x8   :  { %s4975_s24 = sld [smem:[#allocation7_spill]] }
   0xb   :  { %v3497_v0 = vld [vmem:[%s4972_s20 + $0x20] sm:$0xff]  ;;  %v3502_v1 = vld [vmem:[%s4972_s20 + $0x18] sm:$0xff]  ;;  %v3508_v2 = vld [vmem:[%s4972_s20 + $0x10] sm:$0xff] }
   0xc   :  { %121 = vmatpush.msra.mxu0 %v3497_v0  ;;  %v3514_v3 = vld [vmem:[%s4972_s20 + $0x8] sm:$0xff]  ;;  %v64_v4 = vld [vmem:[%s4972_s20] sm:$0xff]  ;;  %v71_v7 = vld [vmem:[%s4973_s28 + $0x10] sm:$0xff] }
   0xd   :  { %v69_v5 = vld [vmem:[%s4973_s28] sm:$0xff]  ;;  %v70_v6 = vld [vmem:[%s4973_s28 + $0x8] sm:$0xff]  ;;  %v72_v8 = vld [vmem:[%s4973_s28 + $0x18] sm:$0xff] }
   0xe   :  { %122 = vmatpush.msra.mxu0 %v3502_v1  ;;  %v73_v9 = vld [vmem:[%s4973_s28 + $0x20] sm:$0xff]  ;;  %v74_v10 = vld [vmem:[%s4973_s28 + $0x28] sm:$0xff]  ;;  %v75_v11 = vld [vmem:[%s4973_s28 + $0x30] sm:$0xff] }
   0xf   :  { %v76_v12 = vld [vmem:[%s4973_s28 + $0x38] sm:$0xff]  ;;  %v77_v13 = vld [vmem:[%s4973_s28 + $0x40] sm:$0xff]  ;;  %v78_v14 = vld [vmem:[%s4973_s28 + $0x48] sm:$0xff] }
  0x10   :  { %123 = vmatpush.msra.mxu0 %v3508_v2  ;;  %v180_v16 = vld [vmem:[%s4974_s22 + $0x18] sm:$0xff]  ;;  %v179_v20 = vld [vmem:[%s4974_s22 + $0x10] sm:$0xff]  ;;  %v178_v23 = vld [vmem:[%s4974_s22 + $0x8] sm:$0xff] }
  0x11   :  { %v334_v17 = vld [vmem:[%s4975_s24 + $0x18] sm:$0xff]  ;;  %209 = vmatpush.msra.mxu1 %v180_v16  ;;  %v333_v21 = vld [vmem:[%s4975_s24 + $0x10] sm:$0xff]  ;;  %v332_v24 = vld [vmem:[%s4975_s24 + $0x8] sm:$0xff] }
  0x12   :  { %124 = vmatpush.msra.mxu0 %v3514_v3  ;;  %v2931_v18 = vld [vmem:[%s4974_s22 + $0x58] sm:$0xff]  ;;  %347 = vmatpush.msra.mxu3 %v334_v17  ;;  %v2930_v22 = vld [vmem:[%s4974_s22 + $0x50] sm:$0xff]  ;;  %v2929_v25 = vld [vmem:[%s4974_s22 + $0x48] sm:$0xff] }
  0x13   :  { %210 = vmatpush.msra.mxu1 %v179_v20  ;;  %v177_v26 = vld [vmem:[%s4974_s22] sm:$0xff]  ;;  %v2893_v37 = vld [vmem:[%s4974_s22 + $0x38] sm:$0xff]  ;;  %v2892_v42 = vld [vmem:[%s4974_s22 + $0x30] sm:$0xff] }
  0x14   :  { %125 = vmatpush.msra.mxu0 %v64_v4  ;;  %348 = vmatpush.msra.mxu3 %v333_v21  ;;  %v331_v27 = vld [vmem:[%s4975_s24] sm:$0xff]  ;;  %v2964_v41 = vld [vmem:[%s4974_s22 + $0x78] sm:$0xff]  ;;  %v2963_v43 = vld [vmem:[%s4974_s22 + $0x70] sm:$0xff] }
  0x15   :  { %2860 = vmatmul.msk.f32.vlgmr.msra.gmra.mxu0 %vm79_vm0, %v69_v5  ;;  %211 = vmatpush.msra.mxu1 %v178_v23  ;;  %v2928_v28 = vld [vmem:[%s4974_s22 + $0x40] sm:$0xff]  ;;  %v2891_v46 = vld [vmem:[%s4974_s22 + $0x28] sm:$0xff]  ;;  %v3030_v5 = vld [vmem:[%s4974_s22 + $0xb8] sm:$0xff] }
  0x16   :  { %654 = vmatpush.msrb.mxu0 %v2931_v18  ;;  %349 = vmatpush.msra.mxu3 %v332_v24  ;;  %v2962_v47 = vld [vmem:[%s4974_s22 + $0x68] sm:$0xff]  ;;  %v2890_v48 = vld [vmem:[%s4974_s22 + $0x20] sm:$0xff] }
  0x17   :  { %212 = vmatpush.msra.mxu1 %v177_v26  ;;  %v2961_v49 = vld [vmem:[%s4974_s22 + $0x60] sm:$0xff]  ;;  %v3061_v16 = vld [vmem:[%s4974_s22 + $0xc8] sm:$0xff] }
  0x18   :  { %655 = vmatpush.msrb.mxu0 %v2930_v22  ;;  %350 = vmatpush.msra.mxu3 %v331_v27  ;;  %v3060_v17 = vld [vmem:[%s4974_s22 + $0xc0] sm:$0xff] }
  0x19   :  { %384 = vmatpush.msrb.mxu1 %v2893_v37 }
  0x1a   :  { %656 = vmatpush.msrb.mxu0 %v2929_v25 }
  0x1b   :  { %385 = vmatpush.msrb.mxu1 %v2892_v42 }
  0x1c   :  { %657 = vmatpush.msrb.mxu0 %v2928_v28  ;;  %v3096_v28 = vld [vmem:[%s4974_s22 + $0xf8] sm:$0xff] }
  0x1d   :  { %2861 = vmatmul.msk.f32.gmra.mxu0 %vm79_vm0, %v70_v6  ;;  %386 = vmatpush.msrb.mxu1 %v2891_v46  ;;  %v3029_v6 = vld [vmem:[%s4974_s22 + $0xb0] sm:$0xff] }
  0x1e   :  { %882 = vmatpush.msra.mxu0 %v2964_v41 }
  0x1f   :  { %387 = vmatpush.msrb.mxu1 %v2890_v48 }
  0x20   :  { %883 = vmatpush.msra.mxu0 %v2963_v43 }
  0x22   :  { %884 = vmatpush.msra.mxu0 %v2962_v47 }
  0x24   :  { %885 = vmatpush.msra.mxu0 %v2961_v49 }
  0x25   :  { %2862 = vmatmul.msk.f32.gmra.mxu0 %vm79_vm0, %v71_v7  ;;  %v2912_v7 = vld [vmem:[%s4975_s24 + $0x38] sm:$0xff] }
  0x2d   :  { %2863 = vmatmul.msk.f32.gmra.mxu0 %vm79_vm0, %v72_v8  ;;  %v3028_v8 = vld [vmem:[%s4974_s22 + $0xa8] sm:$0xff] }
  0x35   :  { %2864 = vmatmul.msk.f32.gmra.mxu0 %vm79_vm0, %v73_v9  ;;  %v3027_v9 = vld [vmem:[%s4974_s22 + $0xa0] sm:$0xff] }
  0x3d   :  { %2865 = vmatmul.msk.f32.gmra.mxu0 %vm79_vm0, %v74_v10  ;;  %v2911_v10 = vld [vmem:[%s4975_s24 + $0x30] sm:$0xff] }
  0x45   :  { %2866 = vmatmul.msk.f32.gmra.mxu0 %vm79_vm0, %v75_v11  ;;  %v2910_v11 = vld [vmem:[%s4975_s24 + $0x28] sm:$0xff] }
  0x4d   :  { %2867 = vmatmul.msk.f32.gmra.mxu0 %vm79_vm0, %v76_v12  ;;  %v2909_v12 = vld [vmem:[%s4975_s24 + $0x20] sm:$0xff] }
  0x55   :  { %2868 = vmatmul.msk.f32.gmra.mxu0 %vm79_vm0, %v77_v13  ;;  %v3063_v13 = vld [vmem:[%s4974_s22 + $0xd8] sm:$0xff] }
  0x5d   :  { %2869 = vmatmul.msk.f32.gmra.mxu0 %vm79_vm0, %v78_v14  ;;  %v3062_v14 = vld [vmem:[%s4974_s22 + $0xd0] sm:$0xff] }
  0x92   :  { %v127_v15 = vpop.f32.mrf.mxu0 }
  0x93   :  { %v157_v33 = vmax.f32 %v127_v15, 0.0 }
  0x9a   :  { %v130_v19 = vpop.f32.mrf.mxu0 }
  0x9b   :  { %v158_v39 = vmax.f32 %v130_v19, 0.0 }
  0xa2   :  { %v133_v29 = vpop.f32.mrf.mxu0 }
  0xa3   :  { %v159_v51 = vmax.f32 %v133_v29, 0.0  ;;  %v3095_v29 = vld [vmem:[%s4974_s22 + $0xf0] sm:$0xff] }
  0xaa   :  { %v136_v30 = vpop.f32.mrf.mxu0 }
  0xab   :  { %v160_v56 = vmax.f32 %v136_v30, 0.0 }
  0xb2   :  { %v139_v31 = vpop.f32.mrf.mxu0 }
  0xb3   :  { %v161_v61 = vmax.f32 %v139_v31, 0.0 }
  0xba   :  { %v142_v32 = vpop.f32.mrf.mxu0 }
  0xbb   :  { %v162_v34 = vmax.f32 %v142_v32, 0.0 }
  0xbd   :  { %v167_v35 = vadd.f32 %v162_v34, %v157_v33  ;;  %v3094_v33 = vld [vmem:[%s4974_s22 + $0xe8] sm:$0xff]  ;;  %v3093_v34 = vld [vmem:[%s4974_s22 + $0xe0] sm:$0xff] }
  0xbf   :  { %v3597_v36 = vadd.f32 %v167_v35, %v64_v4  ;;  %v2994_v4 = vld [vmem:[%s4974_s22 + $0x80] sm:$0xff] }
  0xc1   :  { %2870 = vmatmul.msk.f32.vlgmr.msra.gmra.mxu1 %vm181_vm1, %v3597_v36  ;;  %2885 = vmatmul.msk.f32.vlgmr.msra.gmra.mxu3 %vm181_vm1, %v3597_v36 }
  0xc2   :  { %2932 = vmatmul.msk.f32.vlgmr.msrb.gmra.mxu0 %vm181_vm1, %v3597_v36  ;;  %v145_v38 = vpop.f32.mrf.mxu0 }
  0xc3   :  { %v163_v40 = vmax.f32 %v145_v38, 0.0 }
  0xc5   :  { %v168_v44 = vadd.f32 %v163_v40, %v158_v39 }
  0xc7   :  { %v3618_v45 = vadd.f32 %v168_v44, %v3514_v3  ;;  %v2995_v3 = vld [vmem:[%s4974_s22 + $0x88] sm:$0xff] }
  0xc9   :  { %2871 = vmatmul.msk.f32.gmra.mxu1 %vm181_vm1, %v3618_v45  ;;  %2886 = vmatmul.msk.f32.gmra.mxu3 %vm181_vm1, %v3618_v45 }
  0xca   :  { %2933 = vmatmul.msk.f32.gmra.mxu0 %vm181_vm1, %v3618_v45  ;;  %v148_v50 = vpop.f32.mrf.mxu0 }
  0xcb   :  { %v164_v52 = vmax.f32 %v148_v50, 0.0 }
  0xcd   :  { %v169_v53 = vadd.f32 %v164_v52, %v159_v51 }
  0xcf   :  { %v3639_v54 = vadd.f32 %v169_v53, %v3508_v2 }
  0xd1   :  { %2872 = vmatmul.msk.f32.gmra.mxu1 %vm181_vm1, %v3639_v54  ;;  %2887 = vmatmul.msk.f32.gmra.mxu3 %vm181_vm1, %v3639_v54 }
  0xd2   :  { %2934 = vmatmul.msk.f32.gmra.mxu0 %vm181_vm1, %v3639_v54  ;;  %v151_v55 = vpop.f32.mrf.mxu0 }
  0xd3   :  { %v165_v57 = vmax.f32 %v151_v55, 0.0 }
  0xd5   :  { %v170_v58 = vadd.f32 %v165_v57, %v160_v56 }
  0xd7   :  { %v3648_v59 = vadd.f32 %v170_v58, %v3502_v1  ;;  %v2996_v1 = vld [vmem:[%s4974_s22 + $0x90] sm:$0xff] }
  0xd9   :  { %2873 = vmatmul.msk.f32.gmra.mxu1 %vm181_vm1, %v3648_v59  ;;  %2888 = vmatmul.msk.f32.gmra.mxu3 %vm181_vm1, %v3648_v59 }
  0xda   :  { %2935 = vmatmul.msk.f32.gmra.mxu0 %vm181_vm1, %v3648_v59  ;;  %v154_v60 = vpop.f32.mrf.mxu0 }
  0xdb   :  { %v166_v62 = vmax.f32 %v154_v60, 0.0 }
  0xdd   :  { %v171_v63 = vadd.f32 %v166_v62, %v161_v61 }
  0xdf   :  { %v3657_v2 = vadd.f32 %v171_v63, %v3497_v0  ;;  %v2997_v0 = vld [vmem:[%s4974_s22 + $0x98] sm:$0xff] }
  0xe0   :  { %1110 = vmatpush.msrb.mxu0 %v2997_v0 }
  0xe1   :  { %2874 = vmatmul.msk.f32.gmra.mxu1 %vm181_vm1, %v3657_v2  ;;  %2875 = vmatpush.xpose.msk.msra.mxu2 %vm181_vm1, %v3657_v2 }
  0xe2   :  { %2889 = vmatmul.msk.f32.gmra.mxu3 %vm181_vm1, %v3657_v2  ;;  %2936 = vmatmul.msk.f32.gmra.mxu0 %vm181_vm1, %v3657_v2 }
  0xe3   :  { %2899 = vmatpush.xpose.msk.msrb.mxu3 %vm181_vm1, %v3657_v2  ;;  %1111 = vmatpush.msrb.mxu0 %v2996_v1 }
  0xe5   :  { %2876 = vmatpush.xpose.msk.msra.mxu2 %vm181_vm1, %v3648_v59  ;;  %1112 = vmatpush.msrb.mxu0 %v2995_v3 }
  0xe7   :  { %2900 = vmatpush.xpose.msk.msrb.mxu3 %vm181_vm1, %v3648_v59  ;;  %1113 = vmatpush.msrb.mxu0 %v2994_v4 }
  0xe9   :  { %2877 = vmatpush.xpose.msk.msra.mxu2 %vm181_vm1, %v3639_v54  ;;  %2894 = vmatmul.msk.f32.vlgmr.msrb.gmra.mxu1 %vm181_vm1, %v3597_v36 }
  0xea   :  { %2965 = vmatmul.msk.f32.vlgmr.msra.gmra.mxu0 %vm181_vm1, %v3597_v36 }
  0xeb   :  { %2901 = vmatpush.xpose.msk.msrb.mxu3 %vm181_vm1, %v3639_v54  ;;  %1338 = vmatpush.msra.mxu0 %v3030_v5 }
  0xed   :  { %2878 = vmatpush.xpose.msk.msra.mxu2 %vm181_vm1, %v3618_v45  ;;  %1339 = vmatpush.msra.mxu0 %v3029_v6 }
  0xef   :  { %2902 = vmatpush.xpose.msk.msrb.mxu3 %vm181_vm1, %v3618_v45  ;;  %1340 = vmatpush.msra.mxu0 %v3028_v8 }
  0xf1   :  { %2879 = vmatpush.xpose.msk.msra.mxu2 %vm181_vm1, %v3597_v36  ;;  %2895 = vmatmul.msk.f32.gmra.mxu1 %vm181_vm1, %v3618_v45 }
  0xf2   :  { %2966 = vmatmul.msk.f32.gmra.mxu0 %vm181_vm1, %v3618_v45 }
  0xf3   :  { %2903 = vmatpush.xpose.msk.msrb.mxu3 %vm181_vm1, %v3597_v36  ;;  %1341 = vmatpush.msra.mxu0 %v3027_v9 }
  0xf5   :  { %523 = vmatpush.msrb.mxu2 %v2912_v7 }
  0xf7   :  { %524 = vmatpush.msrb.mxu2 %v2911_v10 }
  0xf9   :  { %2896 = vmatmul.msk.f32.gmra.mxu1 %vm181_vm1, %v3639_v54  ;;  %525 = vmatpush.msrb.mxu2 %v2910_v11 }
  0xfa   :  { %2967 = vmatmul.msk.f32.gmra.mxu0 %vm181_vm1, %v3639_v54 }
  0xfb   :  { %526 = vmatpush.msrb.mxu2 %v2909_v12 }
 0x101   :  { %2897 = vmatmul.msk.f32.gmra.mxu1 %vm181_vm1, %v3648_v59 }
 0x102   :  { %2968 = vmatmul.msk.f32.gmra.mxu0 %vm181_vm1, %v3648_v59 }
 0x109   :  { %2898 = vmatmul.msk.f32.gmra.mxu1 %vm181_vm1, %v3657_v2 }
 0x10a   :  { %2969 = vmatmul.msk.f32.gmra.mxu0 %vm181_vm1, %v3657_v2 }
 0x112   :  { %2998 = vmatmul.msk.f32.vlgmr.msrb.gmra.mxu0 %vm181_vm1, %v3597_v36 }
 0x113   :  { %1566 = vmatpush.msrb.mxu0 %v3063_v13 }
 0x115   :  { %1567 = vmatpush.msrb.mxu0 %v3062_v14 }
 0x117   :  { %1568 = vmatpush.msrb.mxu0 %v3061_v16 }
 0x119   :  { %1569 = vmatpush.msrb.mxu0 %v3060_v17 }
 0x11a   :  { %2999 = vmatmul.msk.f32.gmra.mxu0 %vm181_vm1, %v3618_v45 }
 0x122   :  { %3000 = vmatmul.msk.f32.gmra.mxu0 %vm181_vm1, %v3639_v54 }
 0x12a   :  { %3001 = vmatmul.msk.f32.gmra.mxu0 %vm181_vm1, %v3648_v59 }
 0x132   :  { %3002 = vmatmul.msk.f32.gmra.mxu0 %vm181_vm1, %v3657_v2 }
 0x13a   :  { %3031 = vmatmul.msk.f32.vlgmr.msra.gmra.mxu0 %vm181_vm1, %v3597_v36 }
 0x13b   :  { %1794 = vmatpush.msra.mxu0 %v3096_v28 }
 0x13d   :  { %1795 = vmatpush.msra.mxu0 %v3095_v29 }
 0x13e   :  { %v214_v15 = vpop.f32.mrf.mxu1 }
 0x13f   :  { %2880 = vmatmul.msk.f32.vlgmr.msra.gmra.mxu2 %vm181_vm1, %v214_v15  ;;  %v659_v22 = vpop.f32.mrf.mxu0  ;;  %1796 = vmatpush.msra.mxu0 %v3094_v33 }
 0x140   :  { %2937 = vmatpush.xpose.msk.msra.mxu2 %vm181_vm1, %v3657_v2 }
 0x141   :  { %1797 = vmatpush.msra.mxu0 %v3093_v34 }
 0x142   :  { %3032 = vmatmul.msk.f32.gmra.mxu0 %vm181_vm1, %v3618_v45 }
 0x144   :  { %2938 = vmatpush.xpose.msk.msra.mxu2 %vm181_vm1, %v3648_v59  ;;  %v352_v18 = vpop.f32.mrf.mxu3 }
 0x146   :  { %v217_v19 = vpop.f32.mrf.mxu1 }
 0x147   :  { %2881 = vmatmul.msk.f32.gmra.mxu2 %vm181_vm1, %v217_v19  ;;  %v662_v26 = vpop.f32.mrf.mxu0 }
 0x148   :  { %2939 = vmatpush.xpose.msk.msra.mxu2 %vm181_vm1, %v3639_v54 }
 0x14a   :  { %3033 = vmatmul.msk.f32.gmra.mxu0 %vm181_vm1, %v3639_v54 }
 0x14c   :  { %2940 = vmatpush.xpose.msk.msra.mxu2 %vm181_vm1, %v3618_v45  ;;  %v355_v20 = vpop.f32.mrf.mxu3 }
 0x14e   :  { %v220_v21 = vpop.f32.mrf.mxu1 }
 0x14f   :  { %2882 = vmatmul.msk.f32.gmra.mxu2 %vm181_vm1, %v220_v21  ;;  %v665_v32 = vpop.f32.mrf.mxu0 }
 0x150   :  { %2941 = vmatpush.xpose.msk.msra.mxu2 %vm181_vm1, %v3597_v36 }
 0x152   :  { %3034 = vmatmul.msk.f32.gmra.mxu0 %vm181_vm1, %v3648_v59 }
 0x154   :  { %v358_v23 = vpop.f32.mrf.mxu3 }
 0x156   :  { %v223_v24 = vpop.f32.mrf.mxu1 }
 0x157   :  { %2883 = vmatmul.msk.f32.gmra.mxu2 %vm181_vm1, %v223_v24  ;;  %v668_v37 = vpop.f32.mrf.mxu0 }
 0x15a   :  { %3035 = vmatmul.msk.f32.gmra.mxu0 %vm181_vm1, %v3657_v2 }
 0x15c   :  { %v361_v25 = vpop.f32.mrf.mxu3 }
 0x15e   :  { %v226_v27 = vpop.f32.mrf.mxu1 }
 0x15f   :  { %2884 = vmatmul.msk.f32.gmra.mxu2 %vm181_vm1, %v226_v27  ;;  %v671_v39 = vpop.f32.mrf.mxu0 }
 0x162   :  { %3064 = vmatmul.msk.f32.vlgmr.msrb.gmra.mxu0 %vm181_vm1, %v3597_v36 }
 0x165   :  { %v364_v30 = vpop.f32.mrf.mxu3 }
 0x166   :  { %616 = vmatpush.msra.mxu3 %v364_v30  ;;  %v389_v31 = vpop.f32.mrf.mxu1 }
 0x167   :  { %2904 = vmatmul.msk.f32.vlgmr.msrb.gmra.mxu3 %vm181_vm1, %v389_v31  ;;  %2913 = vmatmul.msk.f32.vlgmr.msrb.gmra.mxu2 %vm181_vm1, %v3597_v36  ;;  %v887_v41 = vpop.f32.mrf.mxu0 }
 0x168   :  { %617 = vmatpush.msra.mxu3 %v361_v25  ;;  %2970 = vmatpush.xpose.msk.msrb.mxu2 %vm181_vm1, %v3657_v2 }
 0x16a   :  { %618 = vmatpush.msra.mxu3 %v358_v23  ;;  %3065 = vmatmul.msk.f32.gmra.mxu0 %vm181_vm1, %v3618_v45 }
 0x16c   :  { %619 = vmatpush.msra.mxu3 %v355_v20  ;;  %2971 = vmatpush.xpose.msk.msrb.mxu2 %vm181_vm1, %v3648_v59 }
 0x16e   :  { %620 = vmatpush.msra.mxu3 %v352_v18  ;;  %v392_v35 = vpop.f32.mrf.mxu1 }
 0x16f   :  { %2905 = vmatmul.msk.f32.gmra.mxu3 %vm181_vm1, %v392_v35  ;;  %2914 = vmatmul.msk.f32.gmra.mxu2 %vm181_vm1, %v3618_v45  ;;  %v890_v43 = vpop.f32.mrf.mxu0 }
 0x170   :  { %2972 = vmatpush.xpose.msk.msrb.mxu2 %vm181_vm1, %v3639_v54 }
 0x172   :  { %3066 = vmatmul.msk.f32.gmra.mxu0 %vm181_vm1, %v3639_v54 }
 0x174   :  { %2973 = vmatpush.xpose.msk.msrb.mxu2 %vm181_vm1, %v3618_v45 }
 0x176   :  { %v395_v38 = vpop.f32.mrf.mxu1 }
 0x177   :  { %2906 = vmatmul.msk.f32.gmra.mxu3 %vm181_vm1, %v395_v38  ;;  %2915 = vmatmul.msk.f32.gmra.mxu2 %vm181_vm1, %v3639_v54  ;;  %v893_v44 = vpop.f32.mrf.mxu0 }
 0x178   :  { %2974 = vmatpush.xpose.msk.msrb.mxu2 %vm181_vm1, %v3597_v36 }
 0x17a   :  { %3067 = vmatmul.msk.f32.gmra.mxu0 %vm181_vm1, %v3648_v59 }
 0x17e   :  { %v398_v40 = vpop.f32.mrf.mxu1 }
 0x17f   :  { %2907 = vmatmul.msk.f32.gmra.mxu3 %vm181_vm1, %v398_v40  ;;  %2916 = vmatmul.msk.f32.gmra.mxu2 %vm181_vm1, %v3648_v59  ;;  %v896_v46 = vpop.f32.mrf.mxu0 }
 0x182   :  { %3068 = vmatmul.msk.f32.gmra.mxu0 %vm181_vm1, %v3657_v2 }
 0x186   :  { %v401_v42 = vpop.f32.mrf.mxu1 }
 0x187   :  { %2908 = vmatmul.msk.f32.gmra.mxu3 %vm181_vm1, %v401_v42  ;;  %2917 = vmatmul.msk.f32.gmra.mxu2 %vm181_vm1, %v3657_v2  ;;  %v899_v47 = vpop.f32.mrf.mxu0 }
 0x18a   :  { %3097 = vmatmul.msk.f32.vlgmr.msra.gmra.mxu0 %vm181_vm1, %v3597_v36 }
 0x18f   :  { %2942 = vmatmul.msk.f32.vlgmr.msra.gmra.mxu2 %vm181_vm1, %v659_v22  ;;  %v1115_v48 = vpop.f32.mrf.mxu0 }
 0x190   :  { %3003 = vmatpush.xpose.msk.msra.mxu2 %vm181_vm1, %v3657_v2 }
 0x192   :  { %3098 = vmatmul.msk.f32.gmra.mxu0 %vm181_vm1, %v3618_v45 }
 0x194   :  { %3004 = vmatpush.xpose.msk.msra.mxu2 %vm181_vm1, %v3648_v59 }
 0x197   :  { %2943 = vmatmul.msk.f32.gmra.mxu2 %vm181_vm1, %v662_v26  ;;  %v1118_v49 = vpop.f32.mrf.mxu0 }
 0x198   :  { %3005 = vmatpush.xpose.msk.msra.mxu2 %vm181_vm1, %v3639_v54 }
 0x19a   :  { %3099 = vmatmul.msk.f32.gmra.mxu0 %vm181_vm1, %v3639_v54 }
 0x19c   :  { %3006 = vmatpush.xpose.msk.msra.mxu2 %vm181_vm1, %v3618_v45 }
 0x19f   :  { %2944 = vmatmul.msk.f32.gmra.mxu2 %vm181_vm1, %v665_v32  ;;  %v1121_v52 = vpop.f32.mrf.mxu0 }
 0x1a0   :  { %3007 = vmatpush.xpose.msk.msra.mxu2 %vm181_vm1, %v3597_v36 }
 0x1a2   :  { %3100 = vmatmul.msk.f32.gmra.mxu0 %vm181_vm1, %v3648_v59 }
 0x1a7   :  { %2945 = vmatmul.msk.f32.gmra.mxu2 %vm181_vm1, %v668_v37  ;;  %v1124_v55 = vpop.f32.mrf.mxu0 }
 0x1aa   :  { %3101 = vmatmul.msk.f32.gmra.mxu0 %vm181_vm1, %v3657_v2 }
 0x1af   :  { %2946 = vmatmul.msk.f32.gmra.mxu2 %vm181_vm1, %v671_v39  ;;  %v1127_v57 = vpop.f32.mrf.mxu0 }
 0x1b7   :  { %2975 = vmatmul.msk.f32.vlgmr.msrb.gmra.mxu2 %vm181_vm1, %v887_v41  ;;  %v1343_v60 = vpop.f32.mrf.mxu0 }
 0x1b8   :  { %3036 = vmatpush.xpose.msk.msrb.mxu2 %vm181_vm1, %v3657_v2 }
 0x1bc   :  { %3037 = vmatpush.xpose.msk.msrb.mxu2 %vm181_vm1, %v3648_v59 }
 0x1bf   :  { %2976 = vmatmul.msk.f32.gmra.mxu2 %vm181_vm1, %v890_v43  ;;  %v1346_v4 = vpop.f32.mrf.mxu0 }
 0x1c0   :  { %3038 = vmatpush.xpose.msk.msrb.mxu2 %vm181_vm1, %v3639_v54 }
 0x1c2   :  { %v3868_v50 = vpop.f32.mrf.mxu2 }
 0x1c4   :  { %3039 = vmatpush.xpose.msk.msrb.mxu2 %vm181_vm1, %v3618_v45 }
 0x1c7   :  { %2977 = vmatmul.msk.f32.gmra.mxu2 %vm181_vm1, %v893_v44  ;;  %v1349_v8 = vpop.f32.mrf.mxu0 }
 0x1c8   :  { %3040 = vmatpush.xpose.msk.msrb.mxu2 %vm181_vm1, %v3597_v36 }
 0x1ca   :  { %v3875_v51 = vpop.f32.mrf.mxu2 }
 0x1cf   :  { %2978 = vmatmul.msk.f32.gmra.mxu2 %vm181_vm1, %v896_v46  ;;  %v1352_v12 = vpop.f32.mrf.mxu0 }
 0x1d2   :  { %v3878_v53 = vpop.f32.mrf.mxu2 }
 0x1d7   :  { %2979 = vmatmul.msk.f32.gmra.mxu2 %vm181_vm1, %v899_v47  ;;  %v1355_v16 = vpop.f32.mrf.mxu0 }
 0x1da   :  { %v3881_v56 = vpop.f32.mrf.mxu2 }
 0x1df   :  { %3008 = vmatmul.msk.f32.vlgmr.msra.gmra.mxu2 %vm181_vm1, %v1115_v48  ;;  %v1571_v17 = vpop.f32.mrf.mxu0 }
 0x1e0   :  { %3069 = vmatpush.xpose.msk.msra.mxu2 %vm181_vm1, %v3657_v2 }
 0x1e2   :  { %v3886_v58 = vpop.f32.mrf.mxu2 }
 0x1e4   :  { %3070 = vmatpush.xpose.msk.msra.mxu2 %vm181_vm1, %v3648_v59 }
 0x1e7   :  { %3009 = vmatmul.msk.f32.gmra.mxu2 %vm181_vm1, %v1118_v49  ;;  %v1574_v18 = vpop.f32.mrf.mxu0 }
 0x1e8   :  { %3071 = vmatpush.xpose.msk.msra.mxu2 %vm181_vm1, %v3639_v54 }
 0x1ea   :  { %v3893_v61 = vpop.f32.mrf.mxu3  ;;  %v528_v62 = vpop.f32.mrf.mxu2 }
 0x1eb   :  { %v451_v63 = vsel %vm79_vm0, %v3893_v61, -inf }
 0x1ec   :  { %3072 = vmatpush.xpose.msk.msra.mxu2 %vm181_vm1, %v3618_v45  ;;  %452 = vmax.xlane.f32.xlu0 %v451_v63 }
 0x1ef   :  { %3010 = vmatmul.msk.f32.gmra.mxu2 %vm181_vm1, %v1121_v52  ;;  %v1577_v19 = vpop.f32.mrf.mxu0 }
 0x1f0   :  { %3073 = vmatpush.xpose.msk.msra.mxu2 %vm181_vm1, %v3597_v36 }
 0x1f2   :  { %v3902_v0 = vpop.f32.mrf.mxu3  ;;  %v531_v1 = vpop.f32.mrf.mxu2 }
 0x1f3   :  { %v454_v3 = vsel %vm79_vm0, %v3902_v0, -inf }
 0x1f4   :  { %455 = vmax.xlane.f32.xlu0 %v454_v3 }
 0x1f7   :  { %3011 = vmatmul.msk.f32.gmra.mxu2 %vm181_vm1, %v1124_v55  ;;  %v1580_v20 = vpop.f32.mrf.mxu0 }
 0x1fa   :  { %v3907_v5 = vpop.f32.mrf.mxu3  ;;  %v534_v6 = vpop.f32.mrf.mxu2 }
 0x1fb   :  { %v457_v7 = vsel %vm79_vm0, %v3907_v5, -inf }
 0x1fc   :  { %458 = vmax.xlane.f32.xlu1 %v457_v7 }
 0x1ff   :  { %3012 = vmatmul.msk.f32.gmra.mxu2 %vm181_vm1, %v1127_v57  ;;  %v1583_v21 = vpop.f32.mrf.mxu0 }
 0x202   :  { %v3912_v9 = vpop.f32.mrf.mxu3  ;;  %v537_v10 = vpop.f32.mrf.mxu2 }
 0x203   :  { %v460_v11 = vsel %vm79_vm0, %v3912_v9, -inf }
 0x204   :  { %461 = vmax.xlane.f32.xlu1 %v460_v11 }
 0x207   :  { %3041 = vmatmul.msk.f32.vlgmr.msrb.gmra.mxu2 %vm181_vm1, %v1343_v60  ;;  %v1799_v23 = vpop.f32.mrf.mxu0 }
 0x208   :  { %3102 = vmatpush.xpose.msk.msrb.mxu2 %vm181_vm1, %v3657_v2 }
 0x20a   :  { %v3919_v13 = vpop.f32.mrf.mxu3  ;;  %v540_v14 = vpop.f32.mrf.mxu2 }
 0x20b   :  { %569 = vmatpush.msra.mxu1 %v540_v14  ;;  %v463_v15 = vsel %vm79_vm0, %v3919_v13, -inf }
 0x20c   :  { %3103 = vmatpush.xpose.msk.msrb.mxu2 %vm181_vm1, %v3648_v59  ;;  %464 = vmax.xlane.f32.xlu2 %v463_v15 }
 0x20d   :  { %570 = vmatpush.msra.mxu1 %v537_v10 }
 0x20f   :  { %571 = vmatpush.msra.mxu1 %v534_v6  ;;  %3042 = vmatmul.msk.f32.gmra.mxu2 %vm181_vm1, %v1346_v4  ;;  %v1802_v25 = vpop.f32.mrf.mxu0  ;;  %v285_v4 = vsel %vm79_vm0, %v3881_v56, -inf }
 0x210   :  { %3104 = vmatpush.xpose.msk.msrb.mxu2 %vm181_vm1, %v3639_v54 }
 0x211   :  { %572 = vmatpush.msra.mxu1 %v531_v1 }
 0x212   :  { %v3938_v22 = vpop.f32.mrf.mxu2 }
 0x213   :  { %573 = vmatpush.msra.mxu1 %v528_v62  ;;  %v721_v10 = vsel %vm79_vm0, %v3938_v22, -inf }
 0x214   :  { %3105 = vmatpush.xpose.msk.msrb.mxu2 %vm181_vm1, %v3618_v45 }
 0x217   :  { %3043 = vmatmul.msk.f32.gmra.mxu2 %vm181_vm1, %v1349_v8  ;;  %v1805_v29 = vpop.f32.mrf.mxu0  ;;  %v288_v8 = vsel %vm79_vm0, %v3886_v58, -inf }
 0x218   :  { %3106 = vmatpush.xpose.msk.msrb.mxu2 %vm181_vm1, %v3597_v36 }
 0x21a   :  { %v3941_v24 = vpop.f32.mrf.mxu2 }
 0x21b   :  { %v724_v7 = vsel %vm79_vm0, %v3941_v24, -inf }
 0x21f   :  { %3044 = vmatmul.msk.f32.gmra.mxu2 %vm181_vm1, %v1352_v12  ;;  %v1808_v38 = vpop.f32.mrf.mxu0 }
 0x222   :  { %v3945_v26 = vpop.f32.mrf.mxu2 }
 0x223   :  { %v727_v11 = vsel %vm79_vm0, %v3945_v26, -inf }
 0x227   :  { %3045 = vmatmul.msk.f32.gmra.mxu2 %vm181_vm1, %v1355_v16  ;;  %v1811_v46 = vpop.f32.mrf.mxu0  ;;  %v2950_v16 = vld [vmem:[%s4975_s24 + $0x58] sm:$0xff] }
 0x228   :  { %793 = vmatpush.msrb.mxu1 %v2950_v16 }
 0x22a   :  { %v3949_v31 = vpop.f32.mrf.mxu2 }
 0x22f   :  { %3074 = vmatmul.msk.f32.vlgmr.msra.gmra.mxu2 %vm181_vm1, %v1571_v17  ;;  %v2949_v17 = vld [vmem:[%s4975_s24 + $0x50] sm:$0xff] }
 0x230   :  { %794 = vmatpush.msrb.mxu1 %v2949_v17 }
 0x232   :  { %v3954_v39 = vpop.f32.mrf.mxu2 }
 0x237   :  { %3075 = vmatmul.msk.f32.gmra.mxu2 %vm181_vm1, %v1574_v18 }
 0x23a   :  { %v3959_v47 = vpop.f32.mrf.mxu2 }
 0x23b   :  { %v949_v17 = vsel %vm79_vm0, %v3959_v47, -inf }
 0x23f   :  { %3076 = vmatmul.msk.f32.gmra.mxu2 %vm181_vm1, %v1577_v19  ;;  %v2948_v19 = vld [vmem:[%s4975_s24 + $0x48] sm:$0xff] }
 0x240   :  { %795 = vmatpush.msrb.mxu1 %v2948_v19 }
 0x247   :  { %3077 = vmatmul.msk.f32.gmra.mxu2 %vm181_vm1, %v1580_v20 }
 0x24f   :  { %3078 = vmatmul.msk.f32.gmra.mxu2 %vm181_vm1, %v1583_v21 }
 0x257   :  { %3107 = vmatmul.msk.f32.vlgmr.msrb.gmra.mxu2 %vm181_vm1, %v1799_v23  ;;  %v2947_v23 = vld [vmem:[%s4975_s24 + $0x40] sm:$0xff] }
 0x258   :  { %796 = vmatpush.msrb.mxu1 %v2947_v23 }
 0x25f   :  { %v453_v27 = vpop.xlane.xlu0 %452  ;;  %3108 = vmatmul.msk.f32.gmra.mxu2 %vm181_vm1, %v1802_v25 }
 0x260   :  { %v466_v28 = vsub.f32 %v3893_v61, %v453_v27 }
 0x262   :  { %v471_v30 = vmul.f32 1.442695, %v466_v28 }
 0x264   :  { %3196 = vpow2.f32 %v471_v30 }
 0x267   :  { %v456_v32 = vpop.xlane.xlu0 %455  ;;  %3109 = vmatmul.msk.f32.gmra.mxu2 %vm181_vm1, %v1805_v29 }
 0x268   :  { %v467_v33 = vsub.f32 %v3902_v0, %v456_v32  ;;  %v276_v0 = vsel %vm79_vm0, %v3868_v50, -inf }
 0x26a   :  { %v3197_v34 = vpop.eup %3196  ;;  %v473_v35 = vmul.f32 1.442695, %v467_v33 }
 0x26b   :  { %v481_v37 = vsel %vm79_vm0, %v3197_v34, 0.0 }
 0x26c   :  { %3198 = vpow2.f32 %v473_v35  ;;  %482 = vadd.xlane.f32.xlu2 %v481_v37 }
 0x26f   :  { %v459_v40 = vpop.xlane.xlu1 %458  ;;  %3110 = vmatmul.msk.f32.gmra.mxu2 %vm181_vm1, %v1808_v38 }
 0x270   :  { %v468_v41 = vsub.f32 %v3907_v5, %v459_v40  ;;  %v279_v5 = vsel %vm79_vm0, %v3875_v51, -inf }
 0x272   :  { %v3199_v42 = vpop.eup %3198  ;;  %v475_v43 = vmul.f32 1.442695, %v468_v41 }
 0x273   :  { %v484_v44 = vsel %vm79_vm0, %v3199_v42, 0.0 }
 0x274   :  { %3200 = vpow2.f32 %v475_v43  ;;  %485 = vadd.xlane.f32.xlu0 %v484_v44 }
 0x277   :  { %v462_v48 = vpop.xlane.xlu1 %461  ;;  %3111 = vmatmul.msk.f32.gmra.mxu2 %vm181_vm1, %v1811_v46 }
 0x278   :  { %v469_v49 = vsub.f32 %v3912_v9, %v462_v48  ;;  %v282_v9 = vsel %vm79_vm0, %v3878_v53, -inf }
 0x27a   :  { %v3201_v52 = vpop.eup %3200  ;;  %v477_v55 = vmul.f32 1.442695, %v469_v49 }
 0x27b   :  { %v487_v57 = vsel %vm79_vm0, %v3201_v52, 0.0 }
 0x27c   :  { %3202 = vpow2.f32 %v477_v55  ;;  %488 = vadd.xlane.f32.xlu1 %v487_v57 }
 0x27f   :  { %v465_v60 = vpop.xlane.xlu2 %464 }
 0x280   :  { %v470_v61 = vsub.f32 %v3919_v13, %v465_v60 }
 0x282   :  { %v3203_v62 = vpop.eup %3202  ;;  %v479_v63 = vmul.f32 1.442695, %v470_v61  ;;  %v730_v61 = vsel %vm79_vm0, %v3949_v31, -inf }
 0x283   :  { %v490_v1 = vsel %vm79_vm0, %v3203_v62, 0.0 }
 0x284   :  { %3204 = vpow2.f32 %v479_v63  ;;  %277 = vmax.xlane.f32.xlu1 %v276_v0  ;;  %491 = vadd.xlane.f32.xlu2 %v490_v1 }
 0x28a   :  { %v3968_v3 = vpop.eup %3204 }
 0x28b   :  { %v493_v6 = vsel %vm79_vm0, %v3968_v3, 0.0 }
 0x28c   :  { %286 = vmax.xlane.f32.xlu1 %v285_v4  ;;  %280 = vmax.xlane.f32.xlu2 %v279_v5 }
 0x28d   :  { %494 = vadd.xlane.f32.xlu0 %v493_v6 }
 0x294   :  { %725 = vmax.xlane.f32.xlu1 %v724_v7  ;;  %289 = vmax.xlane.f32.xlu2 %v288_v8 }
 0x295   :  { %283 = vmax.xlane.f32.xlu0 %v282_v9  ;;  %v733_v9 = vsel %vm79_vm0, %v3954_v39, -inf }
 0x29d   :  { %722 = vmax.xlane.f32.xlu0 %v721_v10 }
 0x2a5   :  { %728 = vmax.xlane.f32.xlu0 %v727_v11 }
 0x2df   :  { %v483_v12 = vpop.xlane.xlu2 %482 }
 0x2e0   :  { %3206 = vrcp.f32 %v483_v12 }
 0x2e6   :  { %v3207_v13 = vpop.eup %3206 }
 0x2e7   :  { %v501_v14 = vmul.f32 %v3207_v13, %v3197_v34  ;;  %v486_v15 = vpop.xlane.xlu0 %485  ;;  %v2980_v13 = vld [vmem:[%s4975_s24 + $0x60] sm:$0xff] }
 0x2e8   :  { %3208 = vrcp.f32 %v486_v15 }
 0x2e9   :  { %2918 = vmatmul.msk.f32.vlgmr.msra.gmra.mxu1 %vm79_vm0, %v501_v14 }
 0x2ee   :  { %v3209_v18 = vpop.eup %3208 }
 0x2ef   :  { %v489_v20 = vpop.xlane.xlu1 %488  ;;  %v502_v21 = vmul.f32 %v3209_v18, %v3199_v42 }
 0x2f0   :  { %3210 = vrcp.f32 %v489_v20 }
 0x2f1   :  { %2919 = vmatmul.msk.f32.gmra.mxu1 %vm79_vm0, %v502_v21 }
 0x2f6   :  { %v3211_v25 = vpop.eup %3210 }
 0x2f7   :  { %v278_v27 = vpop.xlane.xlu1 %277  ;;  %v492_v28 = vpop.xlane.xlu2 %491  ;;  %v503_v29 = vmul.f32 %v3211_v25, %v3201_v52 }
 0x2f8   :  { %v291_v30 = vsub.f32 %v3868_v50, %v278_v27  ;;  %3212 = vrcp.f32 %v492_v28 }
 0x2f9   :  { %2920 = vmatmul.msk.f32.gmra.mxu1 %vm79_vm0, %v503_v29 }
 0x2fa   :  { %v296_v32 = vmul.f32 1.442695, %v291_v30 }
 0x2fc   :  { %3214 = vpow2.f32 %v296_v32 }
 0x2fe   :  { %v3213_v33 = vpop.eup %3212 }
 0x2ff   :  { %v287_v34 = vpop.xlane.xlu1 %286  ;;  %v281_v35 = vpop.xlane.xlu2 %280  ;;  %v504_v37 = vmul.f32 %v3213_v33, %v3203_v62 }
 0x300   :  { %v495_v38 = vpop.xlane.xlu0 %494  ;;  %v292_v40 = vsub.f32 %v3875_v51, %v281_v35  ;;  %v294_v42 = vsub.f32 %v3881_v56, %v287_v34  ;;  %v4010_v51 = vpop.f32.mrf.mxu2 }
 0x301   :  { %3216 = vrcp.f32 %v495_v38  ;;  %2921 = vmatmul.msk.f32.gmra.mxu1 %vm79_vm0, %v504_v37  ;;  %v952_v16 = vsel %vm79_vm0, %v4010_v51, -inf  ;;  %v3016_v37 = vld [vmem:[%s4975_s24 + $0x98] sm:$0xff]  ;;  %v3015_v38 = vld [vmem:[%s4975_s24 + $0x90] sm:$0xff] }
 0x302   :  { %v4004_v41 = vpop.eup %3214  ;;  %v298_v50 = vmul.f32 1.442695, %v292_v40  ;;  %v302_v44 = vmul.f32 1.442695, %v294_v42  ;;  %v3014_v40 = vld [vmem:[%s4975_s24 + $0x88] sm:$0xff]  ;;  %v3013_v42 = vld [vmem:[%s4975_s24 + $0x80] sm:$0xff] }
 0x303   :  { %v306_v43 = vsel %vm79_vm0, %v4004_v41, 0.0 }
 0x304   :  { %307 = vadd.xlane.f32.xlu2 %v306_v43  ;;  %3218 = vpow2.f32 %v298_v50  ;;  %v3049_v50 = vld [vmem:[%s4975_s24 + $0xb8] sm:$0xff]  ;;  %v3048_v43 = vld [vmem:[%s4975_s24 + $0xb0] sm:$0xff] }
 0x305   :  { %3220 = vpow2.f32 %v302_v44 }
 0x307   :  { %v3217_v46 = vpop.eup %3216  ;;  %v290_v49 = vpop.xlane.xlu2 %289 }
 0x308   :  { %v284_v48 = vpop.xlane.xlu0 %283  ;;  %v505_v52 = vmul.f32 %v3217_v46, %v3968_v3  ;;  %v295_v60 = vsub.f32 %v3886_v58, %v290_v49  ;;  %v726_v63 = vpop.xlane.xlu1 %725  ;;  %v2983_v58 = vld [vmem:[%s4975_s24 + $0x78] sm:$0xff]  ;;  %v3047_v46 = vld [vmem:[%s4975_s24 + $0xa8] sm:$0xff] }
 0x309   :  { %v293_v55 = vsub.f32 %v3878_v53, %v284_v48  ;;  %v737_v3 = vsub.f32 %v3941_v24, %v726_v63  ;;  %v4031_v5 = vpop.f32.mrf.mxu2  ;;  %1021 = vmatpush.msra.mxu1 %v2983_v58  ;;  %v2982_v24 = vld [vmem:[%s4975_s24 + $0x70] sm:$0xff]  ;;  %v3046_v48 = vld [vmem:[%s4975_s24 + $0xa0] sm:$0xff] }
 0x30a   :  { %2922 = vmatmul.msk.f32.gmra.mxu1 %vm79_vm0, %v505_v52  ;;  %v4014_v56 = vpop.eup %3218  ;;  %v304_v0 = vmul.f32 1.442695, %v295_v60  ;;  %v955_v27 = vsel %vm79_vm0, %v4031_v5, -inf }
 0x30b   :  { %v300_v57 = vmul.f32 1.442695, %v293_v55  ;;  %v309_v62 = vsel %vm79_vm0, %v4014_v56, 0.0  ;;  %v4021_v53 = vpop.eup %3220  ;;  %v743_v10 = vmul.f32 1.442695, %v737_v3  ;;  %1022 = vmatpush.msra.mxu1 %v2982_v24 }
 0x30c   :  { %731 = vmax.xlane.f32.xlu2 %v730_v61  ;;  %310 = vadd.xlane.f32.xlu1 %v309_v62  ;;  %v315_v7 = vsel %vm79_vm0, %v4021_v53, 0.0 }
 0x30d   :  { %3222 = vpow2.f32 %v300_v57 }
 0x30e   :  { %3224 = vpow2.f32 %v304_v0 }
 0x30f   :  { %3226 = vpow2.f32 %v743_v10 }
 0x310   :  { %v723_v1 = vpop.xlane.xlu0 %722 }
 0x311   :  { %v736_v6 = vsub.f32 %v3938_v22, %v723_v1  ;;  %v2981_v22 = vld [vmem:[%s4975_s24 + $0x68] sm:$0xff]  ;;  %v4060_v19 = vpop.f32.mrf.mxu2 }
 0x312   :  { %2951 = vmatmul.msk.f32.vlgmr.msrb.gmra.mxu1 %vm181_vm1, %v3597_v36  ;;  %v958_v32 = vsel %vm79_vm0, %v4060_v19, -inf }
 0x313   :  { %v4029_v4 = vpop.eup %3222  ;;  %v741_v11 = vmul.f32 1.442695, %v736_v6  ;;  %1023 = vmatpush.msra.mxu1 %v2981_v22 }
 0x314   :  { %v312_v8 = vsel %vm79_vm0, %v4029_v4, 0.0  ;;  %316 = vadd.xlane.f32.xlu2 %v315_v7  ;;  %734 = vmax.xlane.f32.xlu1 %v733_v9  ;;  %v4049_v14 = vpop.eup %3224 }
 0x315   :  { %313 = vadd.xlane.f32.xlu0 %v312_v8  ;;  %3228 = vpow2.f32 %v741_v11  ;;  %1024 = vmatpush.msra.mxu1 %v2980_v13  ;;  %v318_v18 = vsel %vm79_vm0, %v4049_v14, 0.0  ;;  %v4062_v21 = vpop.eup %3226  ;;  %v3082_v13 = vld [vmem:[%s4975_s24 + $0xd8] sm:$0xff] }
 0x317   :  { %1249 = vmatpush.msrb.mxu1 %v3016_v37 }
 0x318   :  { %v729_v12 = vpop.xlane.xlu0 %728 }
 0x319   :  { %v738_v15 = vsub.f32 %v3945_v26, %v729_v12  ;;  %v754_v26 = vsel %vm79_vm0, %v4062_v21, 0.0  ;;  %v4074_v28 = vpop.f32.mrf.mxu2  ;;  %1250 = vmatpush.msrb.mxu1 %v3015_v38 }
 0x31a   :  { %2952 = vmatmul.msk.f32.gmra.mxu1 %vm181_vm1, %v3618_v45  ;;  %v961_v30 = vsel %vm79_vm0, %v4074_v28, -inf }
 0x31b   :  { %v745_v20 = vmul.f32 1.442695, %v738_v15  ;;  %v4064_v23 = vpop.eup %3228  ;;  %1251 = vmatpush.msrb.mxu1 %v3014_v40 }
 0x31c   :  { %953 = vmax.xlane.f32.xlu2 %v952_v16  ;;  %319 = vadd.xlane.f32.xlu1 %v318_v18  ;;  %v751_v25 = vsel %vm79_vm0, %v4064_v23, 0.0 }
 0x31d   :  { %950 = vmax.xlane.f32.xlu0 %v949_v17  ;;  %3230 = vpow2.f32 %v745_v20  ;;  %1252 = vmatpush.msrb.mxu1 %v3013_v42  ;;  %v3080_v17 = vld [vmem:[%s4975_s24 + $0xc8] sm:$0xff] }
 0x321   :  { %v4086_v34 = vpop.f32.mrf.mxu2 }
 0x322   :  { %2953 = vmatmul.msk.f32.gmra.mxu1 %vm181_vm1, %v3639_v54  ;;  %v1177_v35 = vsel %vm79_vm0, %v4086_v34, -inf }
 0x323   :  { %v4076_v29 = vpop.eup %3230 }
 0x324   :  { %755 = vadd.xlane.f32.xlu2 %v754_v26  ;;  %956 = vmax.xlane.f32.xlu1 %v955_v27  ;;  %v757_v33 = vsel %vm79_vm0, %v4076_v29, 0.0  ;;  %v3079_v27 = vld [vmem:[%s4975_s24 + $0xc0] sm:$0xff] }
 0x325   :  { %752 = vadd.xlane.f32.xlu0 %v751_v25 }
 0x329   :  { %v4134_v52 = vpop.f32.mrf.mxu2 }
 0x32a   :  { %2954 = vmatmul.msk.f32.gmra.mxu1 %vm181_vm1, %v3648_v59 }
 0x32c   :  { %962 = vmax.xlane.f32.xlu2 %v961_v30  ;;  %758 = vadd.xlane.f32.xlu1 %v757_v33 }
 0x32d   :  { %959 = vmax.xlane.f32.xlu0 %v958_v32 }
 0x331   :  { %v4142_v60 = vpop.f32.mrf.mxu2 }
 0x332   :  { %2955 = vmatmul.msk.f32.gmra.mxu1 %vm181_vm1, %v3657_v2 }
 0x334   :  { %1178 = vmax.xlane.f32.xlu1 %v1177_v35 }
 0x339   :  { %v4151_v6 = vpop.f32.mrf.mxu2 }
 0x33a   :  { %2984 = vmatmul.msk.f32.vlgmr.msra.gmra.mxu1 %vm181_vm1, %v3597_v36 }
 0x33b   :  { %1477 = vmatpush.msra.mxu1 %v3049_v50 }
 0x33d   :  { %1478 = vmatpush.msra.mxu1 %v3048_v43 }
 0x33f   :  { %1479 = vmatpush.msra.mxu1 %v3047_v46 }
 0x341   :  { %1480 = vmatpush.msra.mxu1 %v3046_v48  ;;  %v4180_v30 = vpop.f32.mrf.mxu2 }
 0x342   :  { %2985 = vmatmul.msk.f32.gmra.mxu1 %vm181_vm1, %v3618_v45 }
 0x34a   :  { %2986 = vmatmul.msk.f32.gmra.mxu1 %vm181_vm1, %v3639_v54 }
 0x352   :  { %2987 = vmatmul.msk.f32.gmra.mxu1 %vm181_vm1, %v3648_v59 }
 0x35a   :  { %2988 = vmatmul.msk.f32.gmra.mxu1 %vm181_vm1, %v3657_v2 }
 0x362   :  { %3017 = vmatmul.msk.f32.vlgmr.msrb.gmra.mxu1 %vm181_vm1, %v3597_v36 }
 0x363   :  { %1705 = vmatpush.msrb.mxu1 %v3082_v13  ;;  %v1189_v13 = vsel %vm79_vm0, %v4180_v30, -inf }
 0x366   :  { %v4122_v44 = vpop.f32.mrf.mxu1 }
 0x36a   :  { %3018 = vmatmul.msk.f32.gmra.mxu1 %vm181_vm1, %v3618_v45 }
 0x36e   :  { %v4132_v49 = vpop.f32.mrf.mxu1 }
 0x372   :  { %3019 = vmatmul.msk.f32.gmra.mxu1 %vm181_vm1, %v3639_v54 }
 0x376   :  { %v4138_v55 = vpop.f32.mrf.mxu1 }
 0x377   :  { %v308_v57 = vpop.xlane.xlu2 %307 }
 0x378   :  { %3232 = vrcp.f32 %v308_v57 }
 0x37a   :  { %3020 = vmatmul.msk.f32.gmra.mxu1 %vm181_vm1, %v3648_v59 }
 0x37e   :  { %v3233_v61 = vpop.eup %3232  ;;  %v4144_v62 = vpop.f32.mrf.mxu1 }
 0x37f   :  { %v326_v63 = vmul.f32 %v3233_v61, %v4004_v41  ;;  %v732_v0 = vpop.xlane.xlu2 %731  ;;  %v311_v1 = vpop.xlane.xlu1 %310 }
 0x380   :  { %v739_v3 = vsub.f32 %v3949_v31, %v732_v0  ;;  %3234 = vrcp.f32 %v311_v1  ;;  %v4205_v61 = vpop.f32.mrf.mxu2 }
 0x381   :  { %2923 = vmatmul.msk.f32.vlgmr.msra.gmra.mxu3 %vm79_vm0, %v326_v63 }
 0x382   :  { %v747_v58 = vmul.f32 1.442695, %v739_v3  ;;  %3021 = vmatmul.msk.f32.gmra.mxu1 %vm181_vm1, %v3657_v2 }
 0x384   :  { %3236 = vpow2.f32 %v747_v58 }
 0x386   :  { %v3235_v7 = vpop.eup %3234 }
 0x387   :  { %v4153_v24 = vpop.f32.mrf.mxu1  ;;  %v317_v8 = vpop.xlane.xlu2 %316  ;;  %v327_v22 = vmul.f32 %v3235_v7, %v4014_v56 }
 0x388   :  { %v314_v9 = vpop.xlane.xlu0 %313  ;;  %v735_v41 = vpop.xlane.xlu1 %734 }
 0x389   :  { %3238 = vrcp.f32 %v314_v9  ;;  %v740_v31 = vsub.f32 %v3954_v39, %v735_v41  ;;  %2924 = vmatmul.msk.f32.gmra.mxu3 %vm79_vm0, %v327_v22  ;;  %v3081_v39 = vld [vmem:[%s4975_s24 + $0xd0] sm:$0xff] }
 0x38a   :  { %v4157_v10 = vpop.eup %3236  ;;  %3050 = vmatmul.msk.f32.vlgmr.msra.gmra.mxu1 %vm181_vm1, %v3597_v36 }
 0x38b   :  { %v749_v11 = vmul.f32 1.442695, %v740_v31  ;;  %v760_v12 = vsel %vm79_vm0, %v4157_v10, 0.0  ;;  %1706 = vmatpush.msrb.mxu1 %v3081_v39 }
 0x38c   :  { %761 = vadd.xlane.f32.xlu0 %v760_v12 }
 0x38d   :  { %3240 = vpow2.f32 %v749_v11  ;;  %1707 = vmatpush.msrb.mxu1 %v3080_v17 }
 0x38e   :  { %3242 = vrcp.f32 %v317_v8 }
 0x38f   :  { %v3239_v56 = vpop.eup %3238  ;;  %v4170_v15 = vpop.f32.mrf.mxu1  ;;  %1708 = vmatpush.msrb.mxu1 %v3079_v27  ;;  %v1405_v27 = vsel %vm79_vm0, %v4205_v61, -inf }
 0x390   :  { %v954_v16 = vpop.xlane.xlu2 %953  ;;  %v951_v18 = vpop.xlane.xlu0 %950  ;;  %v328_v25 = vmul.f32 %v3239_v56, %v4029_v4  ;;  %v1180_v4 = vsel %vm79_vm0, %v4134_v52, -inf }
 0x391   :  { %v320_v20 = vpop.xlane.xlu1 %319  ;;  %v965_v26 = vsub.f32 %v4010_v51, %v954_v16  ;;  %v964_v32 = vsub.f32 %v3959_v47, %v951_v18 }
 0x392   :  { %2925 = vmatmul.msk.f32.gmra.mxu3 %vm79_vm0, %v328_v25  ;;  %3051 = vmatmul.msk.f32.gmra.mxu1 %vm181_vm1, %v3618_v45 }
 0x393   :  { %v971_v33 = vmul.f32 1.442695, %v965_v26  ;;  %v4186_v35 = vpop.eup %3240  ;;  %v969_v51 = vmul.f32 1.442695, %v964_v32 }
 0x394   :  { %v763_v37 = vsel %vm79_vm0, %v4186_v35, 0.0  ;;  %1181 = vmax.xlane.f32.xlu0 %v1180_v4  ;;  %v3243_v38 = vpop.eup %3242 }
 0x395   :  { %3244 = vpow2.f32 %v971_v33  ;;  %764 = vadd.xlane.f32.xlu2 %v763_v37  ;;  %v329_v43 = vmul.f32 %v3243_v38, %v4021_v53  ;;  %v1183_v53 = vsel %vm79_vm0, %v4142_v60, -inf  ;;  %v3115_v33 = vld [vmem:[%s4975_s24 + $0xf8] sm:$0xff]  ;;  %v3114_v37 = vld [vmem:[%s4975_s24 + $0xf0] sm:$0xff] }
 0x396   :  { %3246 = vpow2.f32 %v969_v51  ;;  %1933 = vmatpush.msra.mxu1 %v3115_v33 }
 0x397   :  { %3248 = vrcp.f32 %v320_v20  ;;  %v4192_v47 = vpop.f32.mrf.mxu1 }
 0x398   :  { %v4194_v40 = vpop.xlane.xlu2 %755  ;;  %v753_v42 = vpop.xlane.xlu0 %752  ;;  %1934 = vmatpush.msra.mxu1 %v3114_v37 }
 0x399   :  { %v957_v50 = vpop.xlane.xlu1 %956 }
 0x39a   :  { %v966_v46 = vsub.f32 %v4031_v5, %v957_v50  ;;  %2926 = vmatmul.msk.f32.gmra.mxu3 %vm79_vm0, %v329_v43  ;;  %3052 = vmatmul.msk.f32.gmra.mxu1 %vm181_vm1, %v3639_v54 }
 0x39b   :  { %v4198_v48 = vpop.eup %3244 }
 0x39c   :  { %v4203_v57 = vpop.eup %3246  ;;  %v973_v63 = vmul.f32 1.442695, %v966_v46  ;;  %v982_v0 = vsel %vm79_vm0, %v4198_v48, 0.0 }
 0x39d   :  { %v979_v5 = vsel %vm79_vm0, %v4203_v57, 0.0  ;;  %983 = vadd.xlane.f32.xlu0 %v982_v0  ;;  %v3249_v1 = vpop.eup %3248  ;;  %1184 = vmax.xlane.f32.xlu2 %v1183_v53  ;;  %v3112_v0 = vld [vmem:[%s4975_s24 + $0xe0] sm:$0xff] }
 0x39e   :  { %3250 = vpow2.f32 %v973_v63  ;;  %980 = vadd.xlane.f32.xlu1 %v979_v5  ;;  %v330_v41 = vmul.f32 %v3249_v1, %v4049_v14  ;;  %v3113_v63 = vld [vmem:[%s4975_s24 + $0xe8] sm:$0xff] }
 0x39f   :  { %v804_v3 = vpop.f32.mrf.mxu1  ;;  %1935 = vmatpush.msra.mxu1 %v3113_v63 }
 0x3a0   :  { %v963_v58 = vpop.xlane.xlu2 %962  ;;  %v960_v7 = vpop.xlane.xlu0 %959 }
 0x3a1   :  { %v4213_v8 = vpop.xlane.xlu1 %758  ;;  %v968_v9 = vsub.f32 %v4074_v28, %v963_v58  ;;  %v967_v22 = vsub.f32 %v4060_v19, %v960_v7  ;;  %v1186_v28 = vsel %vm79_vm0, %v4151_v6, -inf  ;;  %v4229_v19 = vpop.f32.mrf.mxu2  ;;  %1936 = vmatpush.msra.mxu1 %v3112_v0 }
 0x3a2   :  { %2927 = vmatmul.msk.f32.gmra.mxu3 %vm79_vm0, %v330_v41  ;;  %3053 = vmatmul.msk.f32.gmra.mxu1 %vm181_vm1, %v3648_v59 }
 0x3a3   :  { %v977_v31 = vmul.f32 1.442695, %v968_v9  ;;  %v975_v12 = vmul.f32 1.442695, %v967_v22 }
 0x3a4   :  { %v4221_v11 = vpop.eup %3250 }
 0x3a5   :  { %3252 = vpow2.f32 %v977_v31  ;;  %v985_v14 = vsel %vm79_vm0, %v4221_v11, 0.0  ;;  %1190 = vmax.xlane.f32.xlu0 %v1189_v13 }
 0x3a6   :  { %3254 = vpow2.f32 %v975_v12  ;;  %1187 = vmax.xlane.f32.xlu1 %v1186_v28  ;;  %986 = vadd.xlane.f32.xlu2 %v985_v14 }
 0x3a7   :  { %v807_v39 = vpop.f32.mrf.mxu1 }
 0x3a9   :  { %v1179_v56 = vpop.xlane.xlu1 %1178 }
 0x3aa   :  { %v1192_v16 = vsub.f32 %v4086_v34, %v1179_v56  ;;  %3054 = vmatmul.msk.f32.gmra.mxu1 %vm181_vm1, %v3657_v2  ;;  %v4244_v34 = vpop.f32.mrf.mxu2 }
 0x3ab   :  { %v4232_v17 = vpop.eup %3252  ;;  %v1411_v4 = vsel %vm79_vm0, %v4244_v34, -inf }
 0x3ac   :  { %v4236_v18 = vpop.eup %3254  ;;  %v1197_v20 = vmul.f32 1.442695, %v1192_v16  ;;  %v991_v26 = vsel %vm79_vm0, %v4232_v17, 0.0 }
 0x3ad   :  { %v988_v25 = vsel %vm79_vm0, %v4236_v18, 0.0  ;;  %992 = vadd.xlane.f32.xlu0 %v991_v26 }
 0x3ae   :  { %3256 = vpow2.f32 %v1197_v20  ;;  %989 = vadd.xlane.f32.xlu1 %v988_v25  ;;  %1406 = vmax.xlane.f32.xlu2 %v1405_v27 }
 0x3af   :  { %3258 = vrcp.f32 %v753_v42  ;;  %v810_v32 = vpop.f32.mrf.mxu1  ;;  %v1408_v42 = vsel %vm79_vm0, %v4229_v19, -inf }
 0x3b0   :  { %839 = vmatpush.msrb.mxu3 %v810_v32  ;;  %3260 = vrcp.f32 %v4194_v40 }
 0x3b1   :  { %3262 = vrcp.f32 %v4213_v8 }
 0x3b2   :  { %840 = vmatpush.msrb.mxu3 %v807_v39  ;;  %3083 = vmatmul.msk.f32.vlgmr.msrb.gmra.mxu1 %vm181_vm1, %v3597_v36  ;;  %v4272_v53 = vpop.f32.mrf.mxu2 }
 0x3b4   :  { %v4251_v51 = vpop.eup %3256  ;;  %841 = vmatpush.msrb.mxu3 %v804_v3 }
 0x3b5   :  { %v3259_v38 = vpop.eup %3258  ;;  %v1207_v50 = vsel %vm79_vm0, %v4251_v51, 0.0  ;;  %1412 = vmax.xlane.f32.xlu0 %v1411_v4 }
 0x3b6   :  { %1409 = vmax.xlane.f32.xlu1 %v1408_v42  ;;  %1208 = vadd.xlane.f32.xlu2 %v1207_v50  ;;  %v771_v43 = vmul.f32 %v3259_v38, %v4064_v23  ;;  %v3261_v23 = vpop.eup %3260 }
 0x3b7   :  { %842 = vmatpush.msrb.mxu3 %v4192_v47  ;;  %v1026_v46 = vpop.f32.mrf.mxu1  ;;  %v1414_v47 = vsel %vm79_vm0, %v4272_v53, -inf  ;;  %v772_v40 = vmul.f32 %v3261_v23, %v4062_v21  ;;  %v3263_v5 = vpop.eup %3262 }
 0x3b8   :  { %v773_v3 = vmul.f32 %v3263_v5, %v4076_v29 }
 0x3b9   :  { %843 = vmatpush.msrb.mxu3 %v4170_v15 }
 0x3ba   :  { %2956 = vmatmul.msk.f32.vlgmr.msrb.gmra.mxu3 %vm79_vm0, %v771_v43  ;;  %3084 = vmatmul.msk.f32.gmra.mxu1 %vm181_vm1, %v3618_v45  ;;  %v4298_v41 = vpop.f32.mrf.mxu2 }
 0x3bb   :  { %v1417_v23 = vsel %vm79_vm0, %v4298_v41, -inf }
 0x3be   :  { %1415 = vmax.xlane.f32.xlu2 %v1414_v47 }
 0x3bf   :  { %v1029_v15 = vpop.f32.mrf.mxu1 }
 0x3c2   :  { %2957 = vmatmul.msk.f32.gmra.mxu3 %vm79_vm0, %v772_v40  ;;  %3085 = vmatmul.msk.f32.gmra.mxu1 %vm181_vm1, %v3639_v54 }
 0x3c7   :  { %v1032_v1 = vpop.f32.mrf.mxu1 }
 0x3ca   :  { %2958 = vmatmul.msk.f32.gmra.mxu3 %vm79_vm0, %v773_v3  ;;  %3086 = vmatmul.msk.f32.gmra.mxu1 %vm181_vm1, %v3648_v59 }
 0x3cf   :  { %v1035_v58 = vpop.f32.mrf.mxu1 }
 0x3d2   :  { %3087 = vmatmul.msk.f32.gmra.mxu1 %vm181_vm1, %v3657_v2 }
 0x3d7   :  { %v1038_v7 = vpop.f32.mrf.mxu1 }
 0x3d8   :  { %1067 = vmatpush.msra.mxu3 %v1038_v7 }
 0x3da   :  { %1068 = vmatpush.msra.mxu3 %v1035_v58  ;;  %3116 = vmatmul.msk.f32.vlgmr.msra.gmra.mxu1 %vm181_vm1, %v3597_v36 }
 0x3dc   :  { %1069 = vmatpush.msra.mxu3 %v1032_v1 }
 0x3de   :  { %1070 = vmatpush.msra.mxu3 %v1029_v15 }
 0x3df   :  { %v1254_v21 = vpop.f32.mrf.mxu1 }
 0x3e0   :  { %1071 = vmatpush.msra.mxu3 %v1026_v46 }
 0x3e2   :  { %3117 = vmatmul.msk.f32.gmra.mxu1 %vm181_vm1, %v3618_v45  ;;  %v4302_v45 = vpop.f32.mrf.mxu2 }
 0x3e7   :  { %v1257_v29 = vpop.f32.mrf.mxu1 }
 0x3ea   :  { %3118 = vmatmul.msk.f32.gmra.mxu1 %vm181_vm1, %v3639_v54  ;;  %v4309_v14 = vpop.f32.mrf.mxu2 }
 0x3ef   :  { %v1260_v8 = vpop.f32.mrf.mxu1 }
 0x3f2   :  { %3119 = vmatmul.msk.f32.gmra.mxu1 %vm181_vm1, %v3648_v59  ;;  %v4323_v43 = vpop.f32.mrf.mxu2 }
 0x3f7   :  { %v1263_v9 = vpop.f32.mrf.mxu1 }
 0x3fa   :  { %3120 = vmatmul.msk.f32.gmra.mxu1 %vm181_vm1, %v3657_v2 }
 0x3ff   :  { %v1266_v36 = vpop.f32.mrf.mxu1  ;;  %v762_v22 = vpop.xlane.xlu0 %761 }
 0x400   :  { %3264 = vrcp.f32 %v762_v22  ;;  %1295 = vmatpush.msrb.mxu3 %v1266_v36 }
 0x402   :  { %1296 = vmatpush.msrb.mxu3 %v1263_v9 }
 0x404   :  { %1297 = vmatpush.msrb.mxu3 %v1260_v8 }
 0x406   :  { %v3265_v31 = vpop.eup %3264  ;;  %1298 = vmatpush.msrb.mxu3 %v1257_v29  ;;  %v4341_v29 = vpop.f32.mrf.mxu2 }
 0x407   :  { %v4304_v54 = vpop.f32.mrf.mxu1  ;;  %v1182_v12 = vpop.xlane.xlu0 %1181  ;;  %v774_v59 = vmul.f32 %v3265_v31, %v4157_v10 }
 0x408   :  { %v1193_v13 = vsub.f32 %v4134_v52, %v1182_v12  ;;  %1299 = vmatpush.msrb.mxu3 %v1254_v21  ;;  %v765_v28 = vpop.xlane.xlu2 %764 }
 0x409   :  { %3266 = vrcp.f32 %v765_v28  ;;  %2959 = vmatmul.msk.f32.gmra.mxu3 %vm79_vm0, %v774_v59 }
 0x40a   :  { %v1199_v2 = vmul.f32 1.442695, %v1193_v13 }
 0x40c   :  { %3268 = vpow2.f32 %v1199_v2 }
 0x40f   :  { %v3267_v39 = vpop.eup %3266  ;;  %v4311_v56 = vpop.f32.mrf.mxu1 }
 0x410   :  { %v984_v16 = vpop.xlane.xlu0 %983  ;;  %v1185_v26 = vpop.xlane.xlu2 %1184  ;;  %v775_v25 = vmul.f32 %v3267_v39, %v4186_v35 }
 0x411   :  { %v981_v20 = vpop.xlane.xlu1 %980  ;;  %v1194_v52 = vsub.f32 %v4142_v60, %v1185_v26 }
 0x412   :  { %3270 = vrcp.f32 %v981_v20  ;;  %v4315_v10 = vpop.eup %3268  ;;  %2960 = vmatmul.msk.f32.gmra.mxu3 %vm79_vm0, %v775_v25 }
 0x413   :  { %v1201_v27 = vmul.f32 1.442695, %v1194_v52  ;;  %v1210_v32 = vsel %vm79_vm0, %v4315_v10, 0.0 }
 0x414   :  { %1211 = vadd.xlane.f32.xlu1 %v1210_v32 }
 0x415   :  { %3272 = vpow2.f32 %v1201_v27 }
 0x416   :  { %3274 = vrcp.f32 %v984_v16  ;;  %v1639_v16 = vsel %vm79_vm0, %v4323_v43, -inf }
 0x417   :  { %v1488_v4 = vpop.f32.mrf.mxu1 }
 0x418   :  { %v3271_v33 = vpop.eup %3270  ;;  %v1191_v37 = vpop.xlane.xlu0 %1190 }
 0x419   :  { %v999_v38 = vmul.f32 %v3271_v33, %v4203_v57  ;;  %v1188_v35 = vpop.xlane.xlu1 %1187  ;;  %v1196_v42 = vsub.f32 %v4180_v30, %v1191_v37  ;;  %v987_v60 = vpop.xlane.xlu2 %986 }
 0x41a   :  { %v1195_v50 = vsub.f32 %v4151_v6, %v1188_v35 }
 0x41b   :  { %v1205_v46 = vmul.f32 1.442695, %v1196_v42  ;;  %2989 = vmatmul.msk.f32.vlgmr.msra.gmra.mxu3 %vm79_vm0, %v999_v38  ;;  %v4326_v63 = vpop.eup %3272 }
 0x41c   :  { %v1203_v0 = vmul.f32 1.442695, %v1195_v50  ;;  %1418 = vmax.xlane.f32.xlu1 %v1417_v23  ;;  %v1213_v57 = vsel %vm79_vm0, %v4326_v63, 0.0  ;;  %v3275_v30 = vpop.eup %3274 }
 0x41d   :  { %3276 = vpow2.f32 %v1205_v46  ;;  %1214 = vadd.xlane.f32.xlu0 %v1213_v57  ;;  %v1000_v5 = vmul.f32 %v3275_v30, %v4198_v48  ;;  %v1633_v48 = vsel %vm79_vm0, %v4302_v45, -inf }
 0x41e   :  { %3278 = vpow2.f32 %v1203_v0 }
 0x41f   :  { %3280 = vrcp.f32 %v987_v60  ;;  %v1491_v6 = vpop.f32.mrf.mxu1 }
 0x420   :  { %v993_v47 = vpop.xlane.xlu0 %992 }
 0x421   :  { %v990_v15 = vpop.xlane.xlu1 %989  ;;  %v1407_v40 = vpop.xlane.xlu2 %1406 }
 0x422   :  { %v1420_v1 = vsub.f32 %v4205_v61, %v1407_v40 }
 0x423   :  { %v4334_v3 = vpop.eup %3276  ;;  %2990 = vmatmul.msk.f32.gmra.mxu3 %vm79_vm0, %v1000_v5 }
 0x424   :  { %v4337_v58 = vpop.eup %3278  ;;  %v1425_v7 = vmul.f32 1.442695, %v1420_v1  ;;  %v1219_v21 = vsel %vm79_vm0, %v4334_v3, 0.0 }
 0x425   :  { %v1216_v8 = vsel %vm79_vm0, %v4337_v58, 0.0  ;;  %1220 = vadd.xlane.f32.xlu1 %v1219_v21  ;;  %v3281_v61 = vpop.eup %3280  ;;  %1634 = vmax.xlane.f32.xlu0 %v1633_v48 }
 0x426   :  { %3282 = vpow2.f32 %v1425_v7  ;;  %1217 = vadd.xlane.f32.xlu2 %v1216_v8  ;;  %v1001_v59 = vmul.f32 %v3281_v61, %v4221_v11 }
 0x427   :  { %3284 = vrcp.f32 %v990_v15  ;;  %v1494_v9 = vpop.f32.mrf.mxu1  ;;  %v4394_v15 = vpop.f32.mrf.mxu3 }
 0x428   :  { %v1413_v36 = vpop.xlane.xlu0 %1412  ;;  %1523 = vmatpush.msra.mxu3 %v1494_v9 }
 0x429   :  { %v1410_v22 = vpop.xlane.xlu1 %1409  ;;  %v1422_v31 = vsub.f32 %v4244_v34, %v1413_v36  ;;  %v1209_v12 = vpop.xlane.xlu2 %1208  ;;  %v1636_v34 = vsel %vm79_vm0, %v4309_v14, -inf }
 0x42a   :  { %v1421_v13 = vsub.f32 %v4229_v19, %v1410_v22  ;;  %1524 = vmatpush.msra.mxu3 %v1491_v6  ;;  %v4359_v19 = vpop.f32.mrf.mxu2 }
 0x42b   :  { %v1429_v28 = vmul.f32 1.442695, %v1422_v31  ;;  %2991 = vmatmul.msk.f32.gmra.mxu3 %vm79_vm0, %v1001_v59  ;;  %v1645_v50 = vsel %vm79_vm0, %v4359_v19, -inf }
 0x42c   :  { %v4351_v2 = vpop.eup %3282  ;;  %v1427_v39 = vmul.f32 1.442695, %v1421_v13  ;;  %1525 = vmatpush.msra.mxu3 %v1488_v4 }
 0x42d   :  { %3286 = vpow2.f32 %v1429_v28  ;;  %1640 = vmax.xlane.f32.xlu1 %v1639_v16  ;;  %v1435_v11 = vsel %vm79_vm0, %v4351_v2, 0.0  ;;  %v3285_v20 = vpop.eup %3284 }
 0x42e   :  { %3288 = vpow2.f32 %v1427_v39  ;;  %1637 = vmax.xlane.f32.xlu2 %v1636_v34  ;;  %1436 = vadd.xlane.f32.xlu0 %v1435_v11  ;;  %v1002_v52 = vmul.f32 %v3285_v20, %v4236_v18  ;;  %v1642_v18 = vsel %vm79_vm0, %v4341_v29, -inf }
 0x42f   :  { %3290 = vrcp.f32 %v993_v47  ;;  %1526 = vmatpush.msra.mxu3 %v4311_v56  ;;  %v1710_v26 = vpop.f32.mrf.mxu1  ;;  %v4396_v40 = vpop.f32.mrf.mxu3 }
 0x431   :  { %v1416_v25 = vpop.xlane.xlu2 %1415  ;;  %1527 = vmatpush.msra.mxu3 %v4304_v54 }
 0x432   :  { %v1423_v27 = vsub.f32 %v4272_v53, %v1416_v25  ;;  %v4376_v54 = vpop.f32.mrf.mxu2 }
 0x433   :  { %v4365_v32 = vpop.eup %3286  ;;  %2992 = vmatmul.msk.f32.gmra.mxu3 %vm79_vm0, %v1002_v52  ;;  %v1861_v60 = vsel %vm79_vm0, %v4376_v54, -inf }
 0x434   :  { %v4368_v33 = vpop.eup %3288  ;;  %v1431_v4 = vmul.f32 1.442695, %v1423_v27  ;;  %v1441_v37 = vsel %vm79_vm0, %v4365_v32, 0.0 }
 0x435   :  { %v1438_v56 = vsel %vm79_vm0, %v4368_v33, 0.0  ;;  %1442 = vadd.xlane.f32.xlu1 %v1441_v37  ;;  %v3291_v38 = vpop.eup %3290 }
 0x436   :  { %3292 = vpow2.f32 %v1431_v4  ;;  %1439 = vadd.xlane.f32.xlu2 %v1438_v56  ;;  %1643 = vmax.xlane.f32.xlu0 %v1642_v18  ;;  %v1003_v35 = vmul.f32 %v3291_v38, %v4232_v17 }
 0x437   :  { %3294 = vrcp.f32 %v1209_v12  ;;  %v1713_v53 = vpop.f32.mrf.mxu1  ;;  %v4400_v1 = vpop.f32.mrf.mxu3 }
 0x43a   :  { %v4389_v57 = vpop.f32.mrf.mxu2 }
 0x43b   :  { %2993 = vmatmul.msk.f32.gmra.mxu3 %vm79_vm0, %v1003_v35  ;;  %v1864_v30 = vsel %vm79_vm0, %v4389_v57, -inf }
 0x43c   :  { %v4380_v42 = vpop.eup %3292 }
 0x43d   :  { %1862 = vmax.xlane.f32.xlu1 %v1861_v60  ;;  %v1444_v46 = vsel %vm79_vm0, %v4380_v42, 0.0  ;;  %v3295_v0 = vpop.eup %3294 }
 0x43e   :  { %1646 = vmax.xlane.f32.xlu2 %v1645_v50  ;;  %1445 = vadd.xlane.f32.xlu0 %v1444_v46  ;;  %v1227_v17 = vmul.f32 %v3295_v0, %v4251_v51 }
 0x43f   :  { %v1716_v23 = vpop.f32.mrf.mxu1  ;;  %v4407_v31 = vpop.f32.mrf.mxu3 }
 0x442   :  { %v4416_v34 = vpop.f32.mrf.mxu2 }
 0x443   :  { %3022 = vmatmul.msk.f32.vlgmr.msrb.gmra.mxu3 %vm79_vm0, %v1227_v17  ;;  %v1867_v18 = vsel %vm79_vm0, %v4416_v34, -inf }
 0x446   :  { %1865 = vmax.xlane.f32.xlu0 %v1864_v30 }
 0x447   :  { %v1719_v6 = vpop.f32.mrf.mxu1  ;;  %v4423_v4 = vpop.f32.mrf.mxu3 }
 0x44f   :  { %v1722_v47 = vpop.f32.mrf.mxu1 }
 0x450   :  { %1751 = vmatpush.msrb.mxu3 %v1722_v47 }
 0x452   :  { %1752 = vmatpush.msrb.mxu3 %v1719_v6 }
 0x454   :  { %1753 = vmatpush.msrb.mxu3 %v1716_v23  ;;  %v4437_v23 = vpop.f32.mrf.mxu3 }
 0x456   :  { %1754 = vmatpush.msrb.mxu3 %v1713_v53 }
 0x457   :  { %v4398_v5 = vpop.f32.mrf.mxu1 }
 0x458   :  { %1755 = vmatpush.msrb.mxu3 %v1710_v26 }
 0x45f   :  { %v4405_v36 = vpop.f32.mrf.mxu1 }
 0x467   :  { %v4418_v11 = vpop.f32.mrf.mxu1 }
 0x46f   :  { %v1947_v35 = vpop.f32.mrf.mxu1 }
 0x487   :  { %v1212_v51 = vpop.xlane.xlu1 %1211 }
 0x488   :  { %3296 = vrcp.f32 %v1212_v51 }
 0x48e   :  { %v3297_v7 = vpop.eup %3296 }
 0x48f   :  { %v1419_v21 = vpop.xlane.xlu1 %1418  ;;  %v1228_v8 = vmul.f32 %v3297_v7, %v4315_v10 }
 0x490   :  { %v1424_v48 = vsub.f32 %v4298_v41, %v1419_v21  ;;  %v1215_v61 = vpop.xlane.xlu0 %1214 }
 0x491   :  { %3298 = vrcp.f32 %v1215_v61  ;;  %3023 = vmatmul.msk.f32.gmra.mxu3 %vm79_vm0, %v1228_v8 }
 0x492   :  { %v1433_v9 = vmul.f32 1.442695, %v1424_v48 }
 0x494   :  { %3300 = vpow2.f32 %v1433_v9 }
 0x497   :  { %v3299_v22 = vpop.eup %3298 }
 0x498   :  { %v1221_v12 = vpop.xlane.xlu1 %1220  ;;  %v1635_v59 = vpop.xlane.xlu0 %1634  ;;  %v1229_v28 = vmul.f32 %v3299_v22, %v4326_v63 }
 0x499   :  { %v1218_v13 = vpop.xlane.xlu2 %1217  ;;  %v1648_v10 = vsub.f32 %v4302_v45, %v1635_v59 }
 0x49a   :  { %3302 = vrcp.f32 %v1218_v13  ;;  %v4411_v41 = vpop.eup %3300  ;;  %3024 = vmatmul.msk.f32.gmra.mxu3 %vm79_vm0, %v1229_v28 }
 0x49b   :  { %v1653_v39 = vmul.f32 1.442695, %v1648_v10  ;;  %v1447_v16 = vsel %vm79_vm0, %v4411_v41, 0.0  ;;  %v4457_v10 = vpop.f32.mrf.mxu3 }
 0x49c   :  { %1448 = vadd.xlane.f32.xlu2 %v1447_v16 }
 0x49d   :  { %3304 = vpow2.f32 %v1653_v39 }
 0x49e   :  { %3306 = vrcp.f32 %v1221_v12  ;;  %v1950_v12 = vpop.f32.mrf.mxu1 }
 0x4a0   :  { %v3303_v20 = vpop.eup %3302  ;;  %v1641_v63 = vpop.xlane.xlu1 %1640 }
 0x4a1   :  { %v1650_v45 = vsub.f32 %v4323_v43, %v1641_v63  ;;  %v1638_v26 = vpop.xlane.xlu2 %1637  ;;  %v1230_v25 = vmul.f32 %v3303_v20, %v4337_v58  ;;  %v1437_v52 = vpop.xlane.xlu0 %1436 }
 0x4a2   :  { %v1649_v27 = vsub.f32 %v4309_v14, %v1638_v26  ;;  %v4432_v14 = vpop.f32.mrf.mxu2 }
 0x4a3   :  { %v1657_v37 = vmul.f32 1.442695, %v1650_v45  ;;  %3025 = vmatmul.msk.f32.gmra.mxu3 %vm79_vm0, %v1230_v25  ;;  %v4426_v56 = vpop.eup %3304  ;;  %v1870_v51 = vsel %vm79_vm0, %v4432_v14, -inf }
 0x4a4   :  { %v1655_v38 = vmul.f32 1.442695, %v1649_v27  ;;  %1868 = vmax.xlane.f32.xlu2 %v1867_v18  ;;  %v1663_v43 = vsel %vm79_vm0, %v4426_v56, 0.0  ;;  %v3307_v58 = vpop.eup %3306 }
 0x4a5   :  { %3308 = vpow2.f32 %v1657_v37  ;;  %1664 = vadd.xlane.f32.xlu1 %v1663_v43  ;;  %v1231_v50 = vmul.f32 %v3307_v58, %v4334_v3 }
 0x4a6   :  { %3310 = vpow2.f32 %v1655_v38 }
 0x4a7   :  { %3312 = vrcp.f32 %v1437_v52 }
 0x4a8   :  { %v1443_v53 = vpop.xlane.xlu1 %1442 }
 0x4a9   :  { %v1440_v60 = vpop.xlane.xlu2 %1439  ;;  %v1644_v46 = vpop.xlane.xlu0 %1643 }
 0x4aa   :  { %v1651_v17 = vsub.f32 %v4341_v29, %v1644_v46  ;;  %v4451_v61 = vpop.f32.mrf.mxu2 }
 0x4ab   :  { %v4435_v0 = vpop.eup %3308  ;;  %3026 = vmatmul.msk.f32.gmra.mxu3 %vm79_vm0, %v1231_v50 }
 0x4ac   :  { %v4441_v30 = vpop.eup %3310  ;;  %v1669_v6 = vsel %vm79_vm0, %v4435_v0, 0.0  ;;  %v1659_v47 = vmul.f32 1.442695, %v1651_v17 }
 0x4ad   :  { %1670 = vadd.xlane.f32.xlu2 %v1669_v6  ;;  %v1666_v3 = vsel %vm79_vm0, %v4441_v30, 0.0  ;;  %v3313_v7 = vpop.eup %3312  ;;  %1871 = vmax.xlane.f32.xlu1 %v1870_v51 }
 0x4ae   :  { %1667 = vadd.xlane.f32.xlu0 %v1666_v3  ;;  %3314 = vpow2.f32 %v1659_v47  ;;  %v1455_v21 = vmul.f32 %v3313_v7, %v4351_v2  ;;  %v1873_v2 = vsel %vm79_vm0, %v4451_v61, -inf }
 0x4af   :  { %3316 = vrcp.f32 %v1440_v60 }
 0x4b0   :  { %v1863_v29 = vpop.xlane.xlu1 %1862 }
 0x4b1   :  { %v1876_v8 = vsub.f32 %v4376_v54, %v1863_v29  ;;  %v1647_v48 = vpop.xlane.xlu2 %1646  ;;  %v1446_v9 = vpop.xlane.xlu0 %1445 }
 0x4b2   :  { %v1652_v22 = vsub.f32 %v4359_v19, %v1647_v48 }
 0x4b3   :  { %v1881_v59 = vmul.f32 1.442695, %v1876_v8  ;;  %3055 = vmatmul.msk.f32.vlgmr.msra.gmra.mxu3 %vm79_vm0, %v1455_v21 }
 0x4b4   :  { %v1661_v13 = vmul.f32 1.442695, %v1652_v22  ;;  %1979 = vmatpush.msra.mxu3 %v1950_v12  ;;  %v4455_v28 = vpop.eup %3314 }
 0x4b5   :  { %3318 = vpow2.f32 %v1881_v59  ;;  %v3317_v54 = vpop.eup %3316  ;;  %v1672_v19 = vsel %vm79_vm0, %v4455_v28, 0.0 }
 0x4b6   :  { %3320 = vpow2.f32 %v1661_v13  ;;  %1980 = vmatpush.msra.mxu3 %v1947_v35  ;;  %1874 = vmax.xlane.f32.xlu0 %v1873_v2  ;;  %v1456_v39 = vmul.f32 %v3317_v54, %v4368_v33 }
 0x4b7   :  { %1673 = vadd.xlane.f32.xlu1 %v1672_v19  ;;  %3322 = vrcp.f32 %v1443_v53 }
 0x4b8   :  { %1981 = vmatpush.msra.mxu3 %v4418_v11 }
 0x4b9   :  { %v1866_v16 = vpop.xlane.xlu0 %1865 }
 0x4ba   :  { %1982 = vmatpush.msra.mxu3 %v4405_v36  ;;  %v1877_v63 = vsub.f32 %v4389_v57, %v1866_v16  ;;  %v4477_v36 = vpop.f32.mrf.mxu3 }
 0x4bb   :  { %v4466_v20 = vpop.eup %3318  ;;  %3056 = vmatmul.msk.f32.gmra.mxu3 %vm79_vm0, %v1456_v39 }
 0x4bc   :  { %v4470_v45 = vpop.eup %3320  ;;  %1983 = vmatpush.msra.mxu3 %v4398_v5  ;;  %v1891_v26 = vsel %vm79_vm0, %v4466_v20, 0.0  ;;  %v1883_v25 = vmul.f32 1.442695, %v1877_v63 }
 0x4bd   :  { %v1675_v33 = vsel %vm79_vm0, %v4470_v45, 0.0  ;;  %v3323_v11 = vpop.eup %3322 }
 0x4be   :  { %1892 = vadd.xlane.f32.xlu0 %v1891_v26  ;;  %1676 = vadd.xlane.f32.xlu2 %v1675_v33  ;;  %3324 = vpow2.f32 %v1883_v25  ;;  %v1457_v57 = vmul.f32 %v3323_v11, %v4365_v32 }
 0x4bf   :  { %3326 = vrcp.f32 %v1446_v9 }
 0x4c2   :  { %v4485_v37 = vpop.f32.mrf.mxu3 }
 0x4c3   :  { %3057 = vmatmul.msk.f32.gmra.mxu3 %vm79_vm0, %v1457_v57 }
 0x4c4   :  { %v4481_v52 = vpop.eup %3324 }
 0x4c5   :  { %v3327_v5 = vpop.eup %3326  ;;  %v1894_v27 = vsel %vm79_vm0, %v4481_v52, 0.0 }
 0x4c6   :  { %1895 = vadd.xlane.f32.xlu1 %v1894_v27  ;;  %v1458_v38 = vmul.f32 %v3327_v5, %v4380_v42 }
 0x4ca   :  { %v4489_v18 = vpop.f32.mrf.mxu3 }
 0x4cb   :  { %3058 = vmatmul.msk.f32.gmra.mxu3 %vm79_vm0, %v1458_v38 }
 0x4d2   :  { %v4491_v43 = vpop.f32.mrf.mxu3 }
 0x4da   :  { %v4493_v32 = vpop.f32.mrf.mxu3 }
 0x4e2   :  { %v4495_v58 = vpop.f32.mrf.mxu3 }
 0x4ea   :  { %v4497_v53 = vpop.f32.mrf.mxu3 }
 0x4f2   :  { %v4499_v35 = vpop.f32.mrf.mxu3 }
 0x4fa   :  { %v4501_v60 = vpop.f32.mrf.mxu3 }
 0x50f   :  { %v1449_v50 = vpop.xlane.xlu2 %1448 }
 0x510   :  { %3328 = vrcp.f32 %v1449_v50 }
 0x514   :  { %v4503_v46 = vpop.f32.mrf.mxu3 }
 0x516   :  { %v3329_v42 = vpop.eup %3328 }
 0x517   :  { %v1869_v17 = vpop.xlane.xlu2 %1868  ;;  %v1459_v6 = vmul.f32 %v3329_v42, %v4411_v41 }
 0x518   :  { %v1665_v47 = vpop.xlane.xlu1 %1664  ;;  %v1878_v51 = vsub.f32 %v4416_v34, %v1869_v17 }
 0x519   :  { %3330 = vrcp.f32 %v1665_v47  ;;  %3059 = vmatmul.msk.f32.gmra.mxu3 %vm79_vm0, %v1459_v6 }
 0x51a   :  { %v1885_v3 = vmul.f32 1.442695, %v1878_v51 }
 0x51c   :  { %3332 = vpow2.f32 %v1885_v3 }
 0x51d   :  { %v1307_v7 = vpop.f32.mrf.mxu3 }
 0x51f   :  { %v3331_v29 = vpop.eup %3330 }
 0x520   :  { %v1683_v21 = vmul.f32 %v3331_v29, %v4426_v56  ;;  %v1872_v8 = vpop.xlane.xlu1 %1871  ;;  %v1671_v12 = vpop.xlane.xlu2 %1670 }
 0x521   :  { %v1668_v48 = vpop.xlane.xlu0 %1667  ;;  %v1879_v9 = vsub.f32 %v4432_v14, %v1872_v8 }
 0x522   :  { %3334 = vrcp.f32 %v1668_v48  ;;  %v4510_v22 = vpop.eup %3332  ;;  %3088 = vmatmul.msk.f32.vlgmr.msrb.gmra.mxu3 %vm79_vm0, %v1683_v21 }
 0x523   :  { %v1887_v41 = vmul.f32 1.442695, %v1879_v9  ;;  %v1897_v34 = vsel %vm79_vm0, %v4510_v22, 0.0 }
 0x524   :  { %1898 = vadd.xlane.f32.xlu2 %v1897_v34 }
 0x525   :  { %3336 = vpow2.f32 %v1887_v41 }
 0x526   :  { %v4515_v59 = vpop.f32.mrf.mxu3  ;;  %3338 = vrcp.f32 %v1671_v12 }
 0x528   :  { %v3335_v13 = vpop.eup %3334 }
 0x529   :  { %v1875_v56 = vpop.xlane.xlu0 %1874  ;;  %v1684_v2 = vmul.f32 %v3335_v13, %v4441_v30 }
 0x52a   :  { %v1880_v14 = vsub.f32 %v4451_v61, %v1875_v56  ;;  %v1674_v39 = vpop.xlane.xlu1 %1673 }
 0x52b   :  { %3089 = vmatmul.msk.f32.gmra.mxu3 %vm79_vm0, %v1684_v2  ;;  %v4520_v54 = vpop.eup %3336 }
 0x52c   :  { %v1889_v19 = vmul.f32 1.442695, %v1880_v14  ;;  %v1900_v16 = vsel %vm79_vm0, %v4520_v54, 0.0  ;;  %v3339_v63 = vpop.eup %3338 }
 0x52d   :  { %1901 = vadd.xlane.f32.xlu0 %v1900_v16  ;;  %v1685_v25 = vmul.f32 %v3339_v63, %v4435_v0  ;;  %v629_v0 = vadd.f32 %v4400_v1, %v4138_v55 }
 0x52e   :  { %3340 = vpow2.f32 %v1889_v19  ;;  %v1313_v26 = vpop.f32.mrf.mxu3 }
 0x52f   :  { %3342 = vrcp.f32 %v1674_v39  ;;  %v862_v42 = vadd.f32 %v4477_v36, %v629_v0  ;;  %v635_v36 = vadd.f32 %v4423_v4, %v4153_v24 }
 0x531   :  { %v1677_v61 = vpop.xlane.xlu2 %1676  ;;  %v1893_v27 = vpop.xlane.xlu0 %1892  ;;  %v1090_v6 = vadd.f32 %v4495_v58, %v862_v42  ;;  %v864_v58 = vadd.f32 %v4489_v18, %v635_v36  ;;  %v626_v18 = vadd.f32 %v4396_v40, %v4132_v49 }
 0x532   :  { %3344 = vrcp.f32 %v1677_v61 }
 0x533   :  { %3090 = vmatmul.msk.f32.gmra.mxu3 %vm79_vm0, %v1685_v25  ;;  %3346 = vrcp.f32 %v1893_v27  ;;  %v1318_v47 = vadd.f32 %v1307_v7, %v1090_v6  ;;  %v1092_v8 = vadd.f32 %v4499_v35, %v864_v58  ;;  %v2044_v6 = vld [vmem:[%s4950_s13 + $0x10] sm:$0xff] }
 0x534   :  { %v4526_v30 = vpop.eup %3340 }
 0x535   :  { %v1903_v33 = vsel %vm79_vm0, %v4526_v30, 0.0  ;;  %v3343_v11 = vpop.eup %3342  ;;  %v1320_v48 = vadd.f32 %v1313_v26, %v1092_v8 }
 0x536   :  { %v1529_v57 = vpop.f32.mrf.mxu3  ;;  %1904 = vadd.xlane.f32.xlu1 %v1903_v33  ;;  %v1686_v5 = vmul.f32 %v3343_v11, %v4455_v28 }
 0x538   :  { %v3345_v38 = vpop.eup %3344 }
 0x539   :  { %v1687_v17 = vmul.f32 %v3345_v38, %v4470_v45  ;;  %v1896_v51 = vpop.xlane.xlu1 %1895  ;;  %v3347_v28 = vpop.eup %3346 }
 0x53a   :  { %3348 = vrcp.f32 %v1896_v51  ;;  %v1911_v21 = vmul.f32 %v3347_v28, %v4466_v20  ;;  %v623_v20 = vadd.f32 %v4394_v15, %v4122_v44  ;;  %v861_v15 = vadd.f32 %v4457_v10, %v626_v18 }
 0x53b   :  { %3091 = vmatmul.msk.f32.gmra.mxu3 %vm79_vm0, %v1686_v5 }
 0x53e   :  { %v1532_v50 = vpop.f32.mrf.mxu3 }
 0x540   :  { %v3349_v55 = vpop.eup %3348 }
 0x541   :  { %v1912_v1 = vmul.f32 %v3349_v55, %v4481_v52  ;;  %v860_v52 = vadd.f32 %v4437_v23, %v623_v20  ;;  %v1089_v23 = vadd.f32 %v4493_v32, %v861_v15  ;;  %v2083_v20 = vld [vmem:[%s4952_s14] sm:$0xff] }
 0x543   :  { %3092 = vmatmul.msk.f32.gmra.mxu3 %vm79_vm0, %v1687_v17  ;;  %v1088_v13 = vadd.f32 %v4491_v43, %v860_v52  ;;  %v1317_v14 = vadd.f32 %v4503_v46, %v1089_v23  ;;  %v2043_v17 = vld [vmem:[%s4950_s13 + $0x8] sm:$0xff] }
 0x544   :  { %v2084_v52 = vld [vmem:[%s4952_s14 + $0x8] sm:$0xff] }
 0x545   :  { %v1316_v4 = vadd.f32 %v4501_v60, %v1088_v13  ;;  %v1545_v60 = vadd.f32 %v1532_v50, %v1317_v14 }
 0x546   :  { %v1535_v3 = vpop.f32.mrf.mxu3 }
 0x547   :  { %v1546_v29 = vadd.f32 %v1535_v3, %v1318_v47  ;;  %v1544_v35 = vadd.f32 %v1529_v57, %v1316_v4  ;;  %v2038_v3 = vld [vmem:[%s4951_s2] sm:$0xff] }
 0x54b   :  { %3121 = vmatmul.msk.f32.vlgmr.msra.gmra.mxu3 %vm79_vm0, %v1911_v21 }
 0x54e   :  { %v1538_v45 = vpop.f32.mrf.mxu3 }
 0x553   :  { %3122 = vmatmul.msk.f32.gmra.mxu3 %vm79_vm0, %v1912_v1  ;;  %v2039_v1 = vld [vmem:[%s4951_s2 + $0x8] sm:$0xff] }
 0x597   :  { %v1899_v7 = vpop.xlane.xlu2 %1898 }
 0x598   :  { %3350 = vrcp.f32 %v1899_v7 }
 0x59c   :  { %v1541_v9 = vpop.f32.mrf.mxu3 }
 0x59d   :  { %v1548_v41 = vadd.f32 %v1541_v9, %v1320_v48 }
 0x59e   :  { %v3351_v34 = vpop.eup %3350 }
 0x59f   :  { %v1913_v12 = vmul.f32 %v3351_v34, %v4510_v22 }
 0x5a0   :  { %v1902_v24 = vpop.xlane.xlu0 %1901 }
 0x5a1   :  { %3352 = vrcp.f32 %v1902_v24  ;;  %3123 = vmatmul.msk.f32.gmra.mxu3 %vm79_vm0, %v1913_v12  ;;  %v2085_v12 = vld [vmem:[%s4952_s14 + $0x10] sm:$0xff] }
 0x5a5   :  { %v1757_v44 = vpop.f32.mrf.mxu3 }
 0x5a6   :  { %v1772_v56 = vadd.f32 %v1757_v44, %v1544_v35 }
 0x5a7   :  { %v3353_v2 = vpop.eup %3352 }
 0x5a8   :  { %v1914_v43 = vmul.f32 %v3353_v2, %v4520_v54  ;;  %v632_v54 = vadd.f32 %v4407_v31, %v4144_v62 }
 0x5a9   :  { %v1905_v22 = vpop.xlane.xlu1 %1904 }
 0x5aa   :  { %3354 = vrcp.f32 %v1905_v22  ;;  %3124 = vmatmul.msk.f32.gmra.mxu3 %vm79_vm0, %v1914_v43  ;;  %v863_v61 = vadd.f32 %v4485_v37, %v632_v54  ;;  %v2005_v37 = vld [vmem:[%s4948_s12] sm:$0xff] }
 0x5ac   :  { %v1091_v33 = vadd.f32 %v4497_v53, %v863_v61  ;;  %v2006_v53 = vld [vmem:[%s4948_s12 + $0x8] sm:$0xff] }
 0x5ae   :  { %v1760_v19 = vpop.f32.mrf.mxu3  ;;  %v1319_v11 = vadd.f32 %v4515_v59, %v1091_v33  ;;  %v2042_v59 = vld [vmem:[%s4950_s13] sm:$0xff] }
 0x5af   :  { %v1773_v39 = vadd.f32 %v1760_v19, %v1545_v60 }
 0x5b0   :  { %v3355_v49 = vpop.eup %3354  ;;  %v1547_v57 = vadd.f32 %v1538_v45, %v1319_v11  ;;  %v4599_v45 = vld [vmem:[%s4949_s7] ss:$0 sm:$0xff] }
 0x5b1   :  { %v1915_v40 = vmul.f32 %v3355_v49, %v4526_v30 }
 0x5b3   :  { %3125 = vmatmul.msk.f32.gmra.mxu3 %vm79_vm0, %v1915_v40 }
 0x5b6   :  { %v1763_v10 = vpop.f32.mrf.mxu3 }
 0x5b7   :  { %v1774_v50 = vadd.f32 %v1763_v10, %v1546_v29 }
 0x5be   :  { %v1766_v16 = vpop.f32.mrf.mxu3 }
 0x5bf   :  { %v1775_v27 = vadd.f32 %v1766_v16, %v1547_v57 }
 0x5c6   :  { %v1769_v63 = vpop.f32.mrf.mxu3 }
 0x5c7   :  { %v1776_v30 = vadd.f32 %v1769_v63, %v1548_v41  ;;  %v2128_v63 = vld [vmem:[%s4953_s0] sm:$0xff] }
 0x5ce   :  { %v1985_v32 = vpop.f32.mrf.mxu3 }
 0x5cf   :  { %v2000_v31 = vadd.f32 %v1985_v32, %v1772_v56 }
 0x5d6   :  { %v1988_v26 = vpop.f32.mrf.mxu3 }
 0x5d7   :  { %v2001_v62 = vadd.f32 %v1988_v26, %v1773_v39 }
 0x624   :  { %v1991_v25 = vpop.f32.mrf.mxu3 }
 0x625   :  { %v2002_v42 = vadd.f32 %v1991_v25, %v1774_v50  ;;  %v2129_v50 = vld [vmem:[%s4953_s0 + $0x8] sm:$0xff] }
 0x62d   :  { %v1994_v46 = vpop.f32.mrf.mxu3 }
 0x62e   :  { %v2003_v0 = vadd.f32 %v1994_v46, %v1775_v27 }
 0x636   :  { %v1997_v5 = vpop.f32.mrf.mxu3 }
 0x637   :  { %v2004_v38 = vadd.f32 %v1997_v5, %v1776_v30 }
 0x639   :  { %2024 = vmatpush.msrb.mxu0 %v2004_v38  ;;  %2065 = vmatpush.msra.mxu2 %v2004_v38 }
 0x63b   :  { %2025 = vmatpush.msrb.mxu0 %v2003_v0  ;;  %2066 = vmatpush.msra.mxu2 %v2003_v0 }
 0x63d   :  { %2026 = vmatpush.msrb.mxu0 %v2002_v42  ;;  %2067 = vmatpush.msra.mxu2 %v2002_v42 }
 0x63f   :  { %2027 = vmatpush.msrb.mxu0 %v2001_v62  ;;  %2068 = vmatpush.msra.mxu2 %v2001_v62 }
 0x641   :  { %2028 = vmatpush.msrb.mxu0 %v2000_v31  ;;  %2069 = vmatpush.msra.mxu2 %v2000_v31 }
 0x642   :  { %3126 = vmatmul.msk.f32.vlgmr.msrb.gmra.mxu0 %vm79_vm0, %v2005_v37  ;;  %3128 = vmatmul.msk.f32.vlgmr.msra.gmra.mxu2 %vm79_vm0, %v2042_v59 }
 0x64a   :  { %3127 = vmatmul.msk.f32.gmra.mxu0 %vm79_vm0, %v2006_v53  ;;  %3129 = vmatmul.msk.f32.gmra.mxu2 %vm79_vm0, %v2043_v17 }
 0x652   :  { %3130 = vmatmul.msk.f32.gmra.mxu2 %vm79_vm0, %v2044_v6 }
 0x6bf   :  { %v2030_v47 = vpop.f32.mrf.mxu0 }
 0x6c0   :  { %v2036_v51 = vmax.f32 %v2030_v47, 0.0 }
 0x6c2   :  { %v2246_v28 = vmul.f32 %v2036_v51, %v2036_v51  ;;  %v4591_v21 = vadd.f32 %v2038_v3, %v2036_v51 }
 0x6c4   :  { %v2248_v29 = vsel %vm181_vm1, %v2246_v28, 0.0  ;;  %v2286_v8 = vmul.f32 %v4599_v45, %v4591_v21  ;;  %v2130_v28 = vld [vmem:[%s4953_s0 + $0x10] sm:$0xff] }
 0x6c5   :  { %2249 = vadd.xlane.f32.xlu0 %v2248_v29  ;;  %v2071_v56 = vpop.f32.mrf.mxu2 }
 0x6c6   :  { %v2297_v34 = vsel %vm181_vm1, %v2286_v8, 0.0  ;;  %v2080_v60 = vmax.f32 %v2071_v56, 0.0  ;;  %v2137_v8 = vld [vmem:[%s4954_s15 + $0x18] sm:$0xff] }
 0x6c7   :  { %v2033_v55 = vpop.f32.mrf.mxu0 }
 0x6c8   :  { %v4601_v36 = vmax.f32 %v2033_v55, 0.0 }
 0x6ca   :  { %v4604_v58 = vadd.f32 %v2039_v1, %v4601_v36  ;;  %v2247_v7 = vmul.f32 %v4601_v36, %v4601_v36 }
 0x6cc   :  { %2110 = vmatpush.msra.mxu0 %v4604_v58  ;;  %v2251_v48 = vsel %vm181_vm1, %v2247_v7, 0.0  ;;  %2165 = vmatpush.msrb.mxu2 %v4604_v58  ;;  %v2287_v9 = vmul.f32 %v4599_v45, %v4604_v58  ;;  %v2136_v7 = vld [vmem:[%s4954_s15 + $0x10] sm:$0xff] }
 0x6cd   :  { %2252 = vadd.xlane.f32.xlu2 %v2251_v48  ;;  %2499 = vmatpush.msrb.mxu3 %v4604_v58  ;;  %v2074_v32 = vpop.f32.mrf.mxu2  ;;  %v2138_v48 = vld [vmem:[%s4954_s15 + $0x20] sm:$0xff] }
 0x6ce   :  { %2111 = vmatpush.msra.mxu0 %v4591_v21  ;;  %2166 = vmatpush.msrb.mxu2 %v4591_v21  ;;  %v2300_v41 = vsel %vm181_vm1, %v2287_v9, 0.0  ;;  %v2081_v11 = vmax.f32 %v2074_v32, 0.0  ;;  %v4694_v9 = vstv %s4955_s17 }
 0x6cf   :  { %3131 = vmatmul.msk.f32.vlgmr.msra.gmra.mxu0 %vm2086_vm2, %v2083_v20  ;;  %2500 = vmatpush.msrb.mxu3 %v4591_v21 }
 0x6d0   :  { %2298 = vadd.xlane.f32.xlu0 %v2297_v34  ;;  %2301 = vadd.xlane.f32.xlu1 %v2300_v41 }
 0x6d5   :  { %v2077_v62 = vpop.f32.mrf.mxu2 }
 0x6d6   :  { %v2082_v59 = vmax.f32 %v2077_v62, 0.0 }
 0x6d7   :  { %3132 = vmatmul.msk.f32.gmra.mxu0 %vm2086_vm2, %v2084_v52 }
 0x6df   :  { %3133 = vmatmul.msk.f32.gmra.mxu0 %vm2086_vm2, %v2085_v12 }
 0x738   :  { %v2250_v13 = vpop.xlane.xlu0 %2249 }
 0x739   :  { %v2254_v24 = vmax.f32 %v2250_v13, 1e-24  ;;  %v2189_v13 = vld [vmem:[%s4956_s5 + $0x18] sm:$0xff] }
 0x73a   :  { %2221 = vmatpush.msrb.mxu1 %v2189_v13 }
 0x73b   :  { %3356 = vrsqrt.f32 %v2254_v24  ;;  %vm2262_vm4 = vweird.f32 %v2254_v24 }
 0x740   :  { %v2253_v4 = vpop.xlane.xlu2 %2252 }
 0x741   :  { %v3357_v18 = vpop.eup %3356  ;;  %v2255_v35 = vmax.f32 %v2253_v4, 1e-24  ;;  %v2188_v4 = vld [vmem:[%s4956_s5 + $0x10] sm:$0xff] }
 0x742   :  { %v2257_v44 = vmul.f32 %v3357_v18, %v2254_v24  ;;  %vm2263_vm3 = vweird.f32 %v3357_v18  ;;  %2222 = vmatpush.msrb.mxu1 %v2188_v4 }
 0x743   :  { %3358 = vrsqrt.f32 %v2255_v35  ;;  %vm2264_vm5 = vmor %vm2262_vm4, %vm2263_vm3  ;;  %vm2272_vm7 = vweird.f32 %v2255_v35  ;;  %v2302_v20 = vpop.xlane.xlu1 %2301  ;;  %v2299_v41 = vpop.xlane.xlu0 %2298 }
 0x744   :  { %v2258_v15 = vmul.f32 %v3357_v18, %v2257_v44  ;;  %v2307_v52 = vadd.f32 %v4694_v9, %v2299_v41  ;;  %v2187_v44 = vld [vmem:[%s4956_s5 + $0x8] sm:$0xff] }
 0x745   :  { %2223 = vmatpush.msrb.mxu1 %v2187_v44 }
 0x746   :  { %v2259_v2 = vmul.f32 0.5, %v2258_v15  ;;  %v2186_v15 = vld [vmem:[%s4956_s5] sm:$0xff] }
 0x747   :  { %2224 = vmatpush.msrb.mxu1 %v2186_v15 }
 0x748   :  { %v2260_v23 = vsub.f32 1.5, %v2259_v2 }
 0x749   :  { %v3359_v22 = vpop.eup %3358 }
 0x74a   :  { %v2267_v43 = vmul.f32 %v3359_v22, %v2255_v35  ;;  %v2261_v14 = vmul.f32 %v3357_v18, %v2260_v23  ;;  %vm2273_vm6 = vweird.f32 %v3359_v22 }
 0x74b   :  { %vm2274_vm8 = vmor %vm2272_vm7, %vm2273_vm6 }
 0x74c   :  { %v2268_v19 = vmul.f32 %v3359_v22, %v2267_v43  ;;  %v2113_v39 = vpop.f32.mrf.mxu0  ;;  %v2265_v49 = vsel %vm2264_vm5, %v3357_v18, %v2261_v14 }
 0x74d   :  { %v2122_v40 = vmax.f32 %v2113_v39, 0.0  ;;  %v4630_v10 = vmul.f32 %v2265_v49, %v2036_v51 }
 0x74e   :  { %v2269_v16 = vmul.f32 0.5, %v2268_v19 }
 0x74f   :  { %v2125_v26 = vadd.f32 %v2122_v40, %v2080_v60  ;;  %v2309_v25 = vmul.f32 %v4599_v45, %v4630_v10 }
 0x750   :  { %v2270_v54 = vsub.f32 1.5, %v2269_v16 }
 0x751   :  { %v4637_v46 = vadd.f32 %v2128_v63, %v2125_v26  ;;  %v2311_v61 = vsel %vm181_vm1, %v2309_v25, 0.0 }
 0x752   :  { %2312 = vadd.xlane.f32.xlu1 %v2311_v61  ;;  %v2271_v33 = vmul.f32 %v3359_v22, %v2270_v54 }
 0x753   :  { %v2283_v38 = vmul.f32 %v4599_v45, %v4637_v46 }
 0x754   :  { %v2116_v57 = vpop.f32.mrf.mxu0  ;;  %v2275_v30 = vsel %vm2274_vm8, %v3359_v22, %v2271_v33  ;;  %v2308_v22 = vadd.f32 %v4694_v9, %v2302_v20 }
 0x755   :  { %v2123_v5 = vmax.f32 %v2116_v57, 0.0  ;;  %v4641_v27 = vmul.f32 %v2275_v30, %v4601_v36  ;;  %v2288_v53 = vsel %vm181_vm1, %v2283_v38, 0.0  ;;  %v2134_v36 = vld [vmem:[%s4954_s15] sm:$0xff] }
 0x757   :  { %v2126_v0 = vadd.f32 %v2123_v5, %v2081_v11  ;;  %v2310_v42 = vmul.f32 %v4599_v45, %v4641_v27 }
 0x759   :  { %v4650_v31 = vadd.f32 %v2129_v50, %v2126_v0  ;;  %v2314_v37 = vsel %vm181_vm1, %v2310_v42, 0.0 }
 0x75a   :  { %2315 = vadd.xlane.f32.xlu2 %v2314_v37  ;;  %2289 = vadd.xlane.f32.xlu1 %v2288_v53 }
 0x75b   :  { %v2284_v17 = vmul.f32 %v4599_v45, %v4650_v31 }
 0x75c   :  { %v2119_v6 = vpop.f32.mrf.mxu0 }
 0x75d   :  { %v2124_v47 = vmax.f32 %v2119_v6, 0.0  ;;  %v2291_v51 = vsel %vm181_vm1, %v2284_v17, 0.0 }
 0x75e   :  { %2292 = vadd.xlane.f32.xlu0 %v2291_v51 }
 0x75f   :  { %v2127_v3 = vadd.f32 %v2124_v47, %v2082_v59 }
 0x761   :  { %v4660_v29 = vadd.f32 %v2130_v28, %v2127_v3 }
 0x763   :  { %2167 = vmatpush.msrb.mxu2 %v4660_v29  ;;  %2501 = vmatpush.msrb.mxu3 %v4660_v29  ;;  %v2285_v55 = vmul.f32 %v4599_v45, %v4660_v29  ;;  %v2135_v45 = vld [vmem:[%s4954_s15 + $0x8] sm:$0xff] }
 0x765   :  { %2168 = vmatpush.msrb.mxu2 %v4650_v31  ;;  %2502 = vmatpush.msrb.mxu3 %v4650_v31  ;;  %v2294_v1 = vsel %vm181_vm1, %v2285_v55, 0.0 }
 0x766   :  { %2295 = vadd.xlane.f32.xlu2 %v2294_v1 }
 0x767   :  { %2169 = vmatpush.msrb.mxu2 %v4637_v46  ;;  %2503 = vmatpush.msrb.mxu3 %v4637_v46 }
 0x768   :  { %3134 = vmatmul.msk.f32.vlgmr.msrb.gmra.mxu2 %vm79_vm0, %v2134_v36 }
 0x770   :  { %3135 = vmatmul.msk.f32.gmra.mxu2 %vm79_vm0, %v2135_v45 }
 0x778   :  { %3136 = vmatmul.msk.f32.gmra.mxu2 %vm79_vm0, %v2136_v7 }
 0x780   :  { %3137 = vmatmul.msk.f32.gmra.mxu2 %vm79_vm0, %v2137_v8 }
 0x788   :  { %3138 = vmatmul.msk.f32.gmra.mxu2 %vm79_vm0, %v2138_v48  ;;  %v4741_v48 = vld [vmem:[%s4958_s16] sm:$0xff] }
 0x789   :  { %3144 = vmatmul.msk.f32.vlgmr.msrb.gmra.mxu3 %vm79_vm0, %v4741_v48 }
 0x7c5   :  { %v2313_v34 = vpop.xlane.xlu1 %2312 }
 0x7c6   :  { %v2317_v12 = vadd.f32 %v2313_v34, %v4694_v9  ;;  %v4749_v34 = vld [vmem:[%s4958_s16 + $0x8] sm:$0xff] }
 0x7c7   :  { %3145 = vmatmul.msk.f32.gmra.mxu3 %vm79_vm0, %v4749_v34 }
 0x7c8   :  { %v2319_v24 = vmax.f32 %v2307_v52, %v2317_v12 }
 0x7ca   :  { %v2324_v18 = vsub.f32 %v2307_v52, %v2319_v24  ;;  %v2336_v35 = vsub.f32 %v2317_v12, %v2319_v24 }
 0x7cc   :  { %v2332_v56 = vmul.f32 1.442695, %v2324_v18  ;;  %v2338_v2 = vmul.f32 1.442695, %v2336_v35  ;;  %v3194_v18 = vld [vmem:[%s4957_s6] ss:$0 sm:$0xff] }
 0x7cd   :  { %v2316_v23 = vpop.xlane.xlu2 %2315  ;;  %v2290_v13 = vpop.xlane.xlu1 %2289 }
 0x7ce   :  { %3360 = vpow2.f32 %v2332_v56  ;;  %v2318_v43 = vadd.f32 %v2316_v23, %v4694_v9  ;;  %v2304_v24 = vadd.f32 %v4694_v9, %v2290_v13  ;;  %v3148_v13 = vld [vmem:[%s4960_s8 + $0x68] sm:$0xff] }
 0x7cf   :  { %3362 = vpow2.f32 %v2338_v2 }
 0x7d0   :  { %v2320_v14 = vmax.f32 %v2308_v22, %v2318_v43  ;;  %v2321_v44 = vsub.f32 %v2304_v24, %v2304_v24  ;;  %v3147_v24 = vld [vmem:[%s4960_s8 + $0x60] sm:$0xff] }
 0x7d1   :  { %v2293_v8 = vpop.xlane.xlu0 %2292 }
 0x7d2   :  { %v2325_v60 = vsub.f32 %v2308_v22, %v2320_v14  ;;  %v2337_v19 = vsub.f32 %v2318_v43, %v2320_v14  ;;  %v2305_v20 = vadd.f32 %v4694_v9, %v2293_v8  ;;  %v2326_v23 = vmul.f32 1.442695, %v2321_v44  ;;  %v3150_v8 = vld [vmem:[%s4960_s8 + $0x78] sm:$0xff] }
 0x7d4   :  { %v3361_v39 = vpop.eup %3360  ;;  %v2334_v49 = vmul.f32 1.442695, %v2325_v60  ;;  %v2340_v40 = vmul.f32 1.442695, %v2337_v19  ;;  %v2322_v41 = vsub.f32 %v2305_v20, %v2305_v20  ;;  %v3153_v20 = vld [vmem:[%s4960_s8 + $0xc8] sm:$0xff] }
 0x7d5   :  { %v3363_v16 = vpop.eup %3362  ;;  %v2355_v26 = vmul.f32 %v3361_v39, %v4591_v21 }
 0x7d6   :  { %v2345_v63 = vadd.f32 %v3363_v16, %v3361_v39  ;;  %3364 = vpow2.f32 %v2334_v49  ;;  %v2357_v25 = vmul.f32 %v3363_v16, %v4630_v10  ;;  %v2328_v52 = vmul.f32 1.442695, %v2322_v41 }
 0x7d7   :  { %3366 = vpow2.f32 %v2340_v40 }
 0x7d8   :  { %3368 = vrcp.f32 %v2345_v63  ;;  %v2362_v57 = vadd.f32 %v2357_v25, %v2355_v26 }
 0x7d9   :  { %v2296_v32 = vpop.xlane.xlu2 %2295 }
 0x7da   :  { %v2306_v54 = vadd.f32 %v4694_v9, %v2296_v32 }
 0x7dc   :  { %v3365_v61 = vpop.eup %3364  ;;  %v2323_v33 = vsub.f32 %v2306_v54, %v2306_v54 }
 0x7dd   :  { %v3367_v11 = vpop.eup %3366  ;;  %v2356_v21 = vmul.f32 %v3365_v61, %v4604_v58 }
 0x7de   :  { %v3369_v30 = vpop.eup %3368  ;;  %v2346_v5 = vadd.f32 %v3367_v11, %v3365_v61  ;;  %v2330_v38 = vmul.f32 1.442695, %v2323_v33  ;;  %v2358_v10 = vmul.f32 %v3367_v11, %v4641_v27 }
 0x7df   :  { %v4715_v50 = vmul.f32 %v3369_v30, %v2362_v57 }
 0x7e0   :  { %3370 = vrcp.f32 %v2346_v5  ;;  %v2363_v62 = vadd.f32 %v2358_v10, %v2356_v21 }
 0x7e1   :  { %3372 = vpow2.f32 %v2330_v38  ;;  %v2392_v0 = vmul.f32 %v4715_v50, %v4715_v50 }
 0x7e3   :  { %v2403_v42 = vsel %vm181_vm1, %v2392_v0, 0.0 }
 0x7e4   :  { %2404 = vadd.xlane.f32.xlu2 %v2403_v42 }
 0x7e6   :  { %v3371_v37 = vpop.eup %3370 }
 0x7e7   :  { %v3373_v53 = vpop.eup %3372  ;;  %v4722_v59 = vmul.f32 %v3371_v37, %v2363_v62 }
 0x7e8   :  { %v2344_v17 = vadd.f32 %v3373_v53, %v3373_v53  ;;  %v2354_v58 = vmul.f32 %v3373_v53, %v4660_v29 }
 0x7e9   :  { %v2393_v6 = vmul.f32 %v4722_v59, %v4722_v59 }
 0x7ea   :  { %3374 = vrcp.f32 %v2344_v17  ;;  %v2361_v27 = vadd.f32 %v2354_v58, %v2354_v58 }
 0x7eb   :  { %v2406_v47 = vsel %vm181_vm1, %v2393_v6, 0.0  ;;  %v2171_v51 = vpop.f32.mrf.mxu2  ;;  %3376 = vpow2.f32 %v2328_v52  ;;  %v3149_v52 = vld [vmem:[%s4960_s8 + $0x70] sm:$0xff] }
 0x7ec   :  { %2407 = vadd.xlane.f32.xlu0 %v2406_v47  ;;  %3139 = vmatmul.msk.f32.vlgmr.msrb.gmra.mxu1 %vm181_vm1, %v2171_v51 }
 0x7f0   :  { %v3375_v28 = vpop.eup %3374 }
 0x7f1   :  { %v4729_v3 = vmul.f32 %v3375_v28, %v2361_v27  ;;  %v3377_v4 = vpop.eup %3376  ;;  %v2515_v27 = vld [vmem:[%s4960_s8 + $0x18] sm:$0xff]  ;;  %v2514_v28 = vld [vmem:[%s4960_s8 + $0x10] sm:$0xff] }
 0x7f2   :  { %v2343_v56 = vadd.f32 %v3377_v4, %v3377_v4  ;;  %v2353_v60 = vmul.f32 %v3377_v4, %v4650_v31  ;;  %2531 = vmatpush.msrb.mxu0 %v2515_v27 }
 0x7f3   :  { %v2174_v55 = vpop.f32.mrf.mxu2  ;;  %v2391_v1 = vmul.f32 %v4729_v3, %v4729_v3 }
 0x7f4   :  { %3140 = vmatmul.msk.f32.gmra.mxu1 %vm181_vm1, %v2174_v55  ;;  %3378 = vrcp.f32 %v2343_v56  ;;  %v2360_v40 = vadd.f32 %v2353_v60, %v2353_v60  ;;  %2532 = vmatpush.msrb.mxu0 %v2514_v28  ;;  %v2513_v55 = vld [vmem:[%s4960_s8 + $0x8] sm:$0xff] }
 0x7f5   :  { %v2400_v36 = vsel %vm181_vm1, %v2391_v1, 0.0  ;;  %3380 = vpow2.f32 %v2326_v23  ;;  %v3155_v1 = vld [vmem:[%s4960_s8 + $0xd8] sm:$0xff] }
 0x7f6   :  { %2401 = vadd.xlane.f32.xlu1 %v2400_v36  ;;  %2533 = vmatpush.msrb.mxu0 %v2513_v55 }
 0x7f7   :  { %2592 = vmatpush.msra.mxu3 %v3155_v1 }
 0x7fa   :  { %v3379_v39 = vpop.eup %3378 }
 0x7fb   :  { %v2177_v45 = vpop.f32.mrf.mxu2  ;;  %v3381_v16 = vpop.eup %3380  ;;  %v4768_v32 = vmul.f32 %v3379_v39, %v2360_v40 }
 0x7fc   :  { %3141 = vmatmul.msk.f32.gmra.mxu1 %vm181_vm1, %v2177_v45  ;;  %v2342_v54 = vadd.f32 %v3381_v16, %v3381_v16  ;;  %v2352_v21 = vmul.f32 %v3381_v16, %v4637_v46 }
 0x7fd   :  { %v2390_v31 = vmul.f32 %v4768_v32, %v4768_v32 }
 0x7fe   :  { %3382 = vrcp.f32 %v2342_v54  ;;  %v2359_v53 = vadd.f32 %v2352_v21, %v2352_v21 }
 0x7ff   :  { %v2397_v30 = vsel %vm181_vm1, %v2390_v31, 0.0 }
 0x803   :  { %v2180_v29 = vpop.f32.mrf.mxu2 }
 0x804   :  { %3142 = vmatmul.msk.f32.gmra.mxu1 %vm181_vm1, %v2180_v29  ;;  %v3383_v62 = vpop.eup %3382  ;;  %v2512_v29 = vld [vmem:[%s4960_s8] sm:$0xff] }
 0x805   :  { %v4789_v47 = vmul.f32 %v3383_v62, %v2359_v53  ;;  %2534 = vmatpush.msrb.mxu0 %v2512_v29 }
 0x807   :  { %v2389_v46 = vmul.f32 %v4789_v47, %v4789_v47  ;;  %2563 = vmatpush.msra.mxu0 %v3150_v8 }
 0x809   :  { %v2394_v51 = vsel %vm181_vm1, %v2389_v46, 0.0  ;;  %2564 = vmatpush.msra.mxu0 %v3149_v52 }
 0x80b   :  { %v2183_v7 = vpop.f32.mrf.mxu2  ;;  %2565 = vmatpush.msra.mxu0 %v3148_v13 }
 0x80c   :  { %3143 = vmatmul.msk.f32.gmra.mxu1 %vm181_vm1, %v2183_v7  ;;  %v2505_v58 = vpop.f32.mrf.mxu3  ;;  %v3154_v7 = vld [vmem:[%s4960_s8 + $0xd0] sm:$0xff] }
 0x80d   :  { %2593 = vmatpush.msra.mxu3 %v3154_v7  ;;  %2566 = vmatpush.msra.mxu0 %v3147_v24 }
 0x80f   :  { %2594 = vmatpush.msra.mxu3 %v3153_v20 }
 0x84a   :  { %v2508_v36 = vpop.f32.mrf.mxu3 }
 0x84b   :  { %v2511_v45 = vmul.f32 %v2508_v36, %v2505_v58 }
 0x84d   :  { %3146 = vmatmul.msk.f32.vlgmr.msrb.gmra.mxu0 %vm181_vm1, %v2511_v45 }
 0x855   :  { %3151 = vmatmul.msk.f32.vlgmr.msra.gmra.mxu0 %vm181_vm1, %v2508_v36 }
 0x857   :  { %v2405_v4 = vpop.xlane.xlu2 %2404 }
 0x85f   :  { %v2408_v41 = vpop.xlane.xlu0 %2407 }
 0x869   :  { %v2226_v12 = vpop.f32.mrf.mxu1 }
 0x86a   :  { %v2227_v61 = vadd.f32 %v3194_v18, %v2226_v12  ;;  %v3152_v12 = vld [vmem:[%s4960_s8 + $0xc0] sm:$0xff] }
 0x86b   :  { %2595 = vmatpush.msra.mxu3 %v3152_v12 }
 0x86c   :  { %v4776_v57 = vmax.f32 %v2227_v61, 0.0  ;;  %3156 = vmatmul.msk.f32.vlgmr.msra.gmra.mxu3 %vm181_vm1, %v2505_v58 }
 0x86e   :  { %v2369_v42 = vmul.f32 %v4776_v57, %v4776_v57 }
 0x870   :  { %v2374_v17 = vsel %vm181_vm1, %v2369_v42, 0.0 }
 0x871   :  { %v2229_v35 = vpop.f32.mrf.mxu1 }
 0x872   :  { %v2230_v15 = vadd.f32 %v3194_v18, %v2229_v35 }
 0x874   :  { %v4757_v2 = vmax.f32 %v2230_v15, 0.0 }
 0x876   :  { %v2370_v22 = vmul.f32 %v4757_v2, %v4757_v2 }
 0x878   :  { %v2377_v43 = vsel %vm181_vm1, %v2370_v22, 0.0 }
 0x879   :  { %v2232_v14 = vpop.f32.mrf.mxu1  ;;  %2378 = vadd.xlane.f32.xlu2 %v2377_v43 }
 0x87a   :  { %v2233_v9 = vadd.f32 %v3194_v18, %v2232_v14 }
 0x87c   :  { %v4763_v19 = vmax.f32 %v2233_v9, 0.0 }
 0x87e   :  { %v2371_v49 = vmul.f32 %v4763_v19, %v4763_v19 }
 0x880   :  { %v2380_v63 = vsel %vm181_vm1, %v2371_v49, 0.0 }
 0x881   :  { %2381 = vadd.xlane.f32.xlu0 %v2380_v63  ;;  %v2235_v26 = vpop.f32.mrf.mxu1 }
 0x882   :  { %v2236_v25 = vadd.f32 %v3194_v18, %v2235_v26 }
 0x884   :  { %v4770_v33 = vmax.f32 %v2236_v25, 0.0 }
 0x886   :  { %v2372_v11 = vmul.f32 %v4770_v33, %v4770_v33 }
 0x888   :  { %v2383_v5 = vsel %vm181_vm1, %v2372_v11, 0.0 }
 0x889   :  { %2398 = vadd.xlane.f32.xlu0 %v2397_v30  ;;  %2384 = vadd.xlane.f32.xlu1 %v2383_v5  ;;  %v2238_v38 = vpop.f32.mrf.mxu1 }
 0x88a   :  { %v2239_v0 = vadd.f32 %v3194_v18, %v2238_v38  ;;  %v2402_v18 = vpop.xlane.xlu1 %2401 }
 0x88c   :  { %v4781_v10 = vmax.f32 %v2239_v0, 0.0 }
 0x88e   :  { %v2373_v37 = vmul.f32 %v4781_v10, %v4781_v10 }
 0x890   :  { %v2386_v6 = vsel %vm181_vm1, %v2373_v37, 0.0 }
 0x891   :  { %2375 = vadd.xlane.f32.xlu1 %v2374_v17  ;;  %2387 = vadd.xlane.f32.xlu2 %v2386_v6 }
 0x899   :  { %2395 = vadd.xlane.f32.xlu2 %v2394_v51 }
 0x8ec   :  { %v2379_v56 = vpop.xlane.xlu2 %2378 }
 0x8f4   :  { %v2382_v35 = vpop.xlane.xlu0 %2381 }
 0x8f5   :  { %v2411_v44 = vadd.f32 %v2402_v18, %v2382_v35 }
 0x8f7   :  { %v2416_v15 = vmax.f32 %v2411_v44, 1e-24 }
 0x8f9   :  { %3384 = vrsqrt.f32 %v2416_v15  ;;  %vm2445_vm15 = vweird.f32 %v2416_v15 }
 0x8fc   :  { %v2399_v23 = vpop.xlane.xlu0 %2398  ;;  %v2385_v22 = vpop.xlane.xlu1 %2384 }
 0x8fd   :  { %v2410_v43 = vadd.f32 %v2399_v23, %v2379_v56  ;;  %v2412_v14 = vadd.f32 %v2405_v4, %v2385_v22 }
 0x8ff   :  { %v2415_v9 = vmax.f32 %v2410_v43, 1e-24  ;;  %v2417_v60 = vmax.f32 %v2412_v14, 1e-24  ;;  %v3385_v49 = vpop.eup %3384  ;;  %v3161_v43 = vld [vmem:[%s4960_s8 + $0x30] sm:$0xff]  ;;  %v3170_v14 = vld [vmem:[%s4960_s8 + $0xe8] sm:$0xff] }
 0x900   :  { %v2440_v25 = vmul.f32 %v3385_v49, %v2416_v15  ;;  %vm2446_vm11 = vweird.f32 %v3385_v49 }
 0x901   :  { %3386 = vrsqrt.f32 %v2415_v9  ;;  %vm2455_vm12 = vweird.f32 %v2417_v60  ;;  %vm2447_vm4 = vmor %vm2445_vm15, %vm2446_vm11  ;;  %vm2435_vm5 = vweird.f32 %v2415_v9 }
 0x902   :  { %3388 = vrsqrt.f32 %v2417_v60  ;;  %v2441_v11 = vmul.f32 %v3385_v49, %v2440_v25  ;;  %v3179_v25 = vld [vmem:[%s4960_s8 + $0x58] sm:$0xff] }
 0x903   :  { %2756 = vmatpush.msra.mxu1 %v3179_v25 }
 0x904   :  { %v2388_v39 = vpop.xlane.xlu2 %2387  ;;  %v2376_v30 = vpop.xlane.xlu1 %2375  ;;  %v2442_v37 = vmul.f32 0.5, %v2441_v11  ;;  %v3177_v11 = vld [vmem:[%s4960_s8 + $0x48] sm:$0xff] }
 0x905   :  { %v2413_v40 = vadd.f32 %v2408_v41, %v2388_v39  ;;  %v3159_v39 = vld [vmem:[%s4960_s8 + $0x20] sm:$0xff] }
 0x906   :  { %v2443_v51 = vsub.f32 1.5, %v2442_v37  ;;  %v3183_v37 = vld [vmem:[%s4960_s8 + $0xb0] sm:$0xff] }
 0x907   :  { %v3387_v16 = vpop.eup %3386  ;;  %v2418_v63 = vmax.f32 %v2413_v40, 1e-24  ;;  %v3166_v40 = vld [vmem:[%s4960_s8 + $0x90] sm:$0xff] }
 0x908   :  { %v3389_v26 = vpop.eup %3388  ;;  %v2430_v61 = vmul.f32 %v3387_v16, %v2415_v9  ;;  %v2444_v29 = vmul.f32 %v3385_v49, %v2443_v51  ;;  %vm2436_vm2 = vweird.f32 %v3387_v16  ;;  %v3169_v9 = vld [vmem:[%s4960_s8 + $0xe0] sm:$0xff]  ;;  %v2597_v51 = vpop.f32.mrf.mxu3 }
 0x909   :  { %v2450_v54 = vmul.f32 %v3389_v26, %v2417_v60  ;;  %3390 = vrsqrt.f32 %v2418_v63  ;;  %vm2456_vm9 = vweird.f32 %v3389_v26  ;;  %vm2465_vm14 = vweird.f32 %v2418_v63  ;;  %vm2437_vm6 = vmor %vm2435_vm5, %vm2436_vm2  ;;  %v3160_v60 = vld [vmem:[%s4960_s8 + $0x28] sm:$0xff] }
 0x90a   :  { %v2431_v0 = vmul.f32 %v3387_v16, %v2430_v61  ;;  %vm2457_vm13 = vmor %vm2455_vm12, %vm2456_vm9  ;;  %v2448_v24 = vsel %vm2447_vm4, %v3385_v49, %v2444_v29  ;;  %v3167_v49 = vld [vmem:[%s4960_s8 + $0x98] sm:$0xff]  ;;  %v3178_v61 = vld [vmem:[%s4960_s8 + $0x50] sm:$0xff] }
 0x90b   :  { %v2451_v31 = vmul.f32 %v3389_v26, %v2450_v54  ;;  %v2471_v15 = vmul.f32 %v2448_v24, %v4763_v19  ;;  %v3188_v54 = vld [vmem:[%s4960_s8 + $0x110] sm:$0xff]  ;;  %2757 = vmatpush.msra.mxu1 %v3178_v61 }
 0x90c   :  { %v2396_v5 = vpop.xlane.xlu2 %2395  ;;  %v2432_v17 = vmul.f32 0.5, %v2431_v0 }
 0x90d   :  { %v2409_v38 = vadd.f32 %v2396_v5, %v2376_v30  ;;  %v2452_v21 = vmul.f32 0.5, %v2451_v31  ;;  %v3187_v31 = vld [vmem:[%s4960_s8 + $0x108] sm:$0xff]  ;;  %v3186_v30 = vld [vmem:[%s4960_s8 + $0x100] sm:$0xff]  ;;  %2758 = vmatpush.msra.mxu1 %v3177_v11 }
 0x90e   :  { %v2433_v27 = vsub.f32 1.5, %v2432_v17  ;;  %v3176_v5 = vld [vmem:[%s4960_s8 + $0x40] sm:$0xff] }
 0x90f   :  { %v3391_v42 = vpop.eup %3390  ;;  %v2414_v62 = vmax.f32 %v2409_v38, 1e-24  ;;  %v2453_v6 = vsub.f32 1.5, %v2452_v21  ;;  %2759 = vmatpush.msra.mxu1 %v3176_v5 }
 0x910   :  { %v2460_v53 = vmul.f32 %v3391_v42, %v2418_v63  ;;  %vm2466_vm10 = vweird.f32 %v3391_v42  ;;  %v2434_v41 = vmul.f32 %v3387_v16, %v2433_v27  ;;  %v3189_v63 = vld [vmem:[%s4960_s8 + $0x118] sm:$0xff] }
 0x911   :  { %3392 = vrsqrt.f32 %v2414_v62  ;;  %v2454_v55 = vmul.f32 %v3389_v26, %v2453_v6  ;;  %vm2467_vm3 = vmor %vm2465_vm14, %vm2466_vm10  ;;  %vm2425_vm8 = vweird.f32 %v2414_v62 }
 0x912   :  { %v2461_v46 = vmul.f32 %v3391_v42, %v2460_v53  ;;  %v2438_v44 = vsel %vm2437_vm6, %v3387_v16, %v2434_v41  ;;  %v3165_v16 = vld [vmem:[%s4960_s8 + $0x88] sm:$0xff] }
 0x913   :  { %v2458_v20 = vsel %vm2457_vm13, %v3389_v26, %v2454_v55  ;;  %v2470_v56 = vmul.f32 %v2438_v44, %v4757_v2  ;;  %v3195_v2 = vld [vmem:[%s4959_s9] ss:$0 sm:$0xff]  ;;  %v3182_v53 = vld [vmem:[%s4960_s8 + $0xa8] sm:$0xff] }
 0x914   :  { %v2462_v58 = vmul.f32 0.5, %v2461_v46  ;;  %v2472_v4 = vmul.f32 %v2458_v20, %v4770_v33  ;;  %v2477_v18 = vmul.f32 %v2458_v20, %v4715_v50  ;;  %v2475_v33 = vmul.f32 %v2438_v44, %v4768_v32  ;;  %v3164_v26 = vld [vmem:[%s4960_s8 + $0x80] sm:$0xff] }
 0x915   :  { %v3181_v46 = vld [vmem:[%s4960_s8 + $0xa0] sm:$0xff] }
 0x916   :  { %v2463_v28 = vsub.f32 1.5, %v2462_v58 }
 0x917   :  { %v3393_v1 = vpop.eup %3392 }
 0x918   :  { %v2464_v36 = vmul.f32 %v3391_v42, %v2463_v28  ;;  %v2420_v45 = vmul.f32 %v3393_v1, %v2414_v62  ;;  %vm2426_vm7 = vweird.f32 %v3393_v1  ;;  %v3184_v62 = vld [vmem:[%s4960_s8 + $0xb8] sm:$0xff] }
 0x919   :  { %vm2427_vm9 = vmor %vm2425_vm8, %vm2426_vm7 }
 0x91a   :  { %v2421_v7 = vmul.f32 %v3393_v1, %v2420_v45  ;;  %v2468_v8 = vsel %vm2467_vm3, %v3391_v42, %v2464_v36 }
 0x91b   :  { %v2473_v52 = vmul.f32 %v2468_v8, %v4781_v10  ;;  %v2478_v12 = vmul.f32 %v2468_v8, %v4722_v59  ;;  %v2476_v10 = vmul.f32 %v2448_v24, %v4729_v3  ;;  %v2536_v3 = vpop.f32.mrf.mxu0  ;;  %v2826_v24 = vstv %s4962_s18 }
 0x91c   :  { %v2422_v13 = vmul.f32 0.5, %v2421_v7  ;;  %v2542_v19 = vadd.f32 %v3195_v2, %v2536_v3 }
 0x91d   :  { %2612 = vmatpush.msrb.mxu0 %v2473_v52  ;;  %2723 = vmatpush.msra.mxu2 %v2478_v12 }
 0x91e   :  { %v2423_v35 = vsub.f32 1.5, %v2422_v13  ;;  %v2824_v13 = vld [vmem:[%s4961_s10] sm:$0x1] }
 0x91f   :  { %2613 = vmatpush.msrb.mxu0 %v2472_v4  ;;  %2724 = vmatpush.msra.mxu2 %v2477_v18 }
 0x920   :  { %v2424_v59 = vmul.f32 %v3393_v1, %v2423_v35 }
 0x921   :  { %2614 = vmatpush.msrb.mxu0 %v2471_v15  ;;  %2725 = vmatpush.msra.mxu2 %v2476_v10 }
 0x922   :  { %v2428_v23 = vsel %vm2427_vm9, %v3393_v1, %v2424_v59 }
 0x923   :  { %2615 = vmatpush.msrb.mxu0 %v2470_v56  ;;  %2726 = vmatpush.msra.mxu2 %v2475_v33  ;;  %v2469_v50 = vmul.f32 %v2428_v23, %v4776_v57  ;;  %v2474_v22 = vmul.f32 %v2428_v23, %v4789_v47  ;;  %v2568_v32 = vpop.f32.mrf.mxu0  ;;  %v3172_v47 = vld [vmem:[%s4960_s8 + $0xf8] sm:$0xff] }
 0x924   :  { %v4854_v57 = vadd.f32 %v2568_v32, %v2542_v19 }
 0x925   :  { %2616 = vmatpush.msrb.mxu0 %v2469_v50  ;;  %2727 = vmatpush.msra.mxu2 %v2474_v22 }
 0x926   :  { %3157 = vmatmul.msk.f32.vlgmr.msrb.gmra.mxu0 %vm79_vm0, %v4741_v48  ;;  %3174 = vmatmul.msk.f32.vlgmr.msra.gmra.mxu2 %vm79_vm0, %v4741_v48  ;;  %v3171_v48 = vld [vmem:[%s4960_s8 + $0xf0] sm:$0xff]  ;;  %v2600_v27 = vadd.f32 %v2597_v51, %v4854_v57 }
 0x927   :  { %2703 = vmatpush.msra.mxu0 %v3172_v47 }
 0x929   :  { %2704 = vmatpush.msra.mxu0 %v3171_v48 }
 0x92b   :  { %2705 = vmatpush.msra.mxu0 %v3170_v14 }
 0x92d   :  { %2706 = vmatpush.msra.mxu0 %v3169_v9 }
 0x92e   :  { %3158 = vmatmul.msk.f32.gmra.mxu0 %vm79_vm0, %v4749_v34  ;;  %3175 = vmatmul.msk.f32.gmra.mxu2 %vm79_vm0, %v4749_v34  ;;  %v3162_v34 = vld [vmem:[%s4960_s8 + $0x38] sm:$0xff]  ;;  %vm2827_vm0 = vcmask 64512  }
 0x92f   :  { %2645 = vmatpush.msrb.mxu3 %v3162_v34  ;;  %2814 = vmatpush.msrb.mxu0 %v3189_v63 }
 0x931   :  { %2646 = vmatpush.msrb.mxu3 %v3161_v43  ;;  %2815 = vmatpush.msrb.mxu0 %v3188_v54 }
 0x933   :  { %2647 = vmatpush.msrb.mxu3 %v3160_v60  ;;  %2816 = vmatpush.msrb.mxu0 %v3187_v31 }
 0x935   :  { %2648 = vmatpush.msrb.mxu3 %v3159_v39  ;;  %2817 = vmatpush.msrb.mxu0 %v3186_v30 }
 0x937   :  { %2674 = vmatpush.msra.mxu3 %v3167_v49 }
 0x939   :  { %2675 = vmatpush.msra.mxu3 %v3166_v40 }
 0x93b   :  { %2676 = vmatpush.msra.mxu3 %v3165_v16 }
 0x93d   :  { %2677 = vmatpush.msra.mxu3 %v3164_v26 }
 0x9a3   :  { %v2618_v38 = vpop.f32.mrf.mxu0 }
 0x9a4   :  { %3173 = vmatmul.msk.f32.vlgmr.msra.gmra.mxu0 %vm181_vm1, %v2618_v38 }
 0x9a9   :  { %v2729_v0 = vpop.f32.mrf.mxu2 }
 0x9ab   :  { %v2621_v21 = vpop.f32.mrf.mxu0 }
 0x9ac   :  { %v2624_v42 = vmul.f32 %v2621_v21, %v2618_v38  ;;  %3190 = vmatmul.msk.f32.vlgmr.msrb.gmra.mxu0 %vm181_vm1, %v2729_v0 }
 0x9ae   :  { %3163 = vmatmul.msk.f32.vlgmr.msrb.gmra.mxu3 %vm181_vm1, %v2624_v42 }
 0x9af   :  { %2785 = vmatpush.msrb.mxu3 %v3184_v62 }
 0x9b1   :  { %2786 = vmatpush.msrb.mxu3 %v3183_v37  ;;  %v2732_v17 = vpop.f32.mrf.mxu2 }
 0x9b2   :  { %v2735_v6 = vmul.f32 %v2732_v17, %v2729_v0 }
 0x9b3   :  { %2787 = vmatpush.msrb.mxu3 %v3182_v53 }
 0x9b4   :  { %3180 = vmatmul.msk.f32.vlgmr.msra.gmra.mxu1 %vm181_vm1, %v2735_v6 }
 0x9b5   :  { %2788 = vmatpush.msrb.mxu3 %v3181_v46 }
 0x9b6   :  { %3168 = vmatmul.msk.f32.vlgmr.msra.gmra.mxu3 %vm181_vm1, %v2621_v21 }
 0x9be   :  { %3185 = vmatmul.msk.f32.vlgmr.msrb.gmra.mxu3 %vm181_vm1, %v2732_v17  ;;  %vm2854_vm1 = vcmask 57344  }
 0xa21   :  { %v2708_v36 = vpop.f32.mrf.mxu0 }
 0xa29   :  { %v2819_v41 = vpop.f32.mrf.mxu0 }
 0xa31   :  { %v2650_v58 = vpop.f32.mrf.mxu3  ;;  %v2761_v29 = vpop.f32.mrf.mxu1 }
 0xa32   :  { %v2653_v28 = vadd.f32 %v2650_v58, %v2600_v27 }
 0xa39   :  { %v2679_v55 = vpop.f32.mrf.mxu3 }
 0xa3a   :  { %v2682_v1 = vadd.f32 %v2679_v55, %v2653_v28 }
 0xa3c   :  { %v2711_v45 = vadd.f32 %v2708_v36, %v2682_v1 }
 0xa3e   :  { %v2764_v7 = vadd.f32 %v2761_v29, %v2711_v45 }
 0xa41   :  { %v2790_v8 = vpop.f32.mrf.mxu3 }
 0xa42   :  { %v2793_v20 = vadd.f32 %v2790_v8, %v2764_v7 }
 0xa44   :  { %v2822_v52 = vadd.f32 %v2819_v41, %v2793_v20 }
 0xa46   :  { %v2823_v12 = vmax.f32 %v2822_v52, 0.0 }
 0xa48   :  { %3191 = vmatpush.xpose.msk.msrb.mxu1 %vm2827_vm0, %v2823_v12 }
 0xa4b   :  { %3192 = vmatmul.msk.f32.vlgmr.msrb.gmra.mxu1 %vm2827_vm0, %v2824_v13 }
 0xac8   :  { %v2851_v4 = vpop.f32.mrf.mxu1 }
 0xac9   :  { %v2852_v18 = vadd.f32 %v2851_v4, %v2826_v24 }
 0xacb   :  { %2855 = vst.msk [vmem:[%s4963_s19] sm:$0x1] %vm2854_vm1, %v2852_v18 }

</bundles_post_ra>
